<compile_context>
chip_gen: v7x
topology: tpu7x:2x2x1
jax: 0.10.0
libtpu: 0.0.40
codegen_flags: <defaults>
</compile_context>

<pallas_src>
import jax
import jax.numpy as jnp
from jax.experimental import pallas as pl
from jax.experimental.pallas import tpu as pltpu


def _round_up(x: int, m: int) -> int:
    return ((x + m - 1) // m) * m


def _sublane_for(dtype) -> int:
    # vregs pack sub-32-bit dtypes along sublanes:
    # f32 -> (8,128), bf16/f16 -> (16,128), int8/fp8 -> (32,128).
    return {4: 8, 2: 16, 1: 32}.get(jnp.dtype(dtype).itemsize, 8)


def _target_block_bytes() -> int:
    # v6e/v7x: ~4 MiB blocks (double-buffered in+out = 16 MiB < 32 MiB scoped
    # default).  v5e / unknown: ~2 MiB blocks (8 MiB < 16 MiB scoped default).
    try:
        kind = jax.devices()[0].device_kind.lower()
    except Exception:
        kind = ""
    if ("v6" in kind) or ("v7" in kind) or ("7x" in kind):
        return 4 << 20
    return 2 << 20


def _mish_kernel(x_ref, o_ref):
    x = x_ref[...].astype(jnp.float32)
    # tanh(softplus(x)) = (e^{2x} + 2 e^x) / (e^{2x} + 2 e^x + 2).
    # Clamp the exponent at 20 (PyTorch softplus threshold): for x > 20 the
    # ratio is 1.0 to f32 precision, so out == x, matching the linear branch.
    u = jnp.exp(jnp.minimum(x, 20.0))
    num = u * (u + 2.0)                    # e^{2x} + 2 e^x
    den = num + 2.0
    r = pl.reciprocal(den, approx=True)    # EUP slot, near-free
    r = r * (2.0 - den * r)                # one Newton step (VPU) -> ~f32 exact
    o_ref[...] = (x * num * r).astype(o_ref.dtype)


def _mish_ref(x: jax.Array) -> jax.Array:
    """Plain-jnp Mish (PyTorch softplus beta=1, threshold=20 semantics)."""
    xf = x.astype(jnp.float32)
    sp = jnp.where(xf > 20.0, xf, jnp.log1p(jnp.exp(jnp.minimum(xf, 20.0))))
    return (xf * jnp.tanh(sp)).astype(x.dtype)


def _run_pallas_2d(x2d: jax.Array, block_rows, donate: bool) -> jax.Array:
    rows, lanes = x2d.shape
    dtype = x2d.dtype
    itemsize = jnp.dtype(dtype).itemsize
    sub = _sublane_for(dtype)

    if block_rows is None:
        block_rows = max(sub, _target_block_bytes() // (lanes * itemsize))
    # Never make the block taller than the (sublane-rounded) array; Pallas
    # masks the ragged last block, so rows need not divide evenly.
    br = min(int(block_rows), _round_up(rows, sub))
    br = max(sub, _round_up(br, sub))
    grid = (pl.cdiv(rows, br),)

    total = rows * lanes
    cost = pl.CostEstimate(flops=6 * total,
                           transcendentals=total,
                           bytes_accessed=2 * total * itemsize)

    extra = {}
    if donate:
        # Only beneficial when the caller actually donates the buffer;
        # otherwise XLA inserts a defensive copy.
        extra["input_output_aliases"] = {0: 0}

    return pl.pallas_call(
        _mish_kernel,
        out_shape=jax.ShapeDtypeStruct((rows, lanes), dtype),
        grid=grid,
        in_specs=[pl.BlockSpec((br, lanes), lambda i: (i, 0))],
        out_specs=pl.BlockSpec((br, lanes), lambda i: (i, 0)),
        compiler_params=pltpu.CompilerParams(
            # "parallel" lets multi-TensorCore chips shard grid steps;
            # no-op elsewhere.
            dimension_semantics=("parallel",),
        ),
        cost_estimate=cost,
        **extra,
    )(x2d)


def mish_features(feats: jax.Array, *, block_rows=None,
                  min_pallas_elements: int = 65536,
                  donate: bool = False) -> jax.Array:
    """Apply Mish elementwise to a sparse-tensor feature matrix of any shape."""
    total = feats.size
    if total == 0:
        return feats
    if total < min_pallas_elements:
        # Launch + repack overhead dominates for tiny feature matrices.
        return _mish_ref(feats)

    orig_shape = feats.shape

    # Path 1: already lane dense -> run directly on (N, C), zero repack.
    if (feats.ndim == 2 and feats.shape[1] % 128 == 0
            and feats.shape[1] <= 8192):
        return _run_pallas_2d(feats, block_rows, donate)

    # Path 2: flatten and view as (rows, lanes) with the widest lane count in
    # {512, 256, 128} that divides the element count -> no pad, no slice.
    flat = feats.reshape(-1)
    lanes = next((l for l in (512, 256, 128) if total % l == 0), None)
    if lanes is not None:
        out = _run_pallas_2d(flat.reshape(total // lanes, lanes),
                             block_rows, donate)
        return out.reshape(orig_shape)

    # Path 3 (rare): pad the tail only (< 512 dead elements), then slice back.
    lanes = 512
    rows = pl.cdiv(total, lanes)
    padded = rows * lanes
    flat = jnp.pad(flat, (0, padded - total))
    out = _run_pallas_2d(flat.reshape(rows, lanes), block_rows, donate)
    return out.reshape(-1)[:total].reshape(orig_shape)


def minkowski_mish(features: jax.Array, coords: jax.Array, **kwargs):
    """Pallas equivalent of MinkowskiMish.forward.

    Returns (new_features, coords): coords are passed through unchanged,
    mirroring ME.SparseTensor(out, coords_key=..., coords_manager=...).
    """
    # TODO(synk): ME.SparseTensor / coords_manager bookkeeping has no Pallas
    # equivalent; features + coords are carried as plain arrays.
    return mish_features(features, **kwargs), coords


if __name__ == "__main__":
    key = jax.random.PRNGKey(0)
    k1, k2, k3, kc = jax.random.split(key, 4)

    # Case 1: small sparse tensor (jnp fallback path): 128 points, 32 channels.
    feats_small = jax.random.normal(k1, (128, 32), dtype=jnp.float32) * 5.0
    coords = jax.random.randint(kc, (128, 4), 0, 16, dtype=jnp.int32)
    out_small, out_coords = minkowski_mish(feats_small, coords)

    # Case 2: lane-dense path (C % 128 == 0) -> Pallas kernel, no repack.
    feats_dense = jax.random.normal(k2, (2048, 128), dtype=jnp.float32) * 5.0
    out_dense = mish_features(feats_dense)

    # Case 3: repack path (C = 96; lanes = 256 divides N*C) -> Pallas kernel.
    feats_odd = jax.random.normal(k3, (1000, 96), dtype=jnp.float32) * 5.0
    out_odd = mish_features(feats_odd)

    jax.block_until_ready((out_small, out_dense, out_odd))

    for got, x in ((out_small, feats_small),
                   (out_dense, feats_dense),
                   (out_odd, feats_odd)):
        ref = _mish_ref(x)
        assert got.shape == x.shape and got.dtype == x.dtype
        assert jnp.allclose(got, ref, atol=1e-4, rtol=1e-4), (
            float(jnp.max(jnp.abs(got - ref))))
    assert (out_coords == coords).all()

    print("KERNEL_OK")
</pallas_src>

<mosaic_0001>
module attributes {stable_mosaic.version = 11 : i64} {
  func.func @_mish_kernel(%arg0: i32, %arg1: memref<2048x128xf32, #tpu.memory_space<vmem>>, %arg2: memref<2048x128xf32, #tpu.memory_space<vmem>>) attributes {dimension_semantics = [#tpu.dimension_semantics<parallel>], iteration_bounds = array<i64: 1>, scalar_prefetch = 0 : i64, scratch_operands = 0 : i64, tpu.core_type = #tpu.core_type<tc>, window_params = [{transform_indices = @transform_0, window_bounds = array<i64: 2048, 128>}, {transform_indices = @transform_1, window_bounds = array<i64: 2048, 128>}]} {
    %c0 = arith.constant 0 : index
    %c0_0 = arith.constant 0 : index
    %0 = vector.load %arg1[%c0, %c0_0] : memref<2048x128xf32, #tpu.memory_space<vmem>>, vector<2048x128xf32>
    %cst = arith.constant 2.000000e+01 : f32
    %1 = vector.broadcast %cst : f32 to vector<2048x128xf32>
    %2 = arith.minimumf %0, %1 : vector<2048x128xf32>
    %3 = math.exp %2 : vector<2048x128xf32>
    %cst_1 = arith.constant 2.000000e+00 : f32
    %4 = vector.broadcast %cst_1 : f32 to vector<2048x128xf32>
    %5 = arith.addf %3, %4 : vector<2048x128xf32>
    %6 = arith.mulf %3, %5 : vector<2048x128xf32>
    %cst_2 = arith.constant 2.000000e+00 : f32
    %7 = vector.broadcast %cst_2 : f32 to vector<2048x128xf32>
    %8 = arith.addf %6, %7 : vector<2048x128xf32>
    %9 = tpu.reciprocal %8 {approx = true} : vector<2048x128xf32> -> vector<2048x128xf32>
    %10 = arith.mulf %8, %9 : vector<2048x128xf32>
    %cst_3 = arith.constant 2.000000e+00 : f32
    %11 = vector.broadcast %cst_3 : f32 to vector<2048x128xf32>
    %12 = arith.subf %11, %10 : vector<2048x128xf32>
    %13 = arith.mulf %9, %12 : vector<2048x128xf32>
    %14 = arith.mulf %0, %6 : vector<2048x128xf32>
    %15 = arith.mulf %14, %13 : vector<2048x128xf32>
    %c0_4 = arith.constant 0 : index
    %c0_5 = arith.constant 0 : index
    %16 = vector.load %arg2[%c0_4, %c0_5] : memref<2048x128xf32, #tpu.memory_space<vmem>>, vector<2048x128xf32>
    tpu.vector_store %arg2[%c0_4, %c0_5], %15 {strides = array<i32>} : memref<2048x128xf32, #tpu.memory_space<vmem>>, vector<2048x128xf32>,
    return
  }
  func.func @transform_0(%arg0: i32) -> (i32, i32) {
    %c0_i32 = arith.constant 0 : i32
    %c0_i32_0 = arith.constant 0 : i32
    return %arg0, %c0_i32 : i32, i32
  }
  func.func @transform_1(%arg0: i32) -> (i32, i32) {
    %c0_i32 = arith.constant 0 : i32
    %c0_i32_0 = arith.constant 0 : i32
    return %arg0, %c0_i32 : i32, i32
  }
}

</mosaic_0001>

<bundles_post_ra>
// kernel: tpu_custom_call.1
= control target key start
LH: loop header
LB: loop body
LE: loop exit
PB: predicated region body
PF: predicated region fallthrough
CT: control target
= control target key end

     0   :  { %6 = vsyncpa [#allocation3], 0  ;;  %s7565_s0 = inlined_call_operand.hbm [shape: f32[2048,128], index: 0, kind: input, shape index: {}]   ;;  %s7566_s1 = inlined_call_operand.hbm [shape: f32[2048,128], index: 1, kind: output, shape index: {}]  }
   0x1   :  { %7 = vsyncpa [#allocation4], 0  ;;  %s4700_s6 = smov [#allocation2]   ;;  %s4652_s10 = scalar_lea.hbm %s7565_s0, 32768 }
   0x2   :  { %s13_s7 = sshll.u32 %s4700_s6, 4  ;;  %p4653_p0 = scmp.ne.s32.totalorder %s7565_s0, %s4652_s10  ;;  %s14_s7 = int_to_ptr.vmem [resolvable:$true] %s13_s7 }
   0x3   :  { %p4656_p1 = scmp.lt.u32.totalorder %s4652_s10, %s7565_s0 }
   0x5   :  { %p4658_p2 = pnand %p4656_p1, %p4653_p0 }
   0x7   :  { %4661 = shalt.err (!%p4658_p2)
}
   0x8   :  { %s4662_s15 = scalar_lea.vmem %s14_s7, 32768  ;;  %p4667_p4 = scmp.lt.s32.totalorder %s14_s7, %s14_s7 }
   0x9   :  { %p4663_p3 = scmp.ne.s32.totalorder %s14_s7, %s4662_s15  ;;  %p4668_p5 = scmp.lt.s32.totalorder %s4662_s15, %s4662_s15 }
   0xb   :  { %p4669_p6 = por %p4668_p5, %p4667_p4 }
   0xd   :  { %p4670_p7 = pnand %p4669_p6, %p4663_p3 }
   0xf   :  { %4673 = shalt.err (!%p4670_p7)
}
  0x10   :  { %s4701_s16 = smov 128   ;;  %s4702_s17 = smov 8  }
  0x11   :  { %19 = dma.hbm_to_vmem [thread:$0]  %s7565_s0, 32768, %s14_s7, [#allocation3], %s4701_s16, %s4701_s16, %s4702_s17  }
  0x12   :  { %4696 = dma.done.wait [#allocation3], 32768  }
  0x13   :  { %4697 = vsyncadd [#allocation3], 4294934528  ;;  %v4729_v0 = vld [vmem:[#allocation2] sm:$0xff]  ;;  %v4731_v1 = vld [vmem:[#allocation2 + $0x8] sm:$0xff]  ;;  %s4703_s0 = smov [#allocation5]  }
  0x14   :  { %v4733_v2 = vld [vmem:[#allocation2 + $0x10] sm:$0xff]  ;;  %v279_v3 = vmin.f32 %v4729_v0, 20.0  ;;  %v280_v4 = vmin.f32 %v4731_v1, 20.0  ;;  %v4738_v6 = vld [vmem:[#allocation2 + $0x18] sm:$0xff]  ;;  %v4740_v7 = vld [vmem:[#allocation2 + $0x20] sm:$0xff]  ;;  %s3612_s20 = sshll.u32 %s4703_s0, 4  ;;  %s3613_s20 = int_to_ptr.vmem [resolvable:$true] %s3612_s20 }
  0x15   :  { %v281_v5 = vmin.f32 %v4733_v2, 20.0  ;;  %v4742_v8 = vld [vmem:[#allocation2 + $0x28] sm:$0xff]  ;;  %v282_v9 = vmin.f32 %v4738_v6, 20.0  ;;  %v283_v10 = vmin.f32 %v4740_v7, 20.0  ;;  %v4747_v12 = vld [vmem:[#allocation2 + $0x30] sm:$0xff]  ;;  %v4749_v13 = vld [vmem:[#allocation2 + $0x38] sm:$0xff]  ;;  %p4679_p9 = scmp.lt.s32.totalorder %s3613_s20, %s3613_s20 }
  0x16   :  { %v284_v11 = vmin.f32 %v4742_v8, 20.0  ;;  %v4751_v14 = vld [vmem:[#allocation2 + $0x40] sm:$0xff]  ;;  %v535_v15 = vmul.f32 1.442695, %v279_v3  ;;  %v537_v16 = vmul.f32 1.442695, %v280_v4 }
  0x17   :  { %v539_v17 = vmul.f32 1.442695, %v281_v5  ;;  %v541_v18 = vmul.f32 1.442695, %v282_v9  ;;  %v543_v19 = vmul.f32 1.442695, %v283_v10 }
  0x18   :  { %v545_v20 = vmul.f32 1.442695, %v284_v11  ;;  %3628 = vpow2.f32 %v535_v15  ;;  %v285_v21 = vmin.f32 %v4747_v12, 20.0  ;;  %v286_v22 = vmin.f32 %v4749_v13, 20.0  ;;  %v4756_v24 = vld [vmem:[#allocation2 + $0x48] sm:$0xff]  ;;  %v4758_v25 = vld [vmem:[#allocation2 + $0x50] sm:$0xff] }
  0x19   :  { %v287_v23 = vmin.f32 %v4751_v14, 20.0  ;;  %v4760_v26 = vld [vmem:[#allocation2 + $0x58] sm:$0xff]  ;;  %3630 = vpow2.f32 %v537_v16  ;;  %v288_v27 = vmin.f32 %v4756_v24, 20.0  ;;  %v289_v28 = vmin.f32 %v4758_v25, 20.0  ;;  %v4765_v30 = vld [vmem:[#allocation2 + $0x60] sm:$0xff]  ;;  %v4767_v31 = vld [vmem:[#allocation2 + $0x68] sm:$0xff] }
  0x1a   :  { %v290_v29 = vmin.f32 %v4760_v26, 20.0  ;;  %v4769_v32 = vld [vmem:[#allocation2 + $0x70] sm:$0xff]  ;;  %3632 = vpow2.f32 %v539_v17  ;;  %v547_v33 = vmul.f32 1.442695, %v285_v21  ;;  %v549_v34 = vmul.f32 1.442695, %v286_v22 }
  0x1b   :  { %v551_v35 = vmul.f32 1.442695, %v287_v23  ;;  %3634 = vpow2.f32 %v541_v18  ;;  %v553_v36 = vmul.f32 1.442695, %v288_v27  ;;  %v555_v37 = vmul.f32 1.442695, %v289_v28 }
  0x1c   :  { %v557_v38 = vmul.f32 1.442695, %v290_v29  ;;  %3636 = vpow2.f32 %v543_v19  ;;  %v291_v39 = vmin.f32 %v4765_v30, 20.0  ;;  %v292_v40 = vmin.f32 %v4767_v31, 20.0  ;;  %v4774_v42 = vld [vmem:[#allocation2 + $0x78] sm:$0xff]  ;;  %v4776_v43 = vld [vmem:[#allocation2 + $0x80] sm:$0xff] }
  0x1d   :  { %v293_v41 = vmin.f32 %v4769_v32, 20.0  ;;  %v4778_v44 = vld [vmem:[#allocation2 + $0x88] sm:$0xff]  ;;  %3638 = vpow2.f32 %v545_v20  ;;  %v294_v45 = vmin.f32 %v4774_v42, 20.0  ;;  %v295_v46 = vmin.f32 %v4776_v43, 20.0  ;;  %v4783_v48 = vld [vmem:[#allocation2 + $0x90] sm:$0xff]  ;;  %v4785_v49 = vld [vmem:[#allocation2 + $0x98] sm:$0xff] }
  0x1e   :  { %v296_v47 = vmin.f32 %v4778_v44, 20.0  ;;  %7574 = vst [vmem:[#allocation8_spill] sm:$0xff] %v4785_v49  ;;  %v4787_v50 = vld [vmem:[#allocation2 + $0xa0] sm:$0xff]  ;;  %3640 = vpow2.f32 %v547_v33  ;;  %v559_v51 = vmul.f32 1.442695, %v291_v39  ;;  %v297_v57 = vmin.f32 %v4783_v48, 20.0 }
  0x1f   :  { %7575 = vst [vmem:[#allocation9_spill] sm:$0xff] %v4787_v50  ;;  %v561_v52 = vmul.f32 1.442695, %v292_v40  ;;  %v563_v53 = vmul.f32 1.442695, %v293_v41  ;;  %3642 = vpow2.f32 %v549_v34  ;;  %v298_v58 = vmin.f32 %v4785_v49, 20.0 }
  0x20   :  { %v4789_v54 = vmul.f32 1.442695, %v294_v45  ;;  %v4791_v55 = vmul.f32 1.442695, %v295_v46  ;;  %v4793_v56 = vmul.f32 1.442695, %v296_v47  ;;  %3644 = vpow2.f32 %v551_v35 }
  0x21   :  { %v299_v59 = vmin.f32 %v4787_v50, 20.0  ;;  %v4798_v60 = vld [vmem:[#allocation2 + $0xa8] sm:$0xff]  ;;  %v4800_v61 = vld [vmem:[#allocation2 + $0xb0] sm:$0xff]  ;;  %v4802_v62 = vld [vmem:[#allocation2 + $0xb8] sm:$0xff]  ;;  %3646 = vpow2.f32 %v553_v36  ;;  %v4811_v11 = vmul.f32 1.442695, %v297_v57 }
  0x22   :  { %7576 = vst [vmem:[#allocation10_spill] sm:$0xff] %v4798_v60  ;;  %7577 = vst [vmem:[#allocation11_spill] sm:$0xff] %v4800_v61  ;;  %v300_v63 = vmin.f32 %v4798_v60, 20.0  ;;  %v301_v3 = vmin.f32 %v4800_v61, 20.0  ;;  %v302_v4 = vmin.f32 %v4802_v62, 20.0  ;;  %v4807_v5 = vld [vmem:[#allocation2 + $0xc0] sm:$0xff]  ;;  %v3629_v10 = vpop.eup %3628  ;;  %3648 = vpow2.f32 %v555_v37 }
  0x23   :  { %7578 = vst [vmem:[#allocation12_spill] sm:$0xff] %v4802_v62  ;;  %7579 = vst [vmem:[#allocation13_spill] sm:$0xff] %v4807_v5  ;;  %v4809_v9 = vld [vmem:[#allocation2 + $0xc8] sm:$0xff]  ;;  %v4813_v15 = vmul.f32 1.442695, %v298_v58  ;;  %v3631_v17 = vpop.eup %3630  ;;  %v1047_v18 = vadd.f32 2.0, %v3629_v10  ;;  %3650 = vpow2.f32 %v557_v38 }
  0x24   :  { %7580 = vst [vmem:[#allocation14_spill] sm:$0xff] %v4809_v9  ;;  %v4815_v16 = vmul.f32 1.442695, %v299_v59  ;;  %v4817_v19 = vmul.f32 1.442695, %v300_v63  ;;  %v3633_v21 = vpop.eup %3632  ;;  %v1048_v22 = vadd.f32 2.0, %v3631_v17  ;;  %3652 = vpow2.f32 %v559_v51 }
  0x25   :  { %v4819_v20 = vmul.f32 1.442695, %v301_v3  ;;  %v4821_v23 = vmul.f32 1.442695, %v302_v4  ;;  %v303_v27 = vmin.f32 %v4807_v5, 20.0  ;;  %v3635_v28 = vpop.eup %3634  ;;  %v1303_v29 = vmul.f32 %v3629_v10, %v1047_v18  ;;  %s4674_s21 = scalar_lea.vmem %s3613_s20, 32768 }
  0x26   :  { %v1049_v33 = vadd.f32 2.0, %v3633_v21  ;;  %3654 = vpow2.f32 %v561_v52  ;;  %v3637_v35 = vpop.eup %3636  ;;  %v1304_v36 = vmul.f32 %v3631_v17, %v1048_v22  ;;  %v1050_v37 = vadd.f32 2.0, %v3635_v28  ;;  %p4675_p8 = scmp.ne.s32.totalorder %s3613_s20, %s4674_s21  ;;  %p4680_p10 = scmp.lt.s32.totalorder %s4674_s21, %s4674_s21 }
  0x27   :  { %3656 = vpow2.f32 %v563_v53  ;;  %v4825_v38 = vmul.f32 1.442695, %v303_v27  ;;  %v3639_v39 = vpop.eup %3638  ;;  %v4827_v40 = vadd.f32 2.0, %v1303_v29  ;;  %v4830_v41 = vmul.f32 %v1303_v29, %v4729_v0 }
  0x28   :  { %v1305_v45 = vmul.f32 %v3633_v21, %v1049_v33  ;;  %v1051_v46 = vadd.f32 2.0, %v3637_v35  ;;  %v3641_v47 = vpop.eup %3640  ;;  %v4832_v51 = vadd.f32 2.0, %v1304_v36  ;;  %v4835_v52 = vmul.f32 %v1304_v36, %v4731_v1  ;;  %p4681_p11 = por %p4680_p10, %p4679_p9 }
  0x29   :  { %v1306_v57 = vmul.f32 %v3635_v28, %v1050_v37  ;;  %v1052_v58 = vadd.f32 2.0, %v3639_v39  ;;  %v3643_v59 = vpop.eup %3642  ;;  %3658 = vrcp.f32 %v4827_v40 }
  0x2a   :  { %v4838_v53 = vadd.f32 2.0, %v1305_v45  ;;  %v4841_v63 = vmul.f32 %v1305_v45, %v4733_v2  ;;  %v1307_v0 = vmul.f32 %v3637_v35, %v1051_v46  ;;  %v3645_v3 = vpop.eup %3644  ;;  %3660 = vrcp.f32 %v4832_v51  ;;  %p4682_p12 = pnand %p4681_p11, %p4675_p8 }
  0x2b   :  { %v4844_v4 = vadd.f32 2.0, %v1306_v57  ;;  %v4847_v10 = vmul.f32 %v1306_v57, %v4738_v6  ;;  %v1308_v1 = vmul.f32 %v3639_v39, %v1052_v58  ;;  %v3647_v17 = vpop.eup %3646  ;;  %v1053_v2 = vadd.f32 2.0, %v3641_v47 }
  0x2c   :  { %3662 = vrcp.f32 %v4838_v53  ;;  %v4850_v18 = vadd.f32 2.0, %v1307_v0  ;;  %v4853_v21 = vmul.f32 %v1307_v0, %v4740_v7  ;;  %v3649_v22 = vpop.eup %3648  ;;  %v1054_v6 = vadd.f32 2.0, %v3643_v59 }
  0x2d   :  { %3664 = vrcp.f32 %v4844_v4  ;;  %v4856_v27 = vadd.f32 2.0, %v1308_v1  ;;  %v4859_v28 = vmul.f32 %v1308_v1, %v4742_v8  ;;  %v3651_v29 = vpop.eup %3650  ;;  %v1309_v33 = vmul.f32 %v3641_v47, %v1053_v2 }
  0x2e   :  { %3666 = vrcp.f32 %v4850_v18  ;;  %v1055_v35 = vadd.f32 2.0, %v3645_v3  ;;  %v1056_v36 = vadd.f32 2.0, %v3647_v17  ;;  %v3653_v37 = vpop.eup %3652  ;;  %v1310_v7 = vmul.f32 %v3643_v59, %v1054_v6 }
  0x2f   :  { %3668 = vrcp.f32 %v4856_v27  ;;  %v1057_v39 = vadd.f32 2.0, %v3649_v22  ;;  %v1058_v45 = vadd.f32 2.0, %v3651_v29  ;;  %v4863_v57 = vadd.f32 2.0, %v1309_v33 }
  0x30   :  { %v3655_v46 = vpop.eup %3654  ;;  %v4866_v58 = vmul.f32 %v1309_v33, %v4747_v12  ;;  %v1311_v8 = vmul.f32 %v3645_v3, %v1055_v35  ;;  %v1312_v0 = vmul.f32 %v3647_v17, %v1056_v36  ;;  %v4868_v34 = vadd.f32 2.0, %v1310_v7 }
  0x31   :  { %v3657_v1 = vpop.eup %3656  ;;  %v4871_v47 = vmul.f32 %v1310_v7, %v4749_v13  ;;  %v1313_v2 = vmul.f32 %v3649_v22, %v1057_v39  ;;  %v1314_v5 = vmul.f32 %v3651_v29, %v1058_v45  ;;  %3670 = vrcp.f32 %v4863_v57 }
  0x32   :  { %v4874_v59 = vadd.f32 2.0, %v1311_v8  ;;  %v4877_v6 = vmul.f32 %v1311_v8, %v4751_v14  ;;  %v4879_v62 = vadd.f32 2.0, %v1312_v0  ;;  %3672 = vrcp.f32 %v4868_v34 }
  0x33   :  { %v4883_v12 = vmul.f32 %v1312_v0, %v4756_v24  ;;  %v4885_v3 = vadd.f32 2.0, %v1313_v2  ;;  %v4888_v13 = vmul.f32 %v1313_v2, %v4758_v25  ;;  %v3659_v17 = vpop.eup %3658  ;;  %v4891_v22 = vadd.f32 2.0, %v1314_v5 }
  0x34   :  { %3674 = vrcp.f32 %v4874_v59  ;;  %v4894_v14 = vmul.f32 %v1314_v5, %v4760_v26  ;;  %v1059_v29 = vadd.f32 2.0, %v3653_v37  ;;  %v3661_v33 = vpop.eup %3660  ;;  %v2071_v35 = vmul.f32 %v3659_v17, %v4827_v40 }
  0x35   :  { %3676 = vrcp.f32 %v4879_v62  ;;  %v1060_v24 = vadd.f32 2.0, %v3655_v46  ;;  %v1061_v36 = vadd.f32 2.0, %v3657_v1  ;;  %v2072_v25 = vmul.f32 %v3661_v33, %v4832_v51 }
  0x36   :  { %v3663_v7 = vpop.eup %3662  ;;  %3678 = vrcp.f32 %v4885_v3  ;;  %v1315_v39 = vmul.f32 %v3653_v37, %v1059_v29  ;;  %v7581_v45 = vmin.f32 %v4809_v9, 20.0  ;;  %v2327_v5 = vsub.f32 2.0, %v2071_v35 }
  0x37   :  { %v3665_v26 = vpop.eup %3664  ;;  %v2073_v0 = vmul.f32 %v3663_v7, %v4838_v53  ;;  %3680 = vrcp.f32 %v4891_v22  ;;  %v1316_v40 = vmul.f32 %v3655_v46, %v1060_v24  ;;  %v2328_v61 = vsub.f32 2.0, %v2072_v25 }
  0x38   :  { %v4902_v8 = vmul.f32 1.442695, %v7581_v45  ;;  %v3667_v2 = vpop.eup %3666  ;;  %v2074_v60 = vmul.f32 %v3665_v26, %v4844_v4  ;;  %v4907_v50 = vadd.f32 2.0, %v1315_v39  ;;  %v4910_v51 = vmul.f32 %v1315_v39, %v4765_v30 }
  0x39   :  { %v3669_v37 = vpop.eup %3668  ;;  %v2583_v29 = vmul.f32 %v3659_v17, %v2327_v5  ;;  %v2329_v45 = vsub.f32 2.0, %v2073_v0  ;;  %v2075_v9 = vmul.f32 %v3667_v2, %v4850_v18  ;;  %v4913_v35 = vadd.f32 2.0, %v1316_v40 }
  0x3a   :  { %v2584_v53 = vmul.f32 %v3661_v33, %v2328_v61  ;;  %v2330_v49 = vsub.f32 2.0, %v2074_v60  ;;  %v2076_v46 = vmul.f32 %v3669_v37, %v4856_v27  ;;  %3682 = vrcp.f32 %v4907_v50 }
  0x3b   :  { %v3095_v4 = vmul.f32 %v4830_v41, %v2583_v29  ;;  %v2585_v24 = vmul.f32 %v3663_v7, %v2329_v45  ;;  %v2331_v25 = vsub.f32 2.0, %v2075_v9  ;;  %3684 = vrcp.f32 %v4913_v35  ;;  %v3671_v30 = vpop.eup %3670 }
  0x3c   :  { %v3096_v17 = vmul.f32 %v4835_v52, %v2584_v53  ;;  %v2586_v39 = vmul.f32 %v3665_v26, %v2330_v49  ;;  %v2332_v5 = vsub.f32 2.0, %v2076_v46  ;;  %v4921_v18 = vmul.f32 %v1316_v40, %v4767_v31  ;;  %v3673_v61 = vpop.eup %3672 }
  0x3d   :  { %3351 = vst [vmem:[#allocation5] sm:$0xff] %v3095_v4  ;;  %v3097_v60 = vmul.f32 %v4841_v63, %v2585_v24  ;;  %v2587_v27 = vmul.f32 %v3667_v2, %v2331_v25  ;;  %v2077_v33 = vmul.f32 %v3671_v30, %v4863_v57  ;;  %v1317_v41 = vmul.f32 %v3657_v1, %v1061_v36  ;;  %v4945_v24 = vld [vmem:[#allocation2 + $0xd0] sm:$0xff] }
  0x3e   :  { %v3675_v7 = vpop.eup %3674  ;;  %3352 = vst [vmem:[#allocation5 + $0x8] sm:$0xff] %v3096_v17  ;;  %v3098_v9 = vmul.f32 %v4847_v10, %v2586_v39  ;;  %v2588_v0 = vmul.f32 %v3669_v37, %v2332_v5  ;;  %v2078_v52 = vmul.f32 %v3673_v61, %v4868_v34  ;;  %3686 = vpow2.f32 %v4789_v54 }
  0x3f   :  { %v3677_v49 = vpop.eup %3676  ;;  %3353 = vst [vmem:[#allocation5 + $0x10] sm:$0xff] %v3097_v60  ;;  %v3099_v31 = vmul.f32 %v4853_v21, %v2587_v27  ;;  %v2333_v26 = vsub.f32 2.0, %v2077_v33  ;;  %v2079_v63 = vmul.f32 %v3675_v7, %v4874_v59  ;;  %v4930_v40 = vadd.f32 2.0, %v1317_v41 }
  0x40   :  { %v3679_v57 = vpop.eup %3678  ;;  %3354 = vst [vmem:[#allocation5 + $0x18] sm:$0xff] %v3098_v9  ;;  %v3100_v1 = vmul.f32 %v4859_v28, %v2588_v0  ;;  %v2334_v36 = vsub.f32 2.0, %v2078_v52  ;;  %v2080_v10 = vmul.f32 %v3677_v49, %v4879_v62  ;;  %v4935_v34 = vmul.f32 %v1317_v41, %v4769_v32 }
  0x41   :  { %v3681_v54 = vpop.eup %3680  ;;  %3355 = vst [vmem:[#allocation5 + $0x20] sm:$0xff] %v3099_v31  ;;  %v2589_v2 = vmul.f32 %v3671_v30, %v2333_v26  ;;  %v2335_v37 = vsub.f32 2.0, %v2079_v63  ;;  %v2081_v21 = vmul.f32 %v3679_v57, %v4885_v3  ;;  %3688 = vrcp.f32 %v4930_v40  ;;  %v4950_v30 = vld [vmem:[#allocation2 + $0xd8] sm:$0xff] }
  0x42   :  { %3356 = vst [vmem:[#allocation5 + $0x28] sm:$0xff] %v3100_v1  ;;  %v2590_v59 = vmul.f32 %v3673_v61, %v2334_v36  ;;  %v2336_v29 = vsub.f32 2.0, %v2080_v10  ;;  %v2082_v45 = vmul.f32 %v3681_v54, %v4891_v22  ;;  %3690 = vpow2.f32 %v4791_v55 }
  0x43   :  { %v3101_v62 = vmul.f32 %v4866_v58, %v2589_v2  ;;  %v2591_v28 = vmul.f32 %v3675_v7, %v2335_v37  ;;  %v2337_v32 = vsub.f32 2.0, %v2081_v21  ;;  %3692 = vpow2.f32 %v4793_v56 }
  0x44   :  { %v3683_v53 = vpop.eup %3682  ;;  %v3102_v46 = vmul.f32 %v4871_v47, %v2590_v59  ;;  %v2592_v4 = vmul.f32 %v3677_v49, %v2336_v29  ;;  %v2338_v3 = vsub.f32 2.0, %v2082_v45  ;;  %3694 = vpow2.f32 %v4811_v11  ;;  %v4973_v49 = vld [vmem:[#allocation2 + $0xf0] sm:$0xff] }
  0x45   :  { %v3685_v25 = vpop.eup %3684  ;;  %3357 = vst [vmem:[#allocation5 + $0x30] sm:$0xff] %v3101_v62  ;;  %v3103_v22 = vmul.f32 %v4877_v6, %v2591_v28  ;;  %v2593_v55 = vmul.f32 %v3679_v57, %v2337_v32  ;;  %v2083_v58 = vmul.f32 %v3683_v53, %v4907_v50  ;;  %3696 = vpow2.f32 %v4813_v15  ;;  %v4958_v6 = vld [vmem:[#allocation2 + $0xe0] sm:$0xff] }
  0x46   :  { %3358 = vst [vmem:[#allocation5 + $0x38] sm:$0xff] %v3102_v46  ;;  %v3104_v56 = vmul.f32 %v4883_v12, %v2592_v4  ;;  %v2594_v47 = vmul.f32 %v3681_v54, %v2338_v3  ;;  %v2084_v17 = vmul.f32 %v3685_v25, %v4913_v35  ;;  %3698 = vpow2.f32 %v4815_v16  ;;  %v4963_v16 = vld [vmem:[#allocation2 + $0xe8] sm:$0xff] }
  0x47   :  { %3359 = vst [vmem:[#allocation5 + $0x40] sm:$0xff] %v3103_v22  ;;  %v3105_v11 = vmul.f32 %v4888_v13, %v2593_v55  ;;  %v2339_v39 = vsub.f32 2.0, %v2083_v58  ;;  %3700 = vpow2.f32 %v4817_v19  ;;  %v305_v50 = vmin.f32 %v4945_v24, 20.0  ;;  %v7582_v58 = vld [vmem:[#allocation8_spill] sm:$0xff] }
  0x48   :  { %v3687_v15 = vpop.eup %3686  ;;  %3360 = vst [vmem:[#allocation5 + $0x48] sm:$0xff] %v3104_v56  ;;  %v3106_v5 = vmul.f32 %v4894_v14, %v2594_v47  ;;  %v2340_v12 = vsub.f32 2.0, %v2084_v17  ;;  %3702 = vpow2.f32 %v4819_v20  ;;  %v306_v35 = vmin.f32 %v4950_v30, 20.0 }
  0x49   :  { %3361 = vst [vmem:[#allocation5 + $0x50] sm:$0xff] %v3105_v11  ;;  %v2595_v13 = vmul.f32 %v3683_v53, %v2339_v39  ;;  %v1062_v61 = vadd.f32 2.0, %v3687_v15  ;;  %3704 = vpow2.f32 %v4821_v23  ;;  %v587_v19 = vmul.f32 1.442695, %v305_v50  ;;  %v7583_v11 = vld [vmem:[#allocation9_spill] sm:$0xff] }
  0x4a   :  { %3362 = vst [vmem:[#allocation5 + $0x58] sm:$0xff] %v3106_v5  ;;  %v2596_v60 = vmul.f32 %v3685_v25, %v2340_v12  ;;  %3706 = vpow2.f32 %v4825_v38  ;;  %v589_v27 = vmul.f32 1.442695, %v306_v35  ;;  %v307_v14 = vmin.f32 %v4958_v6, 20.0 }
  0x4b   :  { %v3689_v33 = vpop.eup %3688  ;;  %v3107_v20 = vmul.f32 %v4910_v51, %v2595_v13  ;;  %v1318_v41 = vmul.f32 %v3687_v15, %v1062_v61  ;;  %3708 = vpow2.f32 %v4902_v8  ;;  %v308_v7 = vmin.f32 %v4963_v16, 20.0 }
  0x4c   :  { %v3691_v9 = vpop.eup %3690  ;;  %v3108_v0 = vmul.f32 %v4921_v18, %v2596_v60  ;;  %v2085_v23 = vmul.f32 %v3689_v33, %v4930_v40  ;;  %3710 = vpow2.f32 %v587_v19  ;;  %v591_v52 = vmul.f32 1.442695, %v307_v14  ;;  %v7584_v14 = vld [vmem:[#allocation10_spill] sm:$0xff] }
  0x4d   :  { %v3693_v38 = vpop.eup %3692  ;;  %3363 = vst [vmem:[#allocation5 + $0x60] sm:$0xff] %v3107_v20  ;;  %v4975_v31 = vadd.f32 2.0, %v1318_v41  ;;  %v4978_v51 = vmul.f32 %v1318_v41, %v4774_v42  ;;  %v1063_v26 = vadd.f32 2.0, %v3691_v9  ;;  %3712 = vpow2.f32 %v589_v27 }
  0x4e   :  { %v3695_v8 = vpop.eup %3694  ;;  %3364 = vst [vmem:[#allocation5 + $0x68] sm:$0xff] %v3108_v0  ;;  %v2341_v63 = vsub.f32 2.0, %v2085_v23  ;;  %v1064_v57 = vadd.f32 2.0, %v3693_v38  ;;  %3714 = vpow2.f32 %v591_v52  ;;  %v593_v18 = vmul.f32 1.442695, %v308_v7  ;;  %v7585_v0 = vld [vmem:[#allocation11_spill] sm:$0xff] }
  0x4f   :  { %v3697_v40 = vpop.eup %3696  ;;  %3716 = vrcp.f32 %v4975_v31  ;;  %v1319_v1 = vmul.f32 %v3691_v9, %v1063_v26  ;;  %v1065_v36 = vadd.f32 2.0, %v3695_v8  ;;  %v309_v10 = vmin.f32 %v4973_v49, 20.0 }
  0x50   :  { %v3699_v54 = vpop.eup %3698  ;;  %v2597_v2 = vmul.f32 %v3689_v33, %v2341_v63  ;;  %v1320_v37 = vmul.f32 %v3693_v38, %v1064_v57  ;;  %v1066_v42 = vadd.f32 2.0, %v3697_v40  ;;  %3718 = vpow2.f32 %v593_v18  ;;  %v7586_v57 = vld [vmem:[#allocation12_spill] sm:$0xff] }
  0x51   :  { %v3701_v21 = vpop.eup %3700  ;;  %v4982_v59 = vadd.f32 2.0, %v1319_v1  ;;  %v4985_v29 = vmul.f32 %v1319_v1, %v4776_v43  ;;  %v1321_v45 = vmul.f32 %v3695_v8, %v1065_v36  ;;  %v1067_v62 = vadd.f32 2.0, %v3699_v54  ;;  %v7587_v1 = vld [vmem:[#allocation13_spill] sm:$0xff] }
  0x52   :  { %v3703_v28 = vpop.eup %3702  ;;  %v3109_v32 = vmul.f32 %v4935_v34, %v2597_v2  ;;  %v4988_v53 = vadd.f32 2.0, %v1320_v37  ;;  %v4991_v46 = vmul.f32 %v1320_v37, %v4778_v44  ;;  %v1322_v4 = vmul.f32 %v3697_v40, %v1066_v42 }
  0x53   :  { %v3705_v3 = vpop.eup %3704  ;;  %3720 = vrcp.f32 %v4982_v59  ;;  %v4994_v25 = vadd.f32 2.0, %v1321_v45  ;;  %v4997_v22 = vmul.f32 %v1321_v45, %v4783_v48  ;;  %v1323_v43 = vmul.f32 %v3699_v54, %v1067_v62 }
  0x54   :  { %v3707_v55 = vpop.eup %3706  ;;  %3365 = vst [vmem:[#allocation5 + $0x70] sm:$0xff] %v3109_v32  ;;  %3722 = vrcp.f32 %v4988_v53  ;;  %v5000_v34 = vadd.f32 2.0, %v1322_v4  ;;  %v5003_v56 = vmul.f32 %v1322_v4, %v7582_v58  ;;  %v1068_v44 = vadd.f32 2.0, %v3701_v21 }
  0x55   :  { %v3709_v47 = vpop.eup %3708  ;;  %3724 = vrcp.f32 %v4994_v25  ;;  %v5006_v17 = vadd.f32 2.0, %v1323_v43  ;;  %v5009_v39 = vmul.f32 %v1323_v43, %v7583_v11  ;;  %v1069_v48 = vadd.f32 2.0, %v3703_v28 }
  0x56   :  { %v3711_v50 = vpop.eup %3710  ;;  %3726 = vrcp.f32 %v5000_v34  ;;  %v1324_v15 = vmul.f32 %v3701_v21, %v1068_v44  ;;  %v1070_v5 = vadd.f32 2.0, %v3705_v3  ;;  %v1071_v12 = vadd.f32 2.0, %v3707_v55 }
  0x57   :  { %v3713_v35 = vpop.eup %3712  ;;  %3728 = vrcp.f32 %v5006_v17  ;;  %v1325_v13 = vmul.f32 %v3703_v28, %v1069_v48  ;;  %v1072_v61 = vadd.f32 2.0, %v3709_v47  ;;  %v1073_v19 = vadd.f32 2.0, %v3711_v50 }
  0x58   :  { %v3715_v60 = vpop.eup %3714  ;;  %v5013_v27 = vadd.f32 2.0, %v1324_v15  ;;  %v5016_v33 = vmul.f32 %v1324_v15, %v7584_v14  ;;  %v1326_v20 = vmul.f32 %v3705_v3, %v1070_v5  ;;  %v1327_v41 = vmul.f32 %v3707_v55, %v1071_v12 }
  0x59   :  { %v3717_v7 = vpop.eup %3716  ;;  %v5018_v9 = vadd.f32 2.0, %v1325_v13  ;;  %v5021_v23 = vmul.f32 %v1325_v13, %v7585_v0  ;;  %v1328_v52 = vmul.f32 %v3709_v47, %v1072_v61  ;;  %v1329_v38 = vmul.f32 %v3711_v50, %v1073_v19 }
  0x5a   :  { %v3719_v26 = vpop.eup %3718  ;;  %v2086_v8 = vmul.f32 %v3717_v7, %v4975_v31  ;;  %3730 = vrcp.f32 %v5013_v27  ;;  %v5025_v63 = vadd.f32 2.0, %v1326_v20  ;;  %v5028_v18 = vmul.f32 %v1326_v20, %v7586_v57  ;;  %v7588_v31 = vld [vmem:[#allocation14_spill] sm:$0xff] }
  0x5b   :  { %3732 = vrcp.f32 %v5018_v9  ;;  %v5031_v40 = vadd.f32 2.0, %v1327_v41  ;;  %v5034_v36 = vmul.f32 %v1327_v41, %v7587_v1  ;;  %v5036_v54 = vadd.f32 2.0, %v1328_v52  ;;  %v5078_v1 = vld [vmem:[#allocation2 + $0xf8] sm:$0xff] }
  0x5c   :  { %v2342_v2 = vsub.f32 2.0, %v2086_v8  ;;  %3734 = vrcp.f32 %v5025_v63  ;;  %v5040_v37 = vmul.f32 %v1328_v52, %v7588_v31  ;;  %v5042_v42 = vadd.f32 2.0, %v1329_v38 }
  0x5d   :  { %v3721_v21 = vpop.eup %3720  ;;  %3736 = vrcp.f32 %v5031_v40  ;;  %v5046_v45 = vmul.f32 %v1329_v38, %v4945_v24  ;;  %v1074_v62 = vadd.f32 2.0, %v3713_v35  ;;  %v1075_v28 = vadd.f32 2.0, %v3715_v60 }
  0x5e   :  { %v3723_v32 = vpop.eup %3722  ;;  %v2598_v4 = vmul.f32 %v3717_v7, %v2342_v2  ;;  %v2087_v3 = vmul.f32 %v3721_v21, %v4982_v59  ;;  %3738 = vrcp.f32 %v5036_v54  ;;  %v1076_v43 = vadd.f32 2.0, %v3719_v26 }
  0x5f   :  { %v3725_v55 = vpop.eup %3724  ;;  %v2088_v58 = vmul.f32 %v3723_v32, %v4988_v53  ;;  %3740 = vrcp.f32 %v5042_v42  ;;  %v1330_v44 = vmul.f32 %v3713_v35, %v1074_v62  ;;  %v1331_v47 = vmul.f32 %v3715_v60, %v1075_v28 }
  0x60   :  { %v3727_v11 = vpop.eup %3726  ;;  %v3110_v24 = vmul.f32 %v4978_v51, %v2598_v4  ;;  %v2343_v48 = vsub.f32 2.0, %v2087_v3  ;;  %v2089_v50 = vmul.f32 %v3725_v55, %v4994_v25  ;;  %v1332_v15 = vmul.f32 %v3719_v26, %v1076_v43  ;;  %v5089_v3 = vld [vmem:[#allocation2 + $0x100] sm:$0xff] }
  0x61   :  { %v3729_v5 = vpop.eup %3728  ;;  %v2344_v12 = vsub.f32 2.0, %v2088_v58  ;;  %v2090_v59 = vmul.f32 %v3727_v11, %v5000_v34  ;;  %v5055_v13 = vadd.f32 2.0, %v1330_v44  ;;  %v5058_v61 = vmul.f32 %v1330_v44, %v4950_v30 }
  0x62   :  { %3366 = vst [vmem:[#allocation5 + $0x78] sm:$0xff] %v3110_v24  ;;  %v2599_v53 = vmul.f32 %v3721_v21, %v2343_v48  ;;  %v2345_v35 = vsub.f32 2.0, %v2089_v50  ;;  %v2091_v19 = vmul.f32 %v3729_v5, %v5006_v17  ;;  %v5061_v60 = vadd.f32 2.0, %v1331_v47  ;;  %v5097_v50 = vld [vmem:[#allocation2 + $0x110] sm:$0xff] }
  0x63   :  { %v2600_v51 = vmul.f32 %v3723_v32, %v2344_v12  ;;  %v2346_v14 = vsub.f32 2.0, %v2090_v59  ;;  %3742 = vrcp.f32 %v5055_v13  ;;  %v5065_v25 = vmul.f32 %v1331_v47, %v4958_v6 }
  0x64   :  { %v3731_v34 = vpop.eup %3730  ;;  %v3111_v20 = vmul.f32 %v4985_v29, %v2599_v53  ;;  %v2601_v41 = vmul.f32 %v3725_v55, %v2345_v35  ;;  %v2347_v30 = vsub.f32 2.0, %v2091_v19  ;;  %3744 = vrcp.f32 %v5061_v60 }
  0x65   :  { %v3733_v7 = vpop.eup %3732  ;;  %v3112_v0 = vmul.f32 %v4991_v46, %v2600_v51  ;;  %v2602_v17 = vmul.f32 %v3727_v11, %v2346_v14  ;;  %v2092_v52 = vmul.f32 %v3731_v34, %v5013_v27  ;;  %v5071_v38 = vadd.f32 2.0, %v1332_v15  ;;  %v5105_v51 = vld [vmem:[#allocation2 + $0x120] sm:$0xff] }
  0x66   :  { %v3735_v26 = vpop.eup %3734  ;;  %3367 = vst [vmem:[#allocation5 + $0x80] sm:$0xff] %v3111_v20  ;;  %v3113_v6 = vmul.f32 %v4997_v22, %v2601_v41  ;;  %v2603_v8 = vmul.f32 %v3729_v5, %v2347_v30  ;;  %v2093_v57 = vmul.f32 %v3733_v7, %v5018_v9  ;;  %v5076_v29 = vmul.f32 %v1332_v15, %v4963_v16  ;;  %v5110_v41 = vld [vmem:[#allocation2 + $0x128] sm:$0xff] }
  0x67   :  { %v3737_v2 = vpop.eup %3736  ;;  %3368 = vst [vmem:[#allocation5 + $0x88] sm:$0xff] %v3112_v0  ;;  %v3114_v46 = vmul.f32 %v5003_v56, %v2602_v17  ;;  %v2348_v31 = vsub.f32 2.0, %v2092_v52  ;;  %v2094_v27 = vmul.f32 %v3735_v26, %v5025_v63  ;;  %3746 = vrcp.f32 %v5071_v38 }
  0x68   :  { %v3739_v21 = vpop.eup %3738  ;;  %3369 = vst [vmem:[#allocation5 + $0x90] sm:$0xff] %v3113_v6  ;;  %v3115_v22 = vmul.f32 %v5009_v39, %v2603_v8  ;;  %v2349_v62 = vsub.f32 2.0, %v2093_v57  ;;  %v2095_v9 = vmul.f32 %v3737_v2, %v5031_v40  ;;  %v595_v16 = vmul.f32 1.442695, %v309_v10  ;;  %v5092_v40 = vld [vmem:[#allocation2 + $0x108] sm:$0xff] }
  0x69   :  { %v3741_v28 = vpop.eup %3740  ;;  %3370 = vst [vmem:[#allocation5 + $0x98] sm:$0xff] %v3114_v46  ;;  %v2604_v32 = vmul.f32 %v3731_v34, %v2348_v31  ;;  %v2350_v4 = vsub.f32 2.0, %v2094_v27  ;;  %v2096_v56 = vmul.f32 %v3739_v21, %v5036_v54  ;;  %v310_v63 = vmin.f32 %v5078_v1, 20.0  ;;  %v5120_v46 = vld [vmem:[#allocation2 + $0x138] sm:$0xff]  ;;  %v5122_v31 = vld [vmem:[#allocation2 + $0x140] sm:$0xff] }
  0x6a   :  { %3371 = vst [vmem:[#allocation5 + $0xa0] sm:$0xff] %v3115_v22  ;;  %v2605_v43 = vmul.f32 %v3733_v7, %v2349_v62  ;;  %v2351_v55 = vsub.f32 2.0, %v2095_v9  ;;  %v2097_v39 = vmul.f32 %v3741_v28, %v5042_v42  ;;  %3748 = vpow2.f32 %v595_v16  ;;  %v5114_v7 = vld [vmem:[#allocation2 + $0x130] sm:$0xff]  ;;  %v5125_v9 = vld [vmem:[#allocation2 + $0x148] sm:$0xff] }
  0x6b   :  { %v3116_v10 = vmul.f32 %v5016_v33, %v2604_v32  ;;  %v2606_v58 = vmul.f32 %v3735_v26, %v2350_v4  ;;  %v2352_v44 = vsub.f32 2.0, %v2096_v56  ;;  %v597_v47 = vmul.f32 1.442695, %v310_v63  ;;  %v5101_v33 = vld [vmem:[#allocation2 + $0x118] sm:$0xff] }
  0x6c   :  { %v3117_v11 = vmul.f32 %v5021_v23, %v2605_v43  ;;  %v2607_v54 = vmul.f32 %v3737_v2, %v2351_v55  ;;  %v2353_v24 = vsub.f32 2.0, %v2097_v39  ;;  %v311_v48 = vmin.f32 %v5089_v3, 20.0 }
  0x6d   :  { %v3743_v15 = vpop.eup %3742  ;;  %3372 = vst [vmem:[#allocation5 + $0xa8] sm:$0xff] %v3116_v10  ;;  %v3118_v42 = vmul.f32 %v5028_v18, %v2606_v58  ;;  %v2608_v5 = vmul.f32 %v3739_v21, %v2352_v44  ;;  %3750 = vpow2.f32 %v597_v47  ;;  %v312_v12 = vmin.f32 %v5092_v40, 20.0  ;;  %v5134_v10 = vld [vmem:[#allocation2 + $0x158] sm:$0xff]  ;;  %v5138_v58 = vld [vmem:[#allocation2 + $0x168] sm:$0xff] }
  0x6e   :  { %v3745_v59 = vpop.eup %3744  ;;  %3373 = vst [vmem:[#allocation5 + $0xb0] sm:$0xff] %v3117_v11  ;;  %v3119_v23 = vmul.f32 %v5034_v36, %v2607_v54  ;;  %v2609_v53 = vmul.f32 %v3741_v28, %v2353_v24  ;;  %v2098_v35 = vmul.f32 %v3743_v15, %v5055_v13  ;;  %v599_v19 = vmul.f32 1.442695, %v311_v48  ;;  %v5141_v24 = vld [vmem:[#allocation2 + $0x170] sm:$0xff] }
  0x6f   :  { %3374 = vst [vmem:[#allocation5 + $0xb8] sm:$0xff] %v3118_v42  ;;  %v3120_v14 = vmul.f32 %v5040_v37, %v2608_v5  ;;  %v2099_v18 = vmul.f32 %v3745_v59, %v5061_v60  ;;  %v601_v34 = vmul.f32 1.442695, %v312_v12  ;;  %v313_v20 = vmin.f32 %v5097_v50, 20.0 }
  0x70   :  { %3375 = vst [vmem:[#allocation5 + $0xc0] sm:$0xff] %v3119_v23  ;;  %v3121_v30 = vmul.f32 %v5046_v45, %v2609_v53  ;;  %v2354_v36 = vsub.f32 2.0, %v2098_v35  ;;  %3752 = vpow2.f32 %v599_v19  ;;  %v314_v13 = vmin.f32 %v5101_v33, 20.0 }
  0x71   :  { %v3747_v0 = vpop.eup %3746  ;;  %3376 = vst [vmem:[#allocation5 + $0xc8] sm:$0xff] %v3120_v14  ;;  %v2355_v17 = vsub.f32 2.0, %v2099_v18  ;;  %3754 = vpow2.f32 %v601_v34  ;;  %v603_v37 = vmul.f32 1.442695, %v313_v20  ;;  %v315_v60 = vmin.f32 %v5105_v51, 20.0 }
  0x72   :  { %3377 = vst [vmem:[#allocation5 + $0xd0] sm:$0xff] %v3121_v30  ;;  %v2610_v52 = vmul.f32 %v3743_v15, %v2354_v36  ;;  %v2100_v26 = vmul.f32 %v3747_v0, %v5071_v38  ;;  %v605_v6 = vmul.f32 1.442695, %v314_v13  ;;  %v316_v45 = vmin.f32 %v5110_v41, 20.0  ;;  %v5127_v38 = vld [vmem:[#allocation2 + $0x150] sm:$0xff] }
  0x73   :  { %v2611_v8 = vmul.f32 %v3745_v59, %v2355_v17  ;;  %3756 = vpow2.f32 %v603_v37  ;;  %v607_v57 = vmul.f32 1.442695, %v315_v60  ;;  %v317_v2 = vmin.f32 %v5114_v7, 20.0 }
  0x74   :  { %v3749_v27 = vpop.eup %3748  ;;  %v3122_v21 = vmul.f32 %v5058_v61, %v2610_v52  ;;  %v2356_v22 = vsub.f32 2.0, %v2100_v26  ;;  %3758 = vpow2.f32 %v605_v6  ;;  %v609_v62 = vmul.f32 1.442695, %v316_v45 }
  0x75   :  { %v3123_v16 = vmul.f32 %v5065_v25, %v2611_v8  ;;  %v1077_v28 = vadd.f32 2.0, %v3749_v27  ;;  %3760 = vpow2.f32 %v607_v57  ;;  %v611_v32 = vmul.f32 1.442695, %v317_v2  ;;  %v5136_v25 = vld [vmem:[#allocation2 + $0x160] sm:$0xff] }
  0x76   :  { %3378 = vst [vmem:[#allocation5 + $0xd8] sm:$0xff] %v3122_v21  ;;  %v2612_v4 = vmul.f32 %v3747_v0, %v2356_v22  ;;  %3762 = vpow2.f32 %v609_v62  ;;  %v318_v56 = vmin.f32 %v5120_v46, 20.0  ;;  %v319_v63 = vmin.f32 %v5122_v31, 20.0 }
  0x77   :  { %v3751_v61 = vpop.eup %3750  ;;  %3379 = vst [vmem:[#allocation5 + $0xe0] sm:$0xff] %v3123_v16  ;;  %v1333_v43 = vmul.f32 %v3749_v27, %v1077_v28  ;;  %3764 = vpow2.f32 %v611_v32  ;;  %v320_v55 = vmin.f32 %v5125_v9, 20.0  ;;  %v321_v39 = vmin.f32 %v5127_v38, 20.0  ;;  %v5176_v28 = vld [vmem:[#allocation2 + $0x178] sm:$0xff] }
  0x78   :  { %v3124_v44 = vmul.f32 %v5076_v29, %v2612_v4  ;;  %v1078_v47 = vadd.f32 2.0, %v3751_v61  ;;  %v613_v11 = vmul.f32 1.442695, %v318_v56  ;;  %v615_v54 = vmul.f32 1.442695, %v319_v63 }
  0x79   :  { %v5143_v48 = vadd.f32 2.0, %v1333_v43  ;;  %v5146_v15 = vmul.f32 %v1333_v43, %v4973_v49  ;;  %v617_v42 = vmul.f32 1.442695, %v320_v55  ;;  %v619_v5 = vmul.f32 1.442695, %v321_v39 }
  0x7a   :  { %v3753_v12 = vpop.eup %3752  ;;  %3380 = vst [vmem:[#allocation5 + $0xe8] sm:$0xff] %v3124_v44  ;;  %v1334_v59 = vmul.f32 %v3751_v61, %v1078_v47  ;;  %3766 = vpow2.f32 %v613_v11  ;;  %v322_v23 = vmin.f32 %v5134_v10, 20.0  ;;  %v323_v29 = vmin.f32 %v5136_v25, 20.0 }
  0x7b   :  { %v3755_v53 = vpop.eup %3754  ;;  %3768 = vrcp.f32 %v5143_v48  ;;  %v1079_v35 = vadd.f32 2.0, %v3753_v12  ;;  %v324_v19 = vmin.f32 %v5138_v58, 20.0  ;;  %v325_v14 = vmin.f32 %v5141_v24, 20.0 }
  0x7c   :  { %v5153_v49 = vadd.f32 2.0, %v1334_v59  ;;  %v5156_v18 = vmul.f32 %v1334_v59, %v5078_v1  ;;  %v1080_v34 = vadd.f32 2.0, %v3755_v53  ;;  %3770 = vpow2.f32 %v615_v54 }
  0x7d   :  { %v3757_v20 = vpop.eup %3756  ;;  %v1335_v30 = vmul.f32 %v3753_v12, %v1079_v35  ;;  %3772 = vpow2.f32 %v617_v42  ;;  %v621_v36 = vmul.f32 1.442695, %v322_v23  ;;  %v5158_v13 = vmul.f32 1.442695, %v323_v29 }
  0x7e   :  { %v3759_v0 = vpop.eup %3758  ;;  %3774 = vrcp.f32 %v5153_v49  ;;  %v1336_v17 = vmul.f32 %v3755_v53, %v1080_v34  ;;  %v1081_v37 = vadd.f32 2.0, %v3757_v20  ;;  %v5161_v60 = vmul.f32 1.442695, %v324_v19 }
  0x7f   :  { %v3761_v52 = vpop.eup %3760  ;;  %v5163_v26 = vadd.f32 2.0, %v1335_v30  ;;  %v5166_v1 = vmul.f32 %v1335_v30, %v5089_v3  ;;  %v1082_v6 = vadd.f32 2.0, %v3759_v0  ;;  %3776 = vpow2.f32 %v619_v5 }
  0x80   :  { %v3763_v45 = vpop.eup %3762  ;;  %v5168_v8 = vadd.f32 2.0, %v1336_v17  ;;  %v5171_v57 = vmul.f32 %v1336_v17, %v5092_v40  ;;  %v1337_v2 = vmul.f32 %v3757_v20, %v1081_v37  ;;  %v1083_v27 = vadd.f32 2.0, %v3761_v52 }
  0x81   :  { %v3765_v21 = vpop.eup %3764  ;;  %3778 = vrcp.f32 %v5163_v26  ;;  %v1338_v22 = vmul.f32 %v3759_v0, %v1082_v6  ;;  %v1084_v62 = vadd.f32 2.0, %v3763_v45  ;;  %v5174_v16 = vmul.f32 1.442695, %v325_v14 }
  0x82   :  { %3780 = vrcp.f32 %v5168_v8  ;;  %v5179_v3 = vadd.f32 2.0, %v1337_v2  ;;  %v5182_v32 = vmul.f32 %v1337_v2, %v5097_v50  ;;  %v1339_v40 = vmul.f32 %v3761_v52, %v1083_v27 }
  0x83   :  { %v5184_v4 = vadd.f32 2.0, %v1338_v22  ;;  %v5187_v56 = vmul.f32 %v1338_v22, %v5101_v33  ;;  %v1340_v63 = vmul.f32 %v3763_v45, %v1084_v62  ;;  %v1085_v61 = vadd.f32 2.0, %v3765_v21 }
  0x84   :  { %v3767_v43 = vpop.eup %3766  ;;  %3782 = vrcp.f32 %v5179_v3  ;;  %v5190_v55 = vadd.f32 2.0, %v1339_v40  ;;  %v5193_v39 = vmul.f32 %v1339_v40, %v5105_v51  ;;  %v326_v44 = vmin.f32 %v5176_v28, 20.0  ;;  %v5206_v51 = vld [vmem:[#allocation2 + $0x180] sm:$0xff] }
  0x85   :  { %v3769_v50 = vpop.eup %3768  ;;  %3784 = vrcp.f32 %v5184_v4  ;;  %v5197_v47 = vadd.f32 2.0, %v1340_v63  ;;  %v5200_v33 = vmul.f32 %v1340_v63, %v5110_v41  ;;  %v1341_v11 = vmul.f32 %v3765_v21, %v1085_v61 }
  0x86   :  { %v3771_v54 = vpop.eup %3770  ;;  %v2101_v42 = vmul.f32 %v3769_v50, %v5143_v48  ;;  %3786 = vrcp.f32 %v5190_v55  ;;  %v1086_v5 = vadd.f32 2.0, %v3767_v43  ;;  %v5204_v12 = vmul.f32 1.442695, %v326_v44 }
  0x87   :  { %v3773_v59 = vpop.eup %3772  ;;  %3788 = vrcp.f32 %v5197_v47  ;;  %v5209_v23 = vadd.f32 2.0, %v1341_v11  ;;  %v5212_v29 = vmul.f32 %v1341_v11, %v5114_v7  ;;  %v1087_v41 = vadd.f32 2.0, %v3771_v54 }
  0x88   :  { %v3775_v53 = vpop.eup %3774  ;;  %v2357_v35 = vsub.f32 2.0, %v2101_v42  ;;  %v1342_v19 = vmul.f32 %v3767_v43, %v1086_v5  ;;  %v1088_v48 = vadd.f32 2.0, %v3773_v59  ;;  %3790 = vpow2.f32 %v621_v36 }
  0x89   :  { %v3777_v14 = vpop.eup %3776  ;;  %v2102_v34 = vmul.f32 %v3775_v53, %v5153_v49  ;;  %3792 = vrcp.f32 %v5209_v23  ;;  %v1343_v20 = vmul.f32 %v3771_v54, %v1087_v41  ;;  %v327_v30 = vmin.f32 %v5206_v51, 20.0 }
  0x8a   :  { %v2613_v0 = vmul.f32 %v3769_v50, %v2357_v35  ;;  %v5217_v17 = vadd.f32 2.0, %v1342_v19  ;;  %v5220_v7 = vmul.f32 %v1342_v19, %v5120_v46  ;;  %v1344_v37 = vmul.f32 %v3773_v59, %v1088_v48 }
  0x8b   :  { %v3779_v52 = vpop.eup %3778  ;;  %v2358_v6 = vsub.f32 2.0, %v2102_v34  ;;  %v5222_v45 = vadd.f32 2.0, %v1343_v20  ;;  %v5225_v36 = vmul.f32 %v1343_v20, %v5122_v31  ;;  %v1089_v49 = vadd.f32 2.0, %v3777_v14 }
  0x8c   :  { %v3781_v2 = vpop.eup %3780  ;;  %v3125_v27 = vmul.f32 %v5146_v15, %v2613_v0  ;;  %v2103_v21 = vmul.f32 %v3779_v52, %v5163_v26  ;;  %3794 = vrcp.f32 %v5217_v17  ;;  %v5230_v22 = vadd.f32 2.0, %v1344_v37 }
  0x8d   :  { %v2614_v46 = vmul.f32 %v3775_v53, %v2358_v6  ;;  %v2104_v62 = vmul.f32 %v3781_v2, %v5168_v8  ;;  %3796 = vrcp.f32 %v5222_v45  ;;  %v5235_v40 = vmul.f32 %v1344_v37, %v5125_v9  ;;  %v5260_v6 = vld [vmem:[#allocation2 + $0x190] sm:$0xff] }
  0x8e   :  { %v3783_v31 = vpop.eup %3782  ;;  %3381 = vst [vmem:[#allocation5 + $0xf0] sm:$0xff] %v3125_v27  ;;  %v2359_v63 = vsub.f32 2.0, %v2103_v21  ;;  %3798 = vrcp.f32 %v5230_v22  ;;  %v1345_v15 = vmul.f32 %v3777_v14, %v1089_v49  ;;  %v631_v61 = vmul.f32 1.442695, %v327_v30  ;;  %v5257_v30 = vld [vmem:[#allocation2 + $0x188] sm:$0xff] }
  0x8f   :  { %v3785_v26 = vpop.eup %3784  ;;  %v3126_v43 = vmul.f32 %v5156_v18, %v2614_v46  ;;  %v2360_v44 = vsub.f32 2.0, %v2104_v62  ;;  %v2105_v50 = vmul.f32 %v3783_v31, %v5179_v3  ;;  %3800 = vpow2.f32 %v5158_v13  ;;  %v5272_v62 = vld [vmem:[#allocation2 + $0x198] sm:$0xff] }
  0x90   :  { %v3787_v8 = vpop.eup %3786  ;;  %v2615_v11 = vmul.f32 %v3779_v52, %v2359_v63  ;;  %v2106_v9 = vmul.f32 %v3785_v26, %v5184_v4  ;;  %v5242_v54 = vadd.f32 2.0, %v1345_v15  ;;  %v5245_v42 = vmul.f32 %v1345_v15, %v5127_v38 }
  0x91   :  { %v3789_v5 = vpop.eup %3788  ;;  %3382 = vst [vmem:[#allocation5 + $0xf8] sm:$0xff] %v3126_v43  ;;  %v2616_v59 = vmul.f32 %v3781_v2, %v2360_v44  ;;  %v2361_v41 = vsub.f32 2.0, %v2105_v50  ;;  %v2107_v18 = vmul.f32 %v3787_v8, %v5190_v55  ;;  %3802 = vpow2.f32 %v5161_v60 }
  0x92   :  { %v3791_v3 = vpop.eup %3790  ;;  %v3127_v13 = vmul.f32 %v5166_v1, %v2615_v11  ;;  %v2362_v53 = vsub.f32 2.0, %v2106_v9  ;;  %v2108_v35 = vmul.f32 %v3789_v5, %v5197_v47  ;;  %3804 = vrcp.f32 %v5242_v54 }
  0x93   :  { %v3793_v4 = vpop.eup %3792  ;;  %v3128_v38 = vmul.f32 %v5171_v57, %v2616_v59  ;;  %v2617_v19 = vmul.f32 %v3783_v31, %v2361_v41  ;;  %v2363_v48 = vsub.f32 2.0, %v2107_v18  ;;  %v1090_v14 = vadd.f32 2.0, %v3791_v3 }
  0x94   :  { %3383 = vst [vmem:[#allocation5 + $0x100] sm:$0xff] %v3127_v13  ;;  %v2618_v34 = vmul.f32 %v3785_v26, %v2362_v53  ;;  %v2364_v20 = vsub.f32 2.0, %v2108_v35  ;;  %v2109_v55 = vmul.f32 %v3793_v4, %v5209_v23  ;;  %3806 = vpow2.f32 %v5174_v16 }
  0x95   :  { %3384 = vst [vmem:[#allocation5 + $0x108] sm:$0xff] %v3128_v38  ;;  %v3129_v60 = vmul.f32 %v5182_v32, %v2617_v19  ;;  %v2619_v1 = vmul.f32 %v3787_v8, %v2363_v48  ;;  %v1346_v47 = vmul.f32 %v3791_v3, %v1090_v14  ;;  %3808 = vpow2.f32 %v5204_v12  ;;  %v5288_v48 = vld [vmem:[#allocation2 + $0x1a0] sm:$0xff] }
  0x96   :  { %v3795_v57 = vpop.eup %3794  ;;  %v3130_v0 = vmul.f32 %v5187_v56, %v2618_v34  ;;  %v2620_v37 = vmul.f32 %v3789_v5, %v2364_v20  ;;  %v2365_v52 = vsub.f32 2.0, %v2109_v55  ;;  %3810 = vpow2.f32 %v631_v61 }
  0x97   :  { %v3797_v23 = vpop.eup %3796  ;;  %3385 = vst [vmem:[#allocation5 + $0x110] sm:$0xff] %v3129_v60  ;;  %v3131_v16 = vmul.f32 %v5193_v39, %v2619_v1  ;;  %v2110_v32 = vmul.f32 %v3795_v57, %v5217_v17  ;;  %v5264_v49 = vadd.f32 2.0, %v1346_v47  ;;  %v5267_v12 = vmul.f32 %v1346_v47, %v5134_v10 }
  0x98   :  { %v3799_v2 = vpop.eup %3798  ;;  %3386 = vst [vmem:[#allocation5 + $0x118] sm:$0xff] %v3130_v0  ;;  %v3132_v56 = vmul.f32 %v5200_v33, %v2620_v37  ;;  %v2621_v27 = vmul.f32 %v3793_v4, %v2365_v52  ;;  %v2111_v21 = vmul.f32 %v3797_v23, %v5222_v45  ;;  %v328_v46 = vmin.f32 %v5257_v30, 20.0 }
  0x99   :  { %v3801_v31 = vpop.eup %3800  ;;  %3387 = vst [vmem:[#allocation5 + $0x120] sm:$0xff] %v3131_v16  ;;  %v2366_v39 = vsub.f32 2.0, %v2110_v32  ;;  %v2112_v17 = vmul.f32 %v3799_v2, %v5230_v22  ;;  %3812 = vrcp.f32 %v5264_v49  ;;  %v329_v10 = vmin.f32 %v5260_v6, 20.0  ;;  %v5309_v16 = vld [vmem:[#allocation2 + $0x1b8] sm:$0xff] }
  0x9a   :  { %3388 = vst [vmem:[#allocation5 + $0x128] sm:$0xff] %v3132_v56  ;;  %v3133_v63 = vmul.f32 %v5212_v29, %v2621_v27  ;;  %v2367_v33 = vsub.f32 2.0, %v2111_v21  ;;  %v1091_v15 = vadd.f32 2.0, %v3801_v31  ;;  %v633_v61 = vmul.f32 1.442695, %v328_v46  ;;  %v5317_v21 = vld [vmem:[#allocation2 + $0x1c0] sm:$0xff] }
  0x9b   :  { %v3803_v45 = vpop.eup %3802  ;;  %v2622_v26 = vmul.f32 %v3795_v57, %v2366_v39  ;;  %v2368_v43 = vsub.f32 2.0, %v2112_v17  ;;  %v635_v44 = vmul.f32 1.442695, %v329_v10  ;;  %v330_v50 = vmin.f32 %v5272_v62, 20.0 }
  0x9c   :  { %v3805_v8 = vpop.eup %3804  ;;  %3389 = vst [vmem:[#allocation5 + $0x130] sm:$0xff] %v3133_v63  ;;  %v2623_v11 = vmul.f32 %v3797_v23, %v2367_v33  ;;  %v1347_v22 = vmul.f32 %v3801_v31, %v1091_v15  ;;  %v1092_v9 = vadd.f32 2.0, %v3803_v45  ;;  %3814 = vpow2.f32 %v633_v61  ;;  %v5307_v23 = vld [vmem:[#allocation2 + $0x1b0] sm:$0xff] }
  0x9d   :  { %v3134_v5 = vmul.f32 %v5220_v7, %v2622_v26  ;;  %v2624_v59 = vmul.f32 %v3799_v2, %v2368_v43  ;;  %v2113_v29 = vmul.f32 %v3805_v8, %v5242_v54  ;;  %3816 = vpow2.f32 %v635_v44  ;;  %v5290_v54 = vld [vmem:[#allocation2 + $0x1a8] sm:$0xff] }
  0x9e   :  { %v3807_v41 = vpop.eup %3806  ;;  %v3135_v18 = vmul.f32 %v5225_v36, %v2623_v11  ;;  %v5282_v3 = vadd.f32 2.0, %v1347_v22  ;;  %v5285_v13 = vmul.f32 %v1347_v22, %v5136_v25  ;;  %v1348_v53 = vmul.f32 %v3803_v45, %v1092_v9  ;;  %v5334_v9 = vld [vmem:[#allocation2 + $0x1d0] sm:$0xff] }
  0x9f   :  { %v3809_v35 = vpop.eup %3808  ;;  %3390 = vst [vmem:[#allocation5 + $0x138] sm:$0xff] %v3134_v5  ;;  %v3136_v4 = vmul.f32 %v5235_v40, %v2624_v59  ;;  %v2369_v38 = vsub.f32 2.0, %v2113_v29  ;;  %v1093_v19 = vadd.f32 2.0, %v3807_v41  ;;  %v637_v7 = vmul.f32 1.442695, %v330_v50 }
  0xa0   :  { %v3811_v14 = vpop.eup %3810  ;;  %3391 = vst [vmem:[#allocation5 + $0x140] sm:$0xff] %v3135_v18  ;;  %3818 = vrcp.f32 %v5282_v3  ;;  %v5293_v36 = vadd.f32 2.0, %v1348_v53  ;;  %v5296_v25 = vmul.f32 %v1348_v53, %v5138_v58  ;;  %v1094_v34 = vadd.f32 2.0, %v3809_v35  ;;  %v5342_v18 = vld [vmem:[#allocation2 + $0x1d8] sm:$0xff]  ;;  %v5344_v53 = vld [vmem:[#allocation2 + $0x1e0] sm:$0xff] }
  0xa1   :  { %3392 = vst [vmem:[#allocation5 + $0x148] sm:$0xff] %v3136_v4  ;;  %v2625_v20 = vmul.f32 %v3805_v8, %v2369_v38  ;;  %v1349_v40 = vmul.f32 %v3807_v41, %v1093_v19  ;;  %v1095_v55 = vadd.f32 2.0, %v3811_v14  ;;  %3820 = vpow2.f32 %v637_v7 }
  0xa2   :  { %3822 = vrcp.f32 %v5293_v36  ;;  %v1350_v60 = vmul.f32 %v3809_v35, %v1094_v34  ;;  %v331_v1 = vmin.f32 %v5288_v48, 20.0  ;;  %v332_v47 = vmin.f32 %v5290_v54, 20.0 }
  0xa3   :  { %v3813_v57 = vpop.eup %3812  ;;  %v3137_v0 = vmul.f32 %v5245_v42, %v2625_v20  ;;  %v5302_v37 = vadd.f32 2.0, %v1349_v40  ;;  %v5305_v58 = vmul.f32 %v1349_v40, %v5141_v24  ;;  %v1351_v52 = vmul.f32 %v3811_v14, %v1095_v55  ;;  %v5319_v42 = vld [vmem:[#allocation2 + $0x1c8] sm:$0xff] }
  0xa4   :  { %v2114_v32 = vmul.f32 %v3813_v57, %v5264_v49  ;;  %v5312_v2 = vadd.f32 2.0, %v1350_v60  ;;  %v5315_v56 = vmul.f32 %v1350_v60, %v5176_v28  ;;  %v639_v27 = vmul.f32 1.442695, %v331_v1 }
  0xa5   :  { %3393 = vst [vmem:[#allocation5 + $0x150] sm:$0xff] %v3137_v0  ;;  %3824 = vrcp.f32 %v5302_v37  ;;  %v5322_v24 = vadd.f32 2.0, %v1351_v52  ;;  %v5325_v46 = vmul.f32 %v1351_v52, %v5206_v51  ;;  %v641_v31 = vmul.f32 1.442695, %v332_v47 }
  0xa6   :  { %v3815_v49 = vpop.eup %3814  ;;  %v2370_v39 = vsub.f32 2.0, %v2114_v32  ;;  %3826 = vrcp.f32 %v5312_v2  ;;  %v333_v28 = vmin.f32 %v5307_v23, 20.0  ;;  %v334_v17 = vmin.f32 %v5309_v16, 20.0 }
  0xa7   :  { %v3817_v10 = vpop.eup %3816  ;;  %3828 = vrcp.f32 %v5322_v24  ;;  %v1096_v63 = vadd.f32 2.0, %v3815_v49  ;;  %v335_v33 = vmin.f32 %v5317_v21, 20.0  ;;  %v336_v15 = vmin.f32 %v5319_v42, 20.0 }
  0xa8   :  { %v2626_v61 = vmul.f32 %v3813_v57, %v2370_v39  ;;  %v1097_v51 = vadd.f32 2.0, %v3817_v10  ;;  %3830 = vpow2.f32 %v639_v27  ;;  %v643_v45 = vmul.f32 1.442695, %v333_v28  ;;  %v5367_v28 = vld [vmem:[#allocation2 + $0x1e8] sm:$0xff] }
  0xa9   :  { %v1352_v26 = vmul.f32 %v3815_v49, %v1096_v63  ;;  %3832 = vpow2.f32 %v641_v31  ;;  %v645_v43 = vmul.f32 1.442695, %v334_v17  ;;  %v647_v44 = vmul.f32 1.442695, %v335_v33 }
  0xaa   :  { %v3819_v50 = vpop.eup %3818  ;;  %v3138_v8 = vmul.f32 %v5267_v12, %v2626_v61  ;;  %v1353_v11 = vmul.f32 %v3817_v10, %v1097_v51  ;;  %3834 = vpow2.f32 %v643_v45  ;;  %v649_v22 = vmul.f32 1.442695, %v336_v15 }
  0xab   :  { %v3821_v5 = vpop.eup %3820  ;;  %v2115_v59 = vmul.f32 %v3819_v50, %v5282_v3  ;;  %v5337_v29 = vadd.f32 2.0, %v1352_v26  ;;  %v5340_v41 = vmul.f32 %v1352_v26, %v5257_v30  ;;  %3836 = vpow2.f32 %v645_v43 }
  0xac   :  { %v3823_v35 = vpop.eup %3822  ;;  %3394 = vst [vmem:[#allocation5 + $0x158] sm:$0xff] %v3138_v8  ;;  %v5346_v12 = vadd.f32 2.0, %v1353_v11  ;;  %v5349_v4 = vmul.f32 %v1353_v11, %v5260_v6  ;;  %v1098_v38 = vadd.f32 2.0, %v3821_v5  ;;  %3838 = vpow2.f32 %v647_v44 }
  0xad   :  { %v2371_v3 = vsub.f32 2.0, %v2115_v59  ;;  %v2116_v19 = vmul.f32 %v3823_v35, %v5293_v36  ;;  %3840 = vrcp.f32 %v5337_v29  ;;  %v337_v30 = vmin.f32 %v5334_v9, 20.0 }
  0xae   :  { %3842 = vrcp.f32 %v5346_v12  ;;  %v1354_v7 = vmul.f32 %v3821_v5, %v1098_v38  ;;  %v338_v14 = vmin.f32 %v5342_v18, 20.0  ;;  %v339_v34 = vmin.f32 %v5344_v53, 20.0 }
  0xaf   :  { %v3825_v20 = vpop.eup %3824  ;;  %v2627_v40 = vmul.f32 %v3819_v50, %v2371_v3  ;;  %v2372_v6 = vsub.f32 2.0, %v2116_v19  ;;  %3844 = vpow2.f32 %v649_v22  ;;  %v651_v55 = vmul.f32 1.442695, %v337_v30 }
  0xb0   :  { %v3827_v60 = vpop.eup %3826  ;;  %v2117_v1 = vmul.f32 %v3825_v20, %v5302_v37  ;;  %v5358_v36 = vadd.f32 2.0, %v1354_v7  ;;  %v5361_v47 = vmul.f32 %v1354_v7, %v5272_v62  ;;  %v653_v57 = vmul.f32 1.442695, %v338_v14 }
  0xb1   :  { %v3829_v0 = vpop.eup %3828  ;;  %v3139_v52 = vmul.f32 %v5285_v13, %v2627_v40  ;;  %v2628_v32 = vmul.f32 %v3823_v35, %v2372_v6  ;;  %v2118_v27 = vmul.f32 %v3827_v60, %v5312_v2  ;;  %3846 = vpow2.f32 %v651_v55 }
  0xb2   :  { %v3831_v31 = vpop.eup %3830  ;;  %v2373_v49 = vsub.f32 2.0, %v2117_v1  ;;  %v2119_v39 = vmul.f32 %v3829_v0, %v5322_v24  ;;  %3848 = vrcp.f32 %v5358_v36  ;;  %v655_v37 = vmul.f32 1.442695, %v339_v34 }
  0xb3   :  { %v3833_v17 = vpop.eup %3832  ;;  %3395 = vst [vmem:[#allocation5 + $0x160] sm:$0xff] %v3139_v52  ;;  %v3140_v62 = vmul.f32 %v5296_v25, %v2628_v32  ;;  %v2374_v10 = vsub.f32 2.0, %v2118_v27  ;;  %v1099_v63 = vadd.f32 2.0, %v3831_v31  ;;  %3850 = vpow2.f32 %v653_v57 }
  0xb4   :  { %v3835_v13 = vpop.eup %3834  ;;  %v2629_v33 = vmul.f32 %v3825_v20, %v2373_v49  ;;  %v2375_v2 = vsub.f32 2.0, %v2119_v39  ;;  %v1100_v15 = vadd.f32 2.0, %v3833_v17  ;;  %3852 = vpow2.f32 %v655_v37 }
  0xb5   :  { %v3837_v61 = vpop.eup %3836  ;;  %3396 = vst [vmem:[#allocation5 + $0x168] sm:$0xff] %v3140_v62  ;;  %v2630_v24 = vmul.f32 %v3827_v60, %v2374_v10  ;;  %v1355_v51 = vmul.f32 %v3831_v31, %v1099_v63  ;;  %v1101_v45 = vadd.f32 2.0, %v3835_v13  ;;  %v340_v26 = vmin.f32 %v5367_v28, 20.0 }
  0xb6   :  { %v3839_v43 = vpop.eup %3838  ;;  %v3141_v44 = vmul.f32 %v5305_v58, %v2629_v33  ;;  %v2631_v50 = vmul.f32 %v3829_v0, %v2375_v2  ;;  %v1356_v25 = vmul.f32 %v3833_v17, %v1100_v15  ;;  %v1102_v8 = vadd.f32 2.0, %v3837_v61  ;;  %v5407_v17 = vld [vmem:[#allocation2 + $0x1f0] sm:$0xff] }
  0xb7   :  { %v3841_v11 = vpop.eup %3840  ;;  %v3142_v22 = vmul.f32 %v5315_v56, %v2630_v24  ;;  %v5373_v5 = vadd.f32 2.0, %v1355_v51  ;;  %v5376_v59 = vmul.f32 %v1355_v51, %v5288_v48  ;;  %v1357_v35 = vmul.f32 %v3835_v13, %v1101_v45 }
  0xb8   :  { %v3843_v38 = vpop.eup %3842  ;;  %3397 = vst [vmem:[#allocation5 + $0x170] sm:$0xff] %v3141_v44  ;;  %v3143_v3 = vmul.f32 %v5325_v46, %v2631_v50  ;;  %v2120_v19 = vmul.f32 %v3841_v11, %v5337_v29  ;;  %v5380_v30 = vadd.f32 2.0, %v1356_v25  ;;  %v5383_v58 = vmul.f32 %v1356_v25, %v5290_v54  ;;  %v5427_v44 = vld [vmem:[#allocation2 + $0x200] sm:$0xff] }
  0xb9   :  { %v3845_v7 = vpop.eup %3844  ;;  %3398 = vst [vmem:[#allocation5 + $0x178] sm:$0xff] %v3142_v22  ;;  %v2121_v56 = vmul.f32 %v3843_v38, %v5346_v12  ;;  %3854 = vrcp.f32 %v5373_v5  ;;  %v5387_v48 = vadd.f32 2.0, %v1357_v35  ;;  %v5390_v14 = vmul.f32 %v1357_v35, %v5307_v23  ;;  %v5438_v22 = vld [vmem:[#allocation2 + $0x210] sm:$0xff] }
  0xba   :  { %3399 = vst [vmem:[#allocation5 + $0x180] sm:$0xff] %v3143_v3  ;;  %v2376_v46 = vsub.f32 2.0, %v2120_v19  ;;  %3856 = vrcp.f32 %v5380_v30  ;;  %v1358_v29 = vmul.f32 %v3837_v61, %v1102_v8  ;;  %v1103_v34 = vadd.f32 2.0, %v3839_v43 }
  0xbb   :  { %v3847_v20 = vpop.eup %3846  ;;  %v2377_v54 = vsub.f32 2.0, %v2121_v56  ;;  %3858 = vrcp.f32 %v5387_v48  ;;  %v1104_v40 = vadd.f32 2.0, %v3845_v7  ;;  %v657_v6 = vmul.f32 1.442695, %v340_v26 }
  0xbc   :  { %v3849_v12 = vpop.eup %3848  ;;  %v2632_v55 = vmul.f32 %v3841_v11, %v2376_v46  ;;  %v5394_v60 = vadd.f32 2.0, %v1358_v29  ;;  %v5397_v1 = vmul.f32 %v1358_v29, %v5309_v16  ;;  %v1359_v23 = vmul.f32 %v3839_v43, %v1103_v34  ;;  %v5409_v16 = vld [vmem:[#allocation2 + $0x1f8] sm:$0xff]  ;;  %v5436_v11 = vld [vmem:[#allocation2 + $0x208] sm:$0xff] }
  0xbd   :  { %v3851_v57 = vpop.eup %3850  ;;  %v2633_v0 = vmul.f32 %v3843_v38, %v2377_v54  ;;  %v2122_v52 = vmul.f32 %v3849_v12, %v5358_v36  ;;  %v1360_v32 = vmul.f32 %v3845_v7, %v1104_v40  ;;  %v1105_v27 = vadd.f32 2.0, %v3847_v20  ;;  %v5452_v46 = vld [vmem:[#allocation2 + $0x218] sm:$0xff] }
  0xbe   :  { %v3853_v31 = vpop.eup %3852  ;;  %v3144_v49 = vmul.f32 %v5340_v41, %v2632_v55  ;;  %3860 = vrcp.f32 %v5394_v60  ;;  %v5402_v39 = vadd.f32 2.0, %v1359_v23  ;;  %v5405_v37 = vmul.f32 %v1359_v23, %v5317_v21 }
  0xbf   :  { %v3145_v62 = vmul.f32 %v5349_v4, %v2633_v0  ;;  %v2378_v10 = vsub.f32 2.0, %v2122_v52  ;;  %v5412_v36 = vadd.f32 2.0, %v1360_v32  ;;  %v5415_v63 = vmul.f32 %v1360_v32, %v5319_v42  ;;  %v5457_v0 = vld [vmem:[#allocation2 + $0x220] sm:$0xff]  ;;  %v5459_v52 = vld [vmem:[#allocation2 + $0x228] sm:$0xff] }
  0xc0   :  { %3400 = vst [vmem:[#allocation5 + $0x188] sm:$0xff] %v3144_v49  ;;  %3862 = vrcp.f32 %v5402_v39  ;;  %v1361_v41 = vmul.f32 %v3847_v20, %v1105_v27  ;;  %v1106_v13 = vadd.f32 2.0, %v3851_v57  ;;  %v1107_v33 = vadd.f32 2.0, %v3853_v31 }
  0xc1   :  { %3401 = vst [vmem:[#allocation5 + $0x190] sm:$0xff] %v3145_v62  ;;  %v2634_v21 = vmul.f32 %v3849_v12, %v2378_v10  ;;  %3864 = vrcp.f32 %v5412_v36  ;;  %v341_v2 = vmin.f32 %v5407_v17, 20.0  ;;  %v342_v4 = vmin.f32 %v5409_v16, 20.0 }
  0xc2   :  { %v5421_v15 = vadd.f32 2.0, %v1361_v41  ;;  %v5424_v61 = vmul.f32 %v1361_v41, %v5334_v9  ;;  %v1362_v42 = vmul.f32 %v3851_v57, %v1106_v13  ;;  %v1363_v24 = vmul.f32 %v3853_v31, %v1107_v33 }
  0xc3   :  { %v3855_v51 = vpop.eup %3854  ;;  %v3146_v45 = vmul.f32 %v5361_v47, %v2634_v21  ;;  %3866 = vpow2.f32 %v657_v6  ;;  %v659_v26 = vmul.f32 1.442695, %v341_v2  ;;  %v661_v43 = vmul.f32 1.442695, %v342_v4 }
  0xc4   :  { %v3857_v50 = vpop.eup %3856  ;;  %v2123_v25 = vmul.f32 %v3855_v51, %v5373_v5  ;;  %3868 = vrcp.f32 %v5421_v15  ;;  %v5431_v8 = vadd.f32 2.0, %v1362_v42  ;;  %v5434_v9 = vmul.f32 %v1362_v42, %v5342_v18 }
  0xc5   :  { %v3859_v47 = vpop.eup %3858  ;;  %3402 = vst [vmem:[#allocation5 + $0x198] sm:$0xff] %v3146_v45  ;;  %v2124_v35 = vmul.f32 %v3857_v50, %v5380_v30  ;;  %v5441_v38 = vadd.f32 2.0, %v1363_v24  ;;  %v5444_v3 = vmul.f32 %v1363_v24, %v5344_v53  ;;  %3870 = vpow2.f32 %v659_v26 }
  0xc6   :  { %v2379_v5 = vsub.f32 2.0, %v2123_v25  ;;  %v2125_v19 = vmul.f32 %v3859_v47, %v5387_v48  ;;  %3872 = vrcp.f32 %v5431_v8  ;;  %v343_v18 = vmin.f32 %v5427_v44, 20.0 }
  0xc7   :  { %v2380_v7 = vsub.f32 2.0, %v2124_v35  ;;  %3874 = vrcp.f32 %v5441_v38  ;;  %v344_v56 = vmin.f32 %v5436_v11, 20.0  ;;  %v345_v30 = vmin.f32 %v5438_v22, 20.0 }
  0xc8   :  { %v3861_v29 = vpop.eup %3860  ;;  %v2635_v53 = vmul.f32 %v3855_v51, %v2379_v5  ;;  %v2381_v34 = vsub.f32 2.0, %v2125_v19  ;;  %3876 = vpow2.f32 %v661_v43  ;;  %v663_v20 = vmul.f32 1.442695, %v343_v18 }
  0xc9   :  { %v2636_v54 = vmul.f32 %v3857_v50, %v2380_v7  ;;  %v2126_v48 = vmul.f32 %v3861_v29, %v5394_v60  ;;  %v665_v40 = vmul.f32 1.442695, %v344_v56  ;;  %v667_v6 = vmul.f32 1.442695, %v345_v30  ;;  %v5463_v60 = vld [vmem:[#allocation2 + $0x230] sm:$0xff]  ;;  %v5474_v7 = vld [vmem:[#allocation2 + $0x238] sm:$0xff] }
  0xca   :  { %v3863_v12 = vpop.eup %3862  ;;  %v3147_v55 = vmul.f32 %v5376_v59, %v2635_v53  ;;  %v2637_v23 = vmul.f32 %v3859_v47, %v2381_v34  ;;  %3878 = vpow2.f32 %v663_v20  ;;  %v346_v57 = vmin.f32 %v5452_v46, 20.0 }
  0xcb   :  { %v3865_v32 = vpop.eup %3864  ;;  %v3148_v27 = vmul.f32 %v5383_v58, %v2636_v54  ;;  %v2382_v31 = vsub.f32 2.0, %v2126_v48  ;;  %v2127_v49 = vmul.f32 %v3863_v12, %v5402_v39  ;;  %3880 = vpow2.f32 %v665_v40 }
  0xcc   :  { %3403 = vst [vmem:[#allocation5 + $0x1a0] sm:$0xff] %v3147_v55  ;;  %v3149_v59 = vmul.f32 %v5390_v14, %v2637_v23  ;;  %v2128_v62 = vmul.f32 %v3865_v32, %v5412_v36  ;;  %3882 = vpow2.f32 %v667_v6  ;;  %v669_v10 = vmul.f32 1.442695, %v346_v57 }
  0xcd   :  { %v3867_v41 = vpop.eup %3866  ;;  %3404 = vst [vmem:[#allocation5 + $0x1a8] sm:$0xff] %v3148_v27  ;;  %v2638_v13 = vmul.f32 %v3861_v29, %v2382_v31  ;;  %v2383_v33 = vsub.f32 2.0, %v2127_v49  ;;  %v347_v21 = vmin.f32 %v5457_v0, 20.0  ;;  %v348_v58 = vmin.f32 %v5459_v52, 20.0 }
  0xce   :  { %v3869_v2 = vpop.eup %3868  ;;  %3405 = vst [vmem:[#allocation5 + $0x1b0] sm:$0xff] %v3149_v59  ;;  %v2384_v39 = vsub.f32 2.0, %v2128_v62  ;;  %v1108_v4 = vadd.f32 2.0, %v3867_v41  ;;  %3884 = vpow2.f32 %v669_v10  ;;  %v349_v42 = vmin.f32 %v5463_v60, 20.0  ;;  %v5493_v62 = vld [vmem:[#allocation2 + $0x240] sm:$0xff] }
  0xcf   :  { %v3871_v14 = vpop.eup %3870  ;;  %v3150_v36 = vmul.f32 %v5397_v1, %v2638_v13  ;;  %v2639_v24 = vmul.f32 %v3863_v12, %v2383_v33  ;;  %v2129_v51 = vmul.f32 %v3869_v2, %v5421_v15  ;;  %v671_v45 = vmul.f32 1.442695, %v347_v21 }
  0xd0   :  { %v3873_v26 = vpop.eup %3872  ;;  %v2640_v43 = vmul.f32 %v3865_v32, %v2384_v39  ;;  %v1364_v50 = vmul.f32 %v3867_v41, %v1108_v4  ;;  %v1109_v25 = vadd.f32 2.0, %v3871_v14  ;;  %v673_v47 = vmul.f32 1.442695, %v348_v58  ;;  %v5508_v39 = vld [vmem:[#allocation2 + $0x248] sm:$0xff]  ;;  %v5512_v4 = vld [vmem:[#allocation2 + $0x258] sm:$0xff] }
  0xd1   :  { %v3875_v35 = vpop.eup %3874  ;;  %3406 = vst [vmem:[#allocation5 + $0x1b8] sm:$0xff] %v3150_v36  ;;  %v3151_v5 = vmul.f32 %v5405_v37, %v2639_v24  ;;  %v2385_v19 = vsub.f32 2.0, %v2129_v51  ;;  %v2130_v18 = vmul.f32 %v3873_v26, %v5431_v8  ;;  %3886 = vpow2.f32 %v671_v45 }
  0xd2   :  { %v3877_v1 = vpop.eup %3876  ;;  %v3152_v56 = vmul.f32 %v5415_v63, %v2640_v43  ;;  %v2131_v15 = vmul.f32 %v3875_v35, %v5441_v38  ;;  %v5478_v30 = vadd.f32 2.0, %v1364_v50  ;;  %v5481_v29 = vmul.f32 %v1364_v50, %v5367_v28 }
  0xd3   :  { %3407 = vst [vmem:[#allocation5 + $0x1c0] sm:$0xff] %v3151_v5  ;;  %v2641_v53 = vmul.f32 %v3869_v2, %v2385_v19  ;;  %v2386_v34 = vsub.f32 2.0, %v2130_v18  ;;  %v1365_v37 = vmul.f32 %v3871_v14, %v1109_v25  ;;  %v1110_v20 = vadd.f32 2.0, %v3877_v1  ;;  %v5535_v5 = vld [vmem:[#allocation2 + $0x260] sm:$0xff]  ;;  %v5537_v19 = vld [vmem:[#allocation2 + $0x268] sm:$0xff] }
  0xd4   :  { %v3879_v54 = vpop.eup %3878  ;;  %3408 = vst [vmem:[#allocation5 + $0x1c8] sm:$0xff] %v3152_v56  ;;  %v2387_v8 = vsub.f32 2.0, %v2131_v15  ;;  %3888 = vrcp.f32 %v5478_v30  ;;  %v675_v48 = vmul.f32 1.442695, %v349_v42  ;;  %v350_v63 = vmin.f32 %v5474_v7, 20.0  ;;  %v5540_v15 = vld [vmem:[#allocation2 + $0x270] sm:$0xff] }
  0xd5   :  { %v3881_v40 = vpop.eup %3880  ;;  %v3153_v38 = vmul.f32 %v5424_v61, %v2641_v53  ;;  %v2642_v6 = vmul.f32 %v3873_v26, %v2386_v34  ;;  %v5486_v12 = vadd.f32 2.0, %v1365_v37  ;;  %v5489_v28 = vmul.f32 %v1365_v37, %v5407_v17  ;;  %v5542_v53 = vld [vmem:[#allocation2 + $0x278] sm:$0xff] }
  0xd6   :  { %v3883_v55 = vpop.eup %3882  ;;  %v2643_v23 = vmul.f32 %v3875_v35, %v2387_v8  ;;  %v1366_v57 = vmul.f32 %v3877_v1, %v1110_v20  ;;  %v1111_v32 = vadd.f32 2.0, %v3879_v54  ;;  %v1112_v27 = vadd.f32 2.0, %v3881_v40 }
  0xd7   :  { %3409 = vst [vmem:[#allocation5 + $0x1d0] sm:$0xff] %v3153_v38  ;;  %v3154_v31 = vmul.f32 %v5434_v9, %v2642_v6  ;;  %3890 = vrcp.f32 %v5486_v12  ;;  %v1113_v49 = vadd.f32 2.0, %v3883_v55  ;;  %v677_v59 = vmul.f32 1.442695, %v350_v63 }
  0xd8   :  { %v3885_v61 = vpop.eup %3884  ;;  %v3155_v10 = vmul.f32 %v5444_v3, %v2643_v23  ;;  %v5496_v41 = vadd.f32 2.0, %v1366_v57  ;;  %v5499_v17 = vmul.f32 %v1366_v57, %v5409_v16  ;;  %v1367_v13 = vmul.f32 %v3879_v54, %v1111_v32  ;;  %v5510_v16 = vld [vmem:[#allocation2 + $0x250] sm:$0xff]  ;;  %v5556_v23 = vld [vmem:[#allocation2 + $0x280] sm:$0xff] }
  0xd9   :  { %3410 = vst [vmem:[#allocation5 + $0x1d8] sm:$0xff] %v3154_v31  ;;  %v1368_v33 = vmul.f32 %v3881_v40, %v1112_v27  ;;  %v1369_v21 = vmul.f32 %v3883_v55, %v1113_v49  ;;  %v1114_v58 = vadd.f32 2.0, %v3885_v61  ;;  %3892 = vpow2.f32 %v673_v47  ;;  %v5558_v49 = vld [vmem:[#allocation2 + $0x288] sm:$0xff] }
  0xda   :  { %3411 = vst [vmem:[#allocation5 + $0x1e0] sm:$0xff] %v3155_v10  ;;  %3894 = vrcp.f32 %v5496_v41  ;;  %v5502_v9 = vadd.f32 2.0, %v1367_v13  ;;  %v5505_v2 = vmul.f32 %v1367_v13, %v5427_v44  ;;  %v351_v3 = vmin.f32 %v5493_v62, 20.0 }
  0xdb   :  { %v3887_v42 = vpop.eup %3886  ;;  %v5514_v14 = vadd.f32 2.0, %v1368_v33  ;;  %v5517_v36 = vmul.f32 %v1368_v33, %v5436_v11  ;;  %v5519_v24 = vadd.f32 2.0, %v1369_v21  ;;  %v5522_v51 = vmul.f32 %v1369_v21, %v5438_v22 }
  0xdc   :  { %3896 = vrcp.f32 %v5502_v9  ;;  %v1370_v44 = vmul.f32 %v3885_v61, %v1114_v58  ;;  %v1115_v45 = vadd.f32 2.0, %v3887_v42  ;;  %v679_v26 = vmul.f32 1.442695, %v351_v3 }
  0xdd   :  { %3898 = vrcp.f32 %v5514_v14  ;;  %v352_v43 = vmin.f32 %v5508_v39, 20.0  ;;  %v353_v50 = vmin.f32 %v5510_v16, 20.0  ;;  %v354_v25 = vmin.f32 %v5512_v4, 20.0 }
  0xde   :  { %v3889_v11 = vpop.eup %3888  ;;  %3900 = vrcp.f32 %v5519_v24  ;;  %v5530_v47 = vadd.f32 2.0, %v1370_v44  ;;  %v5533_v22 = vmul.f32 %v1370_v44, %v5452_v46  ;;  %v1371_v35 = vmul.f32 %v3887_v42, %v1115_v45 }
  0xdf   :  { %v2132_v18 = vmul.f32 %v3889_v11, %v5478_v30  ;;  %3902 = vpow2.f32 %v675_v48  ;;  %v681_v1 = vmul.f32 1.442695, %v352_v43  ;;  %v683_v56 = vmul.f32 1.442695, %v353_v50 }
  0xe0   :  { %3904 = vrcp.f32 %v5530_v47  ;;  %v5545_v34 = vadd.f32 2.0, %v1371_v35  ;;  %v5548_v46 = vmul.f32 %v1371_v35, %v5457_v0  ;;  %v685_v37 = vmul.f32 1.442695, %v354_v25 }
  0xe1   :  { %v3891_v20 = vpop.eup %3890  ;;  %v2388_v54 = vsub.f32 2.0, %v2132_v18  ;;  %3906 = vpow2.f32 %v677_v59  ;;  %v355_v30 = vmin.f32 %v5535_v5, 20.0  ;;  %v356_v8 = vmin.f32 %v5537_v19, 20.0 }
  0xe2   :  { %v2133_v48 = vmul.f32 %v3891_v20, %v5486_v12  ;;  %3908 = vrcp.f32 %v5545_v34  ;;  %v357_v63 = vmin.f32 %v5540_v15, 20.0  ;;  %v358_v40 = vmin.f32 %v5542_v53, 20.0 }
  0xe3   :  { %v3893_v38 = vpop.eup %3892  ;;  %v2644_v6 = vmul.f32 %v3889_v11, %v2388_v54  ;;  %3910 = vpow2.f32 %v679_v26  ;;  %v687_v0 = vmul.f32 1.442695, %v355_v30  ;;  %v689_v55 = vmul.f32 1.442695, %v356_v8 }
  0xe4   :  { %v3895_v57 = vpop.eup %3894  ;;  %v2389_v32 = vsub.f32 2.0, %v2133_v48  ;;  %v1116_v27 = vadd.f32 2.0, %v3893_v38  ;;  %3912 = vpow2.f32 %v681_v1  ;;  %v691_v31 = vmul.f32 1.442695, %v357_v63 }
  0xe5   :  { %v3156_v12 = vmul.f32 %v5481_v29, %v2644_v6  ;;  %v2134_v59 = vmul.f32 %v3895_v57, %v5496_v41  ;;  %3914 = vpow2.f32 %v683_v56  ;;  %v5562_v61 = vmul.f32 1.442695, %v358_v40 }
  0xe6   :  { %v3897_v10 = vpop.eup %3896  ;;  %v2645_v13 = vmul.f32 %v3891_v20, %v2389_v32  ;;  %v1372_v33 = vmul.f32 %v3893_v38, %v1116_v27  ;;  %3916 = vpow2.f32 %v685_v37  ;;  %v359_v21 = vmin.f32 %v5556_v23, 20.0 }
  0xe7   :  { %v3899_v58 = vpop.eup %3898  ;;  %3412 = vst [vmem:[#allocation5 + $0x1e8] sm:$0xff] %v3156_v12  ;;  %v2390_v3 = vsub.f32 2.0, %v2134_v59  ;;  %v2135_v42 = vmul.f32 %v3897_v10, %v5502_v9  ;;  %3918 = vpow2.f32 %v687_v0  ;;  %v360_v44 = vmin.f32 %v5558_v49, 20.0 }
  0xe8   :  { %v3901_v29 = vpop.eup %3900  ;;  %v3157_v41 = vmul.f32 %v5489_v28, %v2645_v13  ;;  %v2136_v45 = vmul.f32 %v3899_v58, %v5514_v14  ;;  %v5569_v26 = vadd.f32 2.0, %v1372_v33  ;;  %v5572_v43 = vmul.f32 %v1372_v33, %v5459_v52 }
  0xe9   :  { %v3903_v50 = vpop.eup %3902  ;;  %v2646_v25 = vmul.f32 %v3895_v57, %v2390_v3  ;;  %v2391_v11 = vsub.f32 2.0, %v2135_v42  ;;  %v2137_v35 = vmul.f32 %v3901_v29, %v5519_v24  ;;  %3920 = vpow2.f32 %v689_v55 }
  0xea   :  { %v3905_v9 = vpop.eup %3904  ;;  %3413 = vst [vmem:[#allocation5 + $0x1f0] sm:$0xff] %v3157_v41  ;;  %v2392_v18 = vsub.f32 2.0, %v2136_v45  ;;  %3922 = vrcp.f32 %v5569_v26  ;;  %v1117_v1 = vadd.f32 2.0, %v3903_v50  ;;  %v5576_v28 = vmul.f32 1.442695, %v359_v21 }
  0xeb   :  { %v3907_v14 = vpop.eup %3906  ;;  %v3158_v56 = vmul.f32 %v5499_v17, %v2646_v25  ;;  %v2647_v37 = vmul.f32 %v3897_v10, %v2391_v11  ;;  %v2393_v52 = vsub.f32 2.0, %v2137_v35  ;;  %v2138_v20 = vmul.f32 %v3905_v9, %v5530_v47 }
  0xec   :  { %v3909_v54 = vpop.eup %3908  ;;  %v2648_v30 = vmul.f32 %v3899_v58, %v2392_v18  ;;  %v1373_v8 = vmul.f32 %v3903_v50, %v1117_v1  ;;  %v1118_v24 = vadd.f32 2.0, %v3907_v14  ;;  %3924 = vpow2.f32 %v691_v31 }
  0xed   :  { %v3911_v48 = vpop.eup %3910  ;;  %3414 = vst [vmem:[#allocation5 + $0x1f8] sm:$0xff] %v3158_v56  ;;  %v3159_v63 = vmul.f32 %v5505_v2, %v2647_v37  ;;  %v2649_v40 = vmul.f32 %v3901_v29, %v2393_v52  ;;  %v2394_v38 = vsub.f32 2.0, %v2138_v20  ;;  %v2139_v6 = vmul.f32 %v3909_v54, %v5545_v34 }
  0xee   :  { %v3913_v0 = vpop.eup %3912  ;;  %v3160_v17 = vmul.f32 %v5517_v36, %v2648_v30  ;;  %v5583_v55 = vadd.f32 2.0, %v1373_v8  ;;  %v5586_v47 = vmul.f32 %v1373_v8, %v5463_v60  ;;  %v1374_v57 = vmul.f32 %v3907_v14, %v1118_v24 }
  0xef   :  { %v3915_v32 = vpop.eup %3914  ;;  %3415 = vst [vmem:[#allocation5 + $0x200] sm:$0xff] %v3159_v63  ;;  %v3161_v27 = vmul.f32 %v5522_v51, %v2649_v40  ;;  %v2650_v31 = vmul.f32 %v3905_v9, %v2394_v38  ;;  %v2395_v12 = vsub.f32 2.0, %v2139_v6  ;;  %v1119_v2 = vadd.f32 2.0, %v3911_v48 }
  0xf0   :  { %v3917_v59 = vpop.eup %3916  ;;  %3416 = vst [vmem:[#allocation5 + $0x208] sm:$0xff] %v3160_v17  ;;  %3926 = vrcp.f32 %v5583_v55  ;;  %v5590_v34 = vadd.f32 2.0, %v1374_v57  ;;  %v5593_v36 = vmul.f32 %v1374_v57, %v5474_v7  ;;  %v1120_v10 = vadd.f32 2.0, %v3913_v0 }
  0xf1   :  { %v3919_v60 = vpop.eup %3918  ;;  %3417 = vst [vmem:[#allocation5 + $0x210] sm:$0xff] %v3161_v27  ;;  %v3162_v13 = vmul.f32 %v5533_v22, %v2650_v31  ;;  %v2651_v33 = vmul.f32 %v3909_v54, %v2395_v12  ;;  %v1375_v21 = vmul.f32 %v3911_v48, %v1119_v2  ;;  %v1121_v51 = vadd.f32 2.0, %v3915_v32  ;;  %v5631_v54 = vld [vmem:[#allocation2 + $0x2a0] sm:$0xff]  ;;  %v5650_v27 = vld [vmem:[#allocation2 + $0x2b0] sm:$0xff]  ;;  %v5652_v31 = vld [vmem:[#allocation2 + $0x2b8] sm:$0xff] }
  0xf2   :  { %3928 = vrcp.f32 %v5590_v34  ;;  %v1376_v58 = vmul.f32 %v3913_v0, %v1120_v10  ;;  %v1122_v3 = vadd.f32 2.0, %v3917_v59  ;;  %v1123_v42 = vadd.f32 2.0, %v3919_v60 }
  0xf3   :  { %v3921_v29 = vpop.eup %3920  ;;  %3418 = vst [vmem:[#allocation5 + $0x218] sm:$0xff] %v3162_v13  ;;  %v3163_v41 = vmul.f32 %v5548_v46, %v2651_v33  ;;  %v5598_v45 = vadd.f32 2.0, %v1375_v21  ;;  %v5601_v7 = vmul.f32 %v1375_v21, %v5493_v62  ;;  %v1377_v50 = vmul.f32 %v3915_v32, %v1121_v51  ;;  %v5615_v62 = vld [vmem:[#allocation2 + $0x290] sm:$0xff]  ;;  %v5648_v32 = vld [vmem:[#allocation2 + $0x2a8] sm:$0xff] }
  0xf4   :  { %v3923_v25 = vpop.eup %3922  ;;  %v5603_v22 = vadd.f32 2.0, %v1376_v58  ;;  %v5606_v11 = vmul.f32 %v1376_v58, %v5508_v39  ;;  %v1378_v35 = vmul.f32 %v3917_v59, %v1122_v3  ;;  %v1379_v9 = vmul.f32 %v3919_v60, %v1123_v42 }
  0xf5   :  { %3419 = vst [vmem:[#allocation5 + $0x220] sm:$0xff] %v3163_v41  ;;  %v2140_v18 = vmul.f32 %v3923_v25, %v5569_v26  ;;  %3930 = vrcp.f32 %v5598_v45  ;;  %v5610_v46 = vadd.f32 2.0, %v1377_v50  ;;  %v5613_v1 = vmul.f32 %v1377_v50, %v5510_v16  ;;  %v5625_v26 = vld [vmem:[#allocation2 + $0x298] sm:$0xff] }
  0xf6   :  { %v3925_v14 = vpop.eup %3924  ;;  %3932 = vrcp.f32 %v5603_v22  ;;  %v5618_v56 = vadd.f32 2.0, %v1378_v35  ;;  %v5621_v39 = vmul.f32 %v1378_v35, %v5512_v4  ;;  %v5623_v37 = vadd.f32 2.0, %v1379_v9 }
  0xf7   :  { %v2396_v52 = vsub.f32 2.0, %v2140_v18  ;;  %3934 = vrcp.f32 %v5610_v46  ;;  %v5629_v16 = vmul.f32 %v1379_v9, %v5535_v5  ;;  %v1124_v20 = vadd.f32 2.0, %v3921_v29 }
  0xf8   :  { %3936 = vrcp.f32 %v5618_v56  ;;  %v1125_v30 = vadd.f32 2.0, %v3925_v14  ;;  %v697_v4 = vmul.f32 1.442695, %v360_v44  ;;  %v361_v8 = vmin.f32 %v5615_v62, 20.0 }
  0xf9   :  { %v2652_v24 = vmul.f32 %v3923_v25, %v2396_v52  ;;  %3938 = vrcp.f32 %v5623_v37  ;;  %v1380_v48 = vmul.f32 %v3921_v29, %v1124_v20  ;;  %v362_v63 = vmin.f32 %v5625_v26, 20.0 }
  0xfa   :  { %v3927_v40 = vpop.eup %3926  ;;  %v1381_v5 = vmul.f32 %v3925_v14, %v1125_v30  ;;  %3940 = vpow2.f32 %v5562_v61  ;;  %v699_v38 = vmul.f32 1.442695, %v361_v8  ;;  %v363_v6 = vmin.f32 %v5631_v54, 20.0 }
  0xfb   :  { %v3164_v0 = vmul.f32 %v5572_v43, %v2652_v24  ;;  %v2141_v17 = vmul.f32 %v3927_v40, %v5583_v55  ;;  %v5643_v44 = vadd.f32 2.0, %v1380_v48  ;;  %v5646_v57 = vmul.f32 %v1380_v48, %v5537_v19  ;;  %v5660_v55 = vld [vmem:[#allocation2 + $0x2c0] sm:$0xff] }
  0xfc   :  { %v3929_v12 = vpop.eup %3928  ;;  %v5654_v61 = vadd.f32 2.0, %v1381_v5  ;;  %v5657_v2 = vmul.f32 %v1381_v5, %v5540_v15  ;;  %3942 = vpow2.f32 %v5576_v28  ;;  %v701_v43 = vmul.f32 1.442695, %v362_v63 }
  0xfd   :  { %3420 = vst [vmem:[#allocation5 + $0x228] sm:$0xff] %v3164_v0  ;;  %v2397_v19 = vsub.f32 2.0, %v2141_v17  ;;  %v2142_v59 = vmul.f32 %v3929_v12, %v5590_v34  ;;  %3944 = vrcp.f32 %v5643_v44  ;;  %v703_v10 = vmul.f32 1.442695, %v363_v6 }
  0xfe   :  { %3946 = vrcp.f32 %v5654_v61  ;;  %v364_v60 = vmin.f32 %v5648_v32, 20.0  ;;  %v365_v13 = vmin.f32 %v5650_v27, 20.0  ;;  %v366_v15 = vmin.f32 %v5652_v31, 20.0 }
  0xff   :  { %v3931_v33 = vpop.eup %3930  ;;  %v2653_v28 = vmul.f32 %v3927_v40, %v2397_v19  ;;  %v2398_v21 = vsub.f32 2.0, %v2142_v59  ;;  %3948 = vpow2.f32 %v697_v4  ;;  %v367_v51 = vmin.f32 %v5660_v55, 20.0 }
 0x100   :  { %v3933_v58 = vpop.eup %3932  ;;  %v2143_v34 = vmul.f32 %v3931_v33, %v5598_v45  ;;  %3950 = vpow2.f32 %v699_v38  ;;  %v705_v3 = vmul.f32 1.442695, %v364_v60  ;;  %v707_v42 = vmul.f32 1.442695, %v365_v13 }
 0x101   :  { %v3935_v29 = vpop.eup %3934  ;;  %v3165_v41 = vmul.f32 %v5586_v47, %v2653_v28  ;;  %v2654_v50 = vmul.f32 %v3929_v12, %v2398_v21  ;;  %v2144_v25 = vmul.f32 %v3933_v58, %v5603_v22  ;;  %3952 = vpow2.f32 %v701_v43 }
 0x102   :  { %v3937_v35 = vpop.eup %3936  ;;  %v2399_v9 = vsub.f32 2.0, %v2143_v34  ;;  %v2145_v18 = vmul.f32 %v3935_v29, %v5610_v46  ;;  %3954 = vpow2.f32 %v703_v10  ;;  %v709_v14 = vmul.f32 1.442695, %v366_v15  ;;  %v5680_v10 = vld [vmem:[#allocation2 + $0x2c8] sm:$0xff] }
 0x103   :  { %v3939_v52 = vpop.eup %3938  ;;  %3421 = vst [vmem:[#allocation5 + $0x230] sm:$0xff] %v3165_v41  ;;  %v3166_v45 = vmul.f32 %v5593_v36, %v2654_v50  ;;  %v2400_v20 = vsub.f32 2.0, %v2144_v25  ;;  %v2146_v30 = vmul.f32 %v3937_v35, %v5618_v56  ;;  %3956 = vpow2.f32 %v705_v3 }
 0x104   :  { %v3941_v4 = vpop.eup %3940  ;;  %v2655_v47 = vmul.f32 %v3931_v33, %v2399_v9  ;;  %v2401_v8 = vsub.f32 2.0, %v2145_v18  ;;  %v2147_v22 = vmul.f32 %v3939_v52, %v5623_v37  ;;  %3958 = vpow2.f32 %v707_v42 }
 0x105   :  { %3422 = vst [vmem:[#allocation5 + $0x238] sm:$0xff] %v3166_v45  ;;  %v2656_v24 = vmul.f32 %v3933_v58, %v2400_v20  ;;  %v2402_v48 = vsub.f32 2.0, %v2146_v30  ;;  %v1126_v46 = vadd.f32 2.0, %v3941_v4  ;;  %3960 = vpow2.f32 %v709_v14 }
 0x106   :  { %v3943_v63 = vpop.eup %3942  ;;  %v3167_v40 = vmul.f32 %v5601_v7, %v2655_v47  ;;  %v2657_v5 = vmul.f32 %v3935_v29, %v2401_v8  ;;  %v2403_v36 = vsub.f32 2.0, %v2147_v22  ;;  %v711_v38 = vmul.f32 1.442695, %v367_v51 }
 0x107   :  { %v3945_v6 = vpop.eup %3944  ;;  %v3168_v56 = vmul.f32 %v5606_v11, %v2656_v24  ;;  %v2658_v0 = vmul.f32 %v3937_v35, %v2402_v48  ;;  %v1382_v17 = vmul.f32 %v3941_v4, %v1126_v46  ;;  %v1127_v12 = vadd.f32 2.0, %v3943_v63 }
 0x108   :  { %v3947_v43 = vpop.eup %3946  ;;  %3423 = vst [vmem:[#allocation5 + $0x240] sm:$0xff] %v3167_v40  ;;  %v3169_v37 = vmul.f32 %v5613_v1, %v2657_v5  ;;  %v2659_v19 = vmul.f32 %v3939_v52, %v2403_v36  ;;  %v2148_v59 = vmul.f32 %v3945_v6, %v5643_v44  ;;  %3962 = vpow2.f32 %v711_v38  ;;  %v5723_v38 = vld [vmem:[#allocation2 + $0x2d0] sm:$0xff] }
 0x109   :  { %v3949_v7 = vpop.eup %3948  ;;  %3424 = vst [vmem:[#allocation5 + $0x248] sm:$0xff] %v3168_v56  ;;  %v3170_v60 = vmul.f32 %v5621_v39, %v2658_v0  ;;  %v2149_v13 = vmul.f32 %v3947_v43, %v5654_v61  ;;  %v5684_v11 = vadd.f32 2.0, %v1382_v17  ;;  %v5687_v15 = vmul.f32 %v1382_v17, %v5542_v53  ;;  %v5735_v0 = vld [vmem:[#allocation2 + $0x2e0] sm:$0xff] }
 0x10a   :  { %v3951_v33 = vpop.eup %3950  ;;  %3425 = vst [vmem:[#allocation5 + $0x250] sm:$0xff] %v3169_v37  ;;  %v3171_v1 = vmul.f32 %v5629_v16, %v2659_v19  ;;  %v2404_v28 = vsub.f32 2.0, %v2148_v59  ;;  %v1383_v44 = vmul.f32 %v3943_v63, %v1127_v12  ;;  %v1128_v21 = vadd.f32 2.0, %v3949_v7 }
 0x10b   :  { %v3953_v51 = vpop.eup %3952  ;;  %3426 = vst [vmem:[#allocation5 + $0x258] sm:$0xff] %v3170_v60  ;;  %v2405_v58 = vsub.f32 2.0, %v2149_v13  ;;  %3964 = vrcp.f32 %v5684_v11  ;;  %v1129_v39 = vadd.f32 2.0, %v3951_v33  ;;  %v368_v61 = vmin.f32 %v5680_v10, 20.0  ;;  %v5749_v60 = vld [vmem:[#allocation2 + $0x2e8] sm:$0xff] }
 0x10c   :  { %v3955_v34 = vpop.eup %3954  ;;  %3427 = vst [vmem:[#allocation5 + $0x260] sm:$0xff] %v3171_v1  ;;  %v2660_v3 = vmul.f32 %v3945_v6, %v2404_v28  ;;  %v5692_v53 = vadd.f32 2.0, %v1383_v44  ;;  %v5695_v42 = vmul.f32 %v1383_v44, %v5556_v23  ;;  %v1384_v16 = vmul.f32 %v3949_v7, %v1128_v21  ;;  %v5725_v6 = vld [vmem:[#allocation2 + $0x2d8] sm:$0xff] }
 0x10d   :  { %v3957_v29 = vpop.eup %3956  ;;  %v2661_v41 = vmul.f32 %v3947_v43, %v2405_v58  ;;  %v1385_v50 = vmul.f32 %v3951_v33, %v1129_v39  ;;  %v1130_v25 = vadd.f32 2.0, %v3953_v51  ;;  %v1131_v35 = vadd.f32 2.0, %v3955_v34  ;;  %v5758_v33 = vld [vmem:[#allocation2 + $0x2f0] sm:$0xff] }
 0x10e   :  { %v3959_v9 = vpop.eup %3958  ;;  %v3172_v18 = vmul.f32 %v5646_v57, %v2660_v3  ;;  %3966 = vrcp.f32 %v5692_v53  ;;  %v5699_v14 = vadd.f32 2.0, %v1384_v16  ;;  %v5702_v52 = vmul.f32 %v1384_v16, %v5558_v49 }
 0x10f   :  { %v3961_v45 = vpop.eup %3960  ;;  %v3173_v23 = vmul.f32 %v5657_v2, %v2661_v41  ;;  %v5705_v20 = vadd.f32 2.0, %v1385_v50  ;;  %v5708_v30 = vmul.f32 %v1385_v50, %v5615_v62  ;;  %v1386_v4 = vmul.f32 %v3953_v51, %v1130_v25  ;;  %v5769_v25 = vld [vmem:[#allocation2 + $0x300] sm:$0xff] }
 0x110   :  { %3428 = vst [vmem:[#allocation5 + $0x268] sm:$0xff] %v3172_v18  ;;  %3968 = vrcp.f32 %v5699_v14  ;;  %v1387_v57 = vmul.f32 %v3955_v34, %v1131_v35  ;;  %v1132_v47 = vadd.f32 2.0, %v3957_v29  ;;  %v1133_v8 = vadd.f32 2.0, %v3959_v9 }
 0x111   :  { %3429 = vst [vmem:[#allocation5 + $0x270] sm:$0xff] %v3173_v23  ;;  %3970 = vrcp.f32 %v5705_v20  ;;  %v5712_v49 = vadd.f32 2.0, %v1386_v4  ;;  %v5715_v22 = vmul.f32 %v1386_v4, %v5625_v26  ;;  %v1134_v2 = vadd.f32 2.0, %v3961_v45 }
 0x112   :  { %v3963_v24 = vpop.eup %3962  ;;  %v5717_v48 = vadd.f32 2.0, %v1387_v57  ;;  %v5720_v62 = vmul.f32 %v1387_v57, %v5631_v54  ;;  %v1388_v46 = vmul.f32 %v3957_v29, %v1132_v47  ;;  %v1389_v63 = vmul.f32 %v3959_v9, %v1133_v8 }
 0x113   :  { %3972 = vrcp.f32 %v5712_v49  ;;  %v1390_v40 = vmul.f32 %v3961_v45, %v1134_v2  ;;  %v1135_v5 = vadd.f32 2.0, %v3963_v24  ;;  %v713_v36 = vmul.f32 1.442695, %v368_v61  ;;  %v5775_v2 = vld [vmem:[#allocation2 + $0x308] sm:$0xff] }
 0x114   :  { %3974 = vrcp.f32 %v5717_v48  ;;  %v5728_v26 = vadd.f32 2.0, %v1388_v46  ;;  %v5731_v56 = vmul.f32 %v1388_v46, %v5648_v32  ;;  %v5733_v54 = vadd.f32 2.0, %v1389_v63 }
 0x115   :  { %v3965_v17 = vpop.eup %3964  ;;  %v5738_v12 = vmul.f32 %v1389_v63, %v5650_v27  ;;  %v5740_v43 = vadd.f32 2.0, %v1390_v40  ;;  %v5743_v37 = vmul.f32 %v1390_v40, %v5652_v31  ;;  %v1391_v19 = vmul.f32 %v3963_v24, %v1135_v5 }
 0x116   :  { %v2150_v59 = vmul.f32 %v3965_v17, %v5684_v11  ;;  %3976 = vrcp.f32 %v5728_v26  ;;  %v369_v32 = vmin.f32 %v5723_v38, 20.0  ;;  %v370_v7 = vmin.f32 %v5725_v6, 20.0  ;;  %v5760_v11 = vld [vmem:[#allocation2 + $0x2f8] sm:$0xff] }
 0x117   :  { %3978 = vrcp.f32 %v5733_v54  ;;  %v5752_v27 = vadd.f32 2.0, %v1391_v19  ;;  %v5755_v13 = vmul.f32 %v1391_v19, %v5660_v55  ;;  %v371_v31 = vmin.f32 %v5735_v0, 20.0 }
 0x118   :  { %v3967_v1 = vpop.eup %3966  ;;  %v2406_v28 = vsub.f32 2.0, %v2150_v59  ;;  %3980 = vrcp.f32 %v5740_v43  ;;  %v715_v44 = vmul.f32 1.442695, %v369_v32  ;;  %v717_v21 = vmul.f32 1.442695, %v370_v7  ;;  %v5782_v32 = vld [vmem:[#allocation2 + $0x310] sm:$0xff] }
 0x119   :  { %v2151_v51 = vmul.f32 %v3967_v1, %v5692_v53  ;;  %3982 = vrcp.f32 %v5752_v27  ;;  %v719_v58 = vmul.f32 1.442695, %v371_v31  ;;  %v372_v55 = vmin.f32 %v5749_v60, 20.0 }
 0x11a   :  { %v3969_v39 = vpop.eup %3968  ;;  %v2662_v61 = vmul.f32 %v3965_v17, %v2406_v28  ;;  %3984 = vpow2.f32 %v713_v36  ;;  %v373_v34 = vmin.f32 %v5758_v33, 20.0  ;;  %v374_v3 = vmin.f32 %v5760_v11, 20.0 }
 0x11b   :  { %v3971_v16 = vpop.eup %3970  ;;  %v2407_v29 = vsub.f32 2.0, %v2151_v51  ;;  %v2152_v41 = vmul.f32 %v3969_v39, %v5699_v14  ;;  %3986 = vpow2.f32 %v715_v44  ;;  %v721_v50 = vmul.f32 1.442695, %v372_v55 }
 0x11c   :  { %v3174_v53 = vmul.f32 %v5687_v15, %v2662_v61  ;;  %v2153_v35 = vmul.f32 %v3971_v16, %v5705_v20  ;;  %3988 = vpow2.f32 %v717_v21  ;;  %v723_v9 = vmul.f32 1.442695, %v373_v34 }
 0x11d   :  { %v3973_v18 = vpop.eup %3972  ;;  %v2663_v45 = vmul.f32 %v3967_v1, %v2407_v29  ;;  %v2408_v23 = vsub.f32 2.0, %v2152_v41  ;;  %3990 = vpow2.f32 %v719_v58  ;;  %v725_v4 = vmul.f32 1.442695, %v374_v3 }
 0x11e   :  { %v3975_v57 = vpop.eup %3974  ;;  %3430 = vst [vmem:[#allocation5 + $0x278] sm:$0xff] %v3174_v53  ;;  %v2409_v47 = vsub.f32 2.0, %v2153_v35  ;;  %v2154_v14 = vmul.f32 %v3973_v18, %v5712_v49  ;;  %3992 = vpow2.f32 %v721_v50  ;;  %v375_v8 = vmin.f32 %v5769_v25, 20.0 }
 0x11f   :  { %v3175_v15 = vmul.f32 %v5695_v42, %v2663_v45  ;;  %v2664_v20 = vmul.f32 %v3969_v39, %v2408_v23  ;;  %v2155_v24 = vmul.f32 %v3975_v57, %v5717_v48  ;;  %3994 = vpow2.f32 %v723_v9 }
 0x120   :  { %v3977_v46 = vpop.eup %3976  ;;  %v2665_v63 = vmul.f32 %v3971_v16, %v2409_v47  ;;  %v2410_v40 = vsub.f32 2.0, %v2154_v14  ;;  %3996 = vpow2.f32 %v725_v4  ;;  %v727_v5 = vmul.f32 1.442695, %v375_v8 }
 0x121   :  { %v3979_v36 = vpop.eup %3978  ;;  %3431 = vst [vmem:[#allocation5 + $0x280] sm:$0xff] %v3175_v15  ;;  %v3176_v49 = vmul.f32 %v5702_v52, %v2664_v20  ;;  %v2411_v17 = vsub.f32 2.0, %v2155_v24  ;;  %v2156_v19 = vmul.f32 %v3977_v46, %v5728_v26  ;;  %v376_v59 = vmin.f32 %v5775_v2, 20.0 }
 0x122   :  { %v3981_v42 = vpop.eup %3980  ;;  %v3177_v48 = vmul.f32 %v5708_v30, %v2665_v63  ;;  %v2666_v7 = vmul.f32 %v3973_v18, %v2410_v40  ;;  %v2157_v31 = vmul.f32 %v3979_v36, %v5733_v54  ;;  %3998 = vpow2.f32 %v727_v5  ;;  %v5811_v63 = vld [vmem:[#allocation2 + $0x318] sm:$0xff] }
 0x123   :  { %v3983_v1 = vpop.eup %3982  ;;  %3432 = vst [vmem:[#allocation5 + $0x288] sm:$0xff] %v3176_v49  ;;  %v2667_v28 = vmul.f32 %v3975_v57, %v2411_v17  ;;  %v2412_v44 = vsub.f32 2.0, %v2156_v19  ;;  %v2158_v52 = vmul.f32 %v3981_v42, %v5740_v43  ;;  %v729_v21 = vmul.f32 1.442695, %v376_v59 }
 0x124   :  { %v3985_v51 = vpop.eup %3984  ;;  %3433 = vst [vmem:[#allocation5 + $0x290] sm:$0xff] %v3177_v48  ;;  %v3178_v26 = vmul.f32 %v5715_v22, %v2666_v7  ;;  %v2413_v58 = vsub.f32 2.0, %v2157_v31  ;;  %v2159_v55 = vmul.f32 %v3983_v1, %v5752_v27  ;;  %v377_v30 = vmin.f32 %v5782_v32, 20.0  ;;  %v5827_v31 = vld [vmem:[#allocation2 + $0x320] sm:$0xff] }
 0x125   :  { %v3987_v39 = vpop.eup %3986  ;;  %v3179_v54 = vmul.f32 %v5720_v62, %v2667_v28  ;;  %v2668_v61 = vmul.f32 %v3977_v46, %v2412_v44  ;;  %v2414_v34 = vsub.f32 2.0, %v2158_v52  ;;  %v1136_v3 = vadd.f32 2.0, %v3985_v51 }
 0x126   :  { %v3989_v16 = vpop.eup %3988  ;;  %3434 = vst [vmem:[#allocation5 + $0x298] sm:$0xff] %v3178_v26  ;;  %v2669_v29 = vmul.f32 %v3979_v36, %v2413_v58  ;;  %v2415_v43 = vsub.f32 2.0, %v2159_v55  ;;  %v1137_v41 = vadd.f32 2.0, %v3987_v39  ;;  %4000 = vpow2.f32 %v729_v21  ;;  %v5834_v21 = vld [vmem:[#allocation2 + $0x328] sm:$0xff]  ;;  %v5838_v26 = vld [vmem:[#allocation2 + $0x338] sm:$0xff] }
 0x127   :  { %v3991_v50 = vpop.eup %3990  ;;  %3435 = vst [vmem:[#allocation5 + $0x2a0] sm:$0xff] %v3179_v54  ;;  %v3180_v22 = vmul.f32 %v5731_v56, %v2668_v61  ;;  %v2670_v53 = vmul.f32 %v3981_v42, %v2414_v34  ;;  %v1392_v27 = vmul.f32 %v3985_v51, %v1136_v3  ;;  %v1138_v35 = vadd.f32 2.0, %v3989_v16  ;;  %v5836_v51 = vld [vmem:[#allocation2 + $0x330] sm:$0xff] }
 0x128   :  { %v3993_v9 = vpop.eup %3992  ;;  %v3181_v18 = vmul.f32 %v5738_v12, %v2669_v29  ;;  %v2671_v62 = vmul.f32 %v3983_v1, %v2415_v43  ;;  %v1393_v45 = vmul.f32 %v3987_v39, %v1137_v41  ;;  %v1139_v23 = vadd.f32 2.0, %v3991_v50  ;;  %v5861_v43 = vld [vmem:[#allocation2 + $0x348] sm:$0xff] }
 0x129   :  { %v3995_v4 = vpop.eup %3994  ;;  %3436 = vst [vmem:[#allocation5 + $0x2a8] sm:$0xff] %v3180_v22  ;;  %v3182_v57 = vmul.f32 %v5743_v37, %v2670_v53  ;;  %v5794_v47 = vadd.f32 2.0, %v1392_v27  ;;  %v5797_v14 = vmul.f32 %v1392_v27, %v5680_v10  ;;  %v1394_v8 = vmul.f32 %v3989_v16, %v1138_v35 }
 0x12a   :  { %v3997_v56 = vpop.eup %3996  ;;  %3437 = vst [vmem:[#allocation5 + $0x2b0] sm:$0xff] %v3181_v18  ;;  %v3183_v15 = vmul.f32 %v5755_v13, %v2671_v62  ;;  %v5800_v20 = vadd.f32 2.0, %v1393_v45  ;;  %v5803_v12 = vmul.f32 %v1393_v45, %v5723_v38  ;;  %v1395_v24 = vmul.f32 %v3991_v50, %v1139_v23 }
 0x12b   :  { %3438 = vst [vmem:[#allocation5 + $0x2b8] sm:$0xff] %v3182_v57  ;;  %4002 = vrcp.f32 %v5794_v47  ;;  %v5806_v37 = vadd.f32 2.0, %v1394_v8  ;;  %v5809_v46 = vmul.f32 %v1394_v8, %v5725_v6  ;;  %v1140_v10 = vadd.f32 2.0, %v3993_v9 }
 0x12c   :  { %v3999_v40 = vpop.eup %3998  ;;  %3439 = vst [vmem:[#allocation5 + $0x2c0] sm:$0xff] %v3183_v15  ;;  %4004 = vrcp.f32 %v5800_v20  ;;  %v5814_v13 = vadd.f32 2.0, %v1395_v24  ;;  %v5817_v38 = vmul.f32 %v1395_v24, %v5735_v0  ;;  %v1141_v5 = vadd.f32 2.0, %v3995_v4 }
 0x12d   :  { %4006 = vrcp.f32 %v5806_v37  ;;  %v1396_v36 = vmul.f32 %v3993_v9, %v1140_v10  ;;  %v1142_v49 = vadd.f32 2.0, %v3997_v56  ;;  %v1143_v17 = vadd.f32 2.0, %v3999_v40 }
 0x12e   :  { %4008 = vrcp.f32 %v5814_v13  ;;  %v1397_v6 = vmul.f32 %v3995_v4, %v1141_v5  ;;  %v731_v19 = vmul.f32 1.442695, %v377_v30  ;;  %v378_v59 = vmin.f32 %v5811_v63, 20.0  ;;  %v5848_v30 = vld [vmem:[#allocation2 + $0x340] sm:$0xff] }
 0x12f   :  { %v5822_v42 = vadd.f32 2.0, %v1396_v36  ;;  %v5825_v48 = vmul.f32 %v1396_v36, %v5749_v60  ;;  %v1398_v7 = vmul.f32 %v3997_v56, %v1142_v49  ;;  %v1399_v0 = vmul.f32 %v3999_v40, %v1143_v17 }
 0x130   :  { %v4001_v1 = vpop.eup %4000  ;;  %v5829_v28 = vadd.f32 2.0, %v1397_v6  ;;  %v5832_v44 = vmul.f32 %v1397_v6, %v5758_v33  ;;  %4010 = vpow2.f32 %v731_v19  ;;  %v733_v52 = vmul.f32 1.442695, %v378_v59 }
 0x131   :  { %4012 = vrcp.f32 %v5822_v42  ;;  %v5841_v60 = vadd.f32 2.0, %v1398_v7  ;;  %v5844_v58 = vmul.f32 %v1398_v7, %v5760_v11  ;;  %v5846_v55 = vadd.f32 2.0, %v1399_v0 }
 0x132   :  { %4014 = vrcp.f32 %v5829_v28  ;;  %v5852_v33 = vmul.f32 %v1399_v0, %v5769_v25  ;;  %v1144_v39 = vadd.f32 2.0, %v4001_v1  ;;  %v379_v54 = vmin.f32 %v5827_v31, 20.0  ;;  %v5863_v25 = vld [vmem:[#allocation2 + $0x350] sm:$0xff] }
 0x133   :  { %4016 = vrcp.f32 %v5841_v60  ;;  %v380_v61 = vmin.f32 %v5834_v21, 20.0  ;;  %v381_v34 = vmin.f32 %v5836_v51, 20.0  ;;  %v382_v11 = vmin.f32 %v5838_v26, 20.0 }
 0x134   :  { %4018 = vrcp.f32 %v5846_v55  ;;  %v1400_v3 = vmul.f32 %v4001_v1, %v1144_v39  ;;  %v735_v16 = vmul.f32 1.442695, %v379_v54  ;;  %v383_v29 = vmin.f32 %v5848_v30, 20.0 }
 0x135   :  { %v4003_v41 = vpop.eup %4002  ;;  %4020 = vpow2.f32 %v733_v52  ;;  %v737_v50 = vmul.f32 1.442695, %v380_v61  ;;  %v739_v22 = vmul.f32 1.442695, %v381_v34  ;;  %v741_v53 = vmul.f32 1.442695, %v382_v11 }
 0x136   :  { %v4005_v27 = vpop.eup %4004  ;;  %v2160_v35 = vmul.f32 %v4003_v41, %v5794_v47  ;;  %v5866_v9 = vadd.f32 2.0, %v1400_v3  ;;  %v5869_v18 = vmul.f32 %v1400_v3, %v5775_v2  ;;  %4022 = vpow2.f32 %v735_v16 }
 0x137   :  { %v4007_v62 = vpop.eup %4006  ;;  %v2161_v45 = vmul.f32 %v4005_v27, %v5800_v20  ;;  %4024 = vpow2.f32 %v737_v50  ;;  %v743_v23 = vmul.f32 1.442695, %v383_v29  ;;  %v384_v4 = vmin.f32 %v5861_v43, 20.0 }
 0x138   :  { %v4009_v57 = vpop.eup %4008  ;;  %v2416_v8 = vsub.f32 2.0, %v2160_v35  ;;  %v2162_v56 = vmul.f32 %v4007_v62, %v5806_v37  ;;  %4026 = vrcp.f32 %v5866_v9  ;;  %v385_v47 = vmin.f32 %v5863_v25, 20.0 }
 0x139   :  { %v2417_v15 = vsub.f32 2.0, %v2161_v45  ;;  %v2163_v2 = vmul.f32 %v4009_v57, %v5814_v13  ;;  %4028 = vpow2.f32 %v739_v22  ;;  %v745_v24 = vmul.f32 1.442695, %v384_v4 }
 0x13a   :  { %v4011_v10 = vpop.eup %4010  ;;  %v2672_v40 = vmul.f32 %v4003_v41, %v2416_v8  ;;  %v2418_v20 = vsub.f32 2.0, %v2162_v56  ;;  %4030 = vpow2.f32 %v741_v53  ;;  %v747_v5 = vmul.f32 1.442695, %v385_v47 }
 0x13b   :  { %v4013_v36 = vpop.eup %4012  ;;  %v2673_v49 = vmul.f32 %v4005_v27, %v2417_v15  ;;  %v2419_v17 = vsub.f32 2.0, %v2163_v2  ;;  %v1145_v6 = vadd.f32 2.0, %v4011_v10  ;;  %4032 = vpow2.f32 %v743_v23 }
 0x13c   :  { %v4015_v37 = vpop.eup %4014  ;;  %v3184_v19 = vmul.f32 %v5797_v14, %v2672_v40  ;;  %v2674_v59 = vmul.f32 %v4007_v62, %v2418_v20  ;;  %v2164_v7 = vmul.f32 %v4013_v36, %v5822_v42  ;;  %4034 = vpow2.f32 %v745_v24  ;;  %v5906_v20 = vld [vmem:[#allocation2 + $0x358] sm:$0xff] }
 0x13d   :  { %v4017_v13 = vpop.eup %4016  ;;  %v3185_v0 = vmul.f32 %v5803_v12, %v2673_v49  ;;  %v2675_v1 = vmul.f32 %v4009_v57, %v2419_v17  ;;  %v2165_v52 = vmul.f32 %v4015_v37, %v5829_v28  ;;  %v1401_v39 = vmul.f32 %v4011_v10, %v1145_v6 }
 0x13e   :  { %v4019_v54 = vpop.eup %4018  ;;  %3440 = vst [vmem:[#allocation5 + $0x2c8] sm:$0xff] %v3184_v19  ;;  %v3186_v61 = vmul.f32 %v5809_v46, %v2674_v59  ;;  %v2420_v34 = vsub.f32 2.0, %v2164_v7  ;;  %v2166_v11 = vmul.f32 %v4017_v13, %v5841_v60  ;;  %4036 = vpow2.f32 %v747_v5 }
 0x13f   :  { %v4021_v14 = vpop.eup %4020  ;;  %3441 = vst [vmem:[#allocation5 + $0x2d0] sm:$0xff] %v3185_v0  ;;  %v3187_v42 = vmul.f32 %v5817_v38, %v2675_v1  ;;  %v2421_v3 = vsub.f32 2.0, %v2165_v52  ;;  %v2167_v16 = vmul.f32 %v4019_v54, %v5846_v55  ;;  %v5885_v12 = vadd.f32 2.0, %v1401_v39 }
 0x140   :  { %v4023_v29 = vpop.eup %4022  ;;  %3442 = vst [vmem:[#allocation5 + $0x2d8] sm:$0xff] %v3186_v61  ;;  %v2676_v28 = vmul.f32 %v4013_v36, %v2420_v34  ;;  %v2422_v41 = vsub.f32 2.0, %v2166_v11  ;;  %v5888_v50 = vmul.f32 %v1401_v39, %v5782_v32  ;;  %v1146_v46 = vadd.f32 2.0, %v4021_v14  ;;  %v5925_v61 = vld [vmem:[#allocation2 + $0x368] sm:$0xff] }
 0x141   :  { %v4025_v22 = vpop.eup %4024  ;;  %3443 = vst [vmem:[#allocation5 + $0x2e0] sm:$0xff] %v3187_v42  ;;  %v2677_v60 = vmul.f32 %v4015_v37, %v2421_v3  ;;  %v2423_v53 = vsub.f32 2.0, %v2167_v16  ;;  %4038 = vrcp.f32 %v5885_v12  ;;  %v1147_v38 = vadd.f32 2.0, %v4023_v29  ;;  %v5939_v3 = vld [vmem:[#allocation2 + $0x378] sm:$0xff] }
 0x142   :  { %v4027_v27 = vpop.eup %4026  ;;  %v3188_v55 = vmul.f32 %v5825_v48, %v2676_v28  ;;  %v2678_v35 = vmul.f32 %v4017_v13, %v2422_v41  ;;  %v1402_v62 = vmul.f32 %v4021_v14, %v1146_v46  ;;  %v1148_v45 = vadd.f32 2.0, %v4025_v22 }
 0x143   :  { %v4029_v23 = vpop.eup %4028  ;;  %v3189_v4 = vmul.f32 %v5832_v44, %v2677_v60  ;;  %v2679_v57 = vmul.f32 %v4019_v54, %v2423_v53  ;;  %v2168_v32 = vmul.f32 %v4027_v27, %v5866_v9  ;;  %v1403_v8 = vmul.f32 %v4023_v29, %v1147_v38  ;;  %v5923_v54 = vld [vmem:[#allocation2 + $0x360] sm:$0xff] }
 0x144   :  { %v4031_v56 = vpop.eup %4030  ;;  %3444 = vst [vmem:[#allocation5 + $0x2e8] sm:$0xff] %v3188_v55  ;;  %v3190_v47 = vmul.f32 %v5844_v58, %v2678_v35  ;;  %v5895_v15 = vadd.f32 2.0, %v1402_v62  ;;  %v5898_v2 = vmul.f32 %v1402_v62, %v5811_v63  ;;  %v1404_v48 = vmul.f32 %v4025_v22, %v1148_v45  ;;  %v5954_v60 = vld [vmem:[#allocation2 + $0x380] sm:$0xff] }
 0x145   :  { %v4033_v24 = vpop.eup %4032  ;;  %3445 = vst [vmem:[#allocation5 + $0x2f0] sm:$0xff] %v3189_v4  ;;  %v3191_v10 = vmul.f32 %v5852_v33, %v2679_v57  ;;  %v2424_v40 = vsub.f32 2.0, %v2168_v32  ;;  %v5901_v44 = vadd.f32 2.0, %v1403_v8  ;;  %v5904_v9 = vmul.f32 %v1403_v8, %v5827_v31  ;;  %v5967_v8 = vld [vmem:[#allocation2 + $0x390] sm:$0xff] }
 0x146   :  { %v4035_v5 = vpop.eup %4034  ;;  %3446 = vst [vmem:[#allocation5 + $0x2f8] sm:$0xff] %v3190_v47  ;;  %4040 = vrcp.f32 %v5895_v15  ;;  %v5909_v58 = vadd.f32 2.0, %v1404_v48  ;;  %v5912_v63 = vmul.f32 %v1404_v48, %v5834_v21  ;;  %v1149_v36 = vadd.f32 2.0, %v4029_v23 }
 0x147   :  { %3447 = vst [vmem:[#allocation5 + $0x300] sm:$0xff] %v3191_v10  ;;  %v2680_v33 = vmul.f32 %v4027_v27, %v2424_v40  ;;  %4042 = vrcp.f32 %v5901_v44  ;;  %v1150_v49 = vadd.f32 2.0, %v4031_v56  ;;  %v1151_v17 = vadd.f32 2.0, %v4033_v24  ;;  %v5962_v27 = vld [vmem:[#allocation2 + $0x388] sm:$0xff] }
 0x148   :  { %v4037_v31 = vpop.eup %4036  ;;  %4044 = vrcp.f32 %v5909_v58  ;;  %v1405_v6 = vmul.f32 %v4029_v23, %v1149_v36  ;;  %v1152_v37 = vadd.f32 2.0, %v4035_v5  ;;  %v386_v19 = vmin.f32 %v5906_v20, 20.0 }
 0x149   :  { %v3192_v59 = vmul.f32 %v5869_v18, %v2680_v33  ;;  %v1406_v7 = vmul.f32 %v4031_v56, %v1150_v49  ;;  %v1407_v13 = vmul.f32 %v4033_v24, %v1151_v17  ;;  %v1153_v21 = vadd.f32 2.0, %v4037_v31  ;;  %v5972_v24 = vld [vmem:[#allocation2 + $0x398] sm:$0xff] }
 0x14a   :  { %v5918_v0 = vadd.f32 2.0, %v1405_v6  ;;  %v5921_v1 = vmul.f32 %v1405_v6, %v5836_v51  ;;  %v1408_v52 = vmul.f32 %v4035_v5, %v1152_v37  ;;  %v749_v39 = vmul.f32 1.442695, %v386_v19  ;;  %v5937_v51 = vld [vmem:[#allocation2 + $0x370] sm:$0xff]  ;;  %v5975_v5 = vld [vmem:[#allocation2 + $0x3a0] sm:$0xff] }
 0x14b   :  { %v4039_v34 = vpop.eup %4038  ;;  %3448 = vst [vmem:[#allocation5 + $0x308] sm:$0xff] %v3192_v59  ;;  %v5927_v11 = vadd.f32 2.0, %v1406_v7  ;;  %v5930_v18 = vmul.f32 %v1406_v7, %v5838_v26  ;;  %v5932_v14 = vadd.f32 2.0, %v1407_v13  ;;  %v5935_v42 = vmul.f32 %v1407_v13, %v5848_v30 }
 0x14c   :  { %v2169_v16 = vmul.f32 %v4039_v34, %v5885_v12  ;;  %4046 = vrcp.f32 %v5918_v0  ;;  %v5943_v29 = vadd.f32 2.0, %v1408_v52  ;;  %v5946_v28 = vmul.f32 %v1408_v52, %v5861_v43 }
 0x14d   :  { %4048 = vrcp.f32 %v5927_v11  ;;  %v1409_v26 = vmul.f32 %v4037_v31, %v1153_v21  ;;  %v387_v41 = vmin.f32 %v5923_v54, 20.0  ;;  %v388_v30 = vmin.f32 %v5925_v61, 20.0  ;;  %v5982_v21 = vld [vmem:[#allocation2 + $0x3a8] sm:$0xff] }
 0x14e   :  { %v2425_v46 = vsub.f32 2.0, %v2169_v16  ;;  %4050 = vrcp.f32 %v5932_v14  ;;  %v389_v22 = vmin.f32 %v5937_v51, 20.0  ;;  %v390_v12 = vmin.f32 %v5939_v3, 20.0 }
 0x14f   :  { %4052 = vrcp.f32 %v5943_v29  ;;  %v5957_v43 = vadd.f32 2.0, %v1409_v26  ;;  %v5960_v53 = vmul.f32 %v1409_v26, %v5863_v25  ;;  %v751_v38 = vmul.f32 1.442695, %v387_v41 }
 0x150   :  { %v4041_v55 = vpop.eup %4040  ;;  %v2681_v35 = vmul.f32 %v4039_v34, %v2425_v46  ;;  %4054 = vpow2.f32 %v749_v39  ;;  %v753_v62 = vmul.f32 1.442695, %v388_v30  ;;  %v755_v45 = vmul.f32 1.442695, %v389_v22 }
 0x151   :  { %v4043_v23 = vpop.eup %4042  ;;  %v2170_v4 = vmul.f32 %v4041_v55, %v5895_v15  ;;  %4056 = vrcp.f32 %v5957_v43  ;;  %v757_v57 = vmul.f32 1.442695, %v390_v12  ;;  %v391_v32 = vmin.f32 %v5954_v60, 20.0 }
 0x152   :  { %v4045_v25 = vpop.eup %4044  ;;  %v3193_v56 = vmul.f32 %v5888_v50, %v2681_v35  ;;  %v2171_v47 = vmul.f32 %v4043_v23, %v5901_v44  ;;  %4058 = vpow2.f32 %v751_v38  ;;  %v392_v48 = vmin.f32 %v5962_v27, 20.0 }
 0x153   :  { %v2426_v10 = vsub.f32 2.0, %v2170_v4  ;;  %v2172_v15 = vmul.f32 %v4045_v25, %v5909_v58  ;;  %4060 = vpow2.f32 %v753_v62  ;;  %v759_v40 = vmul.f32 1.442695, %v391_v32 }
 0x154   :  { %3449 = vst [vmem:[#allocation5 + $0x310] sm:$0xff] %v3193_v56  ;;  %v2427_v36 = vsub.f32 2.0, %v2171_v47  ;;  %4062 = vpow2.f32 %v755_v45  ;;  %v761_v33 = vmul.f32 1.442695, %v392_v48  ;;  %v393_v50 = vmin.f32 %v5967_v8, 20.0 }
 0x155   :  { %v2682_v49 = vmul.f32 %v4041_v55, %v2426_v10  ;;  %v2428_v44 = vsub.f32 2.0, %v2172_v15  ;;  %4064 = vpow2.f32 %v757_v57  ;;  %v394_v17 = vmin.f32 %v5972_v24, 20.0 }
 0x156   :  { %v4047_v31 = vpop.eup %4046  ;;  %v2683_v6 = vmul.f32 %v4043_v23, %v2427_v36  ;;  %4066 = vpow2.f32 %v759_v40  ;;  %v763_v37 = vmul.f32 1.442695, %v393_v50  ;;  %v395_v58 = vmin.f32 %v5975_v5, 20.0 }
 0x157   :  { %v4049_v19 = vpop.eup %4048  ;;  %v3194_v59 = vmul.f32 %v5898_v2, %v2682_v49  ;;  %v2684_v7 = vmul.f32 %v4045_v25, %v2428_v44  ;;  %v2173_v13 = vmul.f32 %v4047_v31, %v5918_v0  ;;  %4068 = vpow2.f32 %v761_v33 }
 0x158   :  { %v4051_v52 = vpop.eup %4050  ;;  %v3195_v39 = vmul.f32 %v5904_v9, %v2683_v6  ;;  %v2174_v34 = vmul.f32 %v4049_v19, %v5927_v11  ;;  %4070 = vpow2.f32 %v763_v37  ;;  %v765_v16 = vmul.f32 1.442695, %v394_v17 }
 0x159   :  { %v4053_v26 = vpop.eup %4052  ;;  %3450 = vst [vmem:[#allocation5 + $0x318] sm:$0xff] %v3194_v59  ;;  %v3196_v41 = vmul.f32 %v5912_v63, %v2684_v7  ;;  %v2429_v30 = vsub.f32 2.0, %v2173_v13  ;;  %v2175_v2 = vmul.f32 %v4051_v52, %v5932_v14  ;;  %v767_v46 = vmul.f32 1.442695, %v395_v58 }
 0x15a   :  { %v4055_v22 = vpop.eup %4054  ;;  %3451 = vst [vmem:[#allocation5 + $0x320] sm:$0xff] %v3195_v39  ;;  %v2430_v0 = vsub.f32 2.0, %v2174_v34  ;;  %v2176_v12 = vmul.f32 %v4053_v26, %v5943_v29  ;;  %4072 = vpow2.f32 %v765_v16  ;;  %v396_v9 = vmin.f32 %v5982_v21, 20.0 }
 0x15b   :  { %v4057_v38 = vpop.eup %4056  ;;  %3452 = vst [vmem:[#allocation5 + $0x328] sm:$0xff] %v3196_v41  ;;  %v2685_v11 = vmul.f32 %v4047_v31, %v2429_v30  ;;  %v2431_v55 = vsub.f32 2.0, %v2175_v2  ;;  %v1154_v35 = vadd.f32 2.0, %v4055_v22  ;;  %4074 = vpow2.f32 %v767_v46 }
 0x15c   :  { %v4059_v62 = vpop.eup %4058  ;;  %v2686_v63 = vmul.f32 %v4049_v19, %v2430_v0  ;;  %v2432_v45 = vsub.f32 2.0, %v2176_v12  ;;  %v2177_v14 = vmul.f32 %v4057_v38, %v5957_v43  ;;  %v5991_v23 = vmul.f32 1.442695, %v396_v9  ;;  %v6027_v0 = vld [vmem:[#allocation2 + $0x3b0] sm:$0xff]  ;;  %v6029_v12 = vld [vmem:[#allocation2 + $0x3b8] sm:$0xff] }
 0x15d   :  { %v4061_v4 = vpop.eup %4060  ;;  %v3197_v57 = vmul.f32 %v5921_v1, %v2685_v11  ;;  %v2687_v29 = vmul.f32 %v4051_v52, %v2431_v55  ;;  %v1410_v32 = vmul.f32 %v4055_v22, %v1154_v35  ;;  %v1155_v25 = vadd.f32 2.0, %v4059_v62 }
 0x15e   :  { %v4063_v56 = vpop.eup %4062  ;;  %v3198_v47 = vmul.f32 %v5930_v18, %v2686_v63  ;;  %v2688_v48 = vmul.f32 %v4053_v26, %v2432_v45  ;;  %v2433_v10 = vsub.f32 2.0, %v2177_v14  ;;  %v1156_v15 = vadd.f32 2.0, %v4061_v4 }
 0x15f   :  { %v4065_v40 = vpop.eup %4064  ;;  %3453 = vst [vmem:[#allocation5 + $0x330] sm:$0xff] %v3197_v57  ;;  %v3199_v36 = vmul.f32 %v5935_v42, %v2687_v29  ;;  %v5996_v33 = vadd.f32 2.0, %v1410_v32  ;;  %v5999_v43 = vmul.f32 %v1410_v32, %v5906_v20  ;;  %v1411_v50 = vmul.f32 %v4059_v62, %v1155_v25  ;;  %v6059_v57 = vld [vmem:[#allocation2 + $0x3c8] sm:$0xff]  ;;  %v6063_v29 = vld [vmem:[#allocation2 + $0x3d8] sm:$0xff] }
 0x160   :  { %v4067_v1 = vpop.eup %4066  ;;  %3454 = vst [vmem:[#allocation5 + $0x338] sm:$0xff] %v3198_v47  ;;  %v3200_v49 = vmul.f32 %v5946_v28, %v2688_v48  ;;  %v2689_v44 = vmul.f32 %v4057_v38, %v2433_v10  ;;  %v1412_v17 = vmul.f32 %v4061_v4, %v1156_v15  ;;  %v1157_v18 = vadd.f32 2.0, %v4063_v56  ;;  %v6039_v38 = vld [vmem:[#allocation2 + $0x3c0] sm:$0xff] }
 0x161   :  { %v4069_v31 = vpop.eup %4068  ;;  %3455 = vst [vmem:[#allocation5 + $0x340] sm:$0xff] %v3199_v36  ;;  %4076 = vrcp.f32 %v5996_v33  ;;  %v6003_v6 = vadd.f32 2.0, %v1411_v50  ;;  %v6006_v42 = vmul.f32 %v1411_v50, %v5923_v54  ;;  %v1158_v37 = vadd.f32 2.0, %v4065_v40  ;;  %v6071_v48 = vld [vmem:[#allocation2 + $0x3e0] sm:$0xff] }
 0x162   :  { %v4071_v20 = vpop.eup %4070  ;;  %3456 = vst [vmem:[#allocation5 + $0x348] sm:$0xff] %v3200_v49  ;;  %v3201_v58 = vmul.f32 %v5960_v53, %v2689_v44  ;;  %v6009_v19 = vadd.f32 2.0, %v1412_v17  ;;  %v6012_v28 = vmul.f32 %v1412_v17, %v5925_v61  ;;  %v1413_v59 = vmul.f32 %v4063_v56, %v1157_v18 }
 0x163   :  { %4078 = vrcp.f32 %v6003_v6  ;;  %v1414_v7 = vmul.f32 %v4065_v40, %v1158_v37  ;;  %v1159_v13 = vadd.f32 2.0, %v4067_v1  ;;  %v1160_v52 = vadd.f32 2.0, %v4069_v31 }
 0x164   :  { %v4073_v39 = vpop.eup %4072  ;;  %3457 = vst [vmem:[#allocation5 + $0x350] sm:$0xff] %v3201_v58  ;;  %4080 = vrcp.f32 %v6009_v19  ;;  %v6016_v54 = vadd.f32 2.0, %v1413_v59  ;;  %v6019_v34 = vmul.f32 %v1413_v59, %v5937_v51  ;;  %v1161_v53 = vadd.f32 2.0, %v4071_v20 }
 0x165   :  { %v4075_v16 = vpop.eup %4074  ;;  %v6021_v26 = vadd.f32 2.0, %v1414_v7  ;;  %v6024_v61 = vmul.f32 %v1414_v7, %v5939_v3  ;;  %v1415_v41 = vmul.f32 %v4067_v1, %v1159_v13  ;;  %v1416_v30 = vmul.f32 %v4069_v31, %v1160_v52  ;;  %v6083_v7 = vld [vmem:[#allocation2 + $0x3e8] sm:$0xff] }
 0x166   :  { %4082 = vrcp.f32 %v6016_v54  ;;  %v1417_v2 = vmul.f32 %v4071_v20, %v1161_v53  ;;  %v1162_v46 = vadd.f32 2.0, %v4073_v39  ;;  %v1163_v22 = vadd.f32 2.0, %v4075_v16 }
 0x167   :  { %4084 = vrcp.f32 %v6021_v26  ;;  %v6032_v51 = vadd.f32 2.0, %v1415_v41  ;;  %v6035_v9 = vmul.f32 %v1415_v41, %v5954_v60  ;;  %v6037_v3 = vadd.f32 2.0, %v1416_v30 }
 0x168   :  { %v6042_v11 = vmul.f32 %v1416_v30, %v5962_v27  ;;  %v6044_v55 = vadd.f32 2.0, %v1417_v2  ;;  %v6047_v35 = vmul.f32 %v1417_v2, %v5967_v8  ;;  %v1418_v62 = vmul.f32 %v4073_v39, %v1162_v46  ;;  %v6061_v8 = vld [vmem:[#allocation2 + $0x3d0] sm:$0xff] }
 0x169   :  { %4086 = vrcp.f32 %v6032_v51  ;;  %v1419_v63 = vmul.f32 %v4075_v16, %v1163_v22  ;;  %v397_v45 = vmin.f32 %v6027_v0, 20.0  ;;  %v398_v60 = vmin.f32 %v6029_v12, 20.0 }
 0x16a   :  { %4088 = vrcp.f32 %v6037_v3  ;;  %v6053_v14 = vadd.f32 2.0, %v1418_v62  ;;  %v6056_v27 = vmul.f32 %v1418_v62, %v5972_v24  ;;  %v399_v4 = vmin.f32 %v6039_v38, 20.0 }
 0x16b   :  { %v4077_v32 = vpop.eup %4076  ;;  %4090 = vrcp.f32 %v6044_v55  ;;  %v6066_v25 = vadd.f32 2.0, %v1419_v63  ;;  %v6069_v56 = vmul.f32 %v1419_v63, %v5975_v5  ;;  %v771_v47 = vmul.f32 1.442695, %v397_v45  ;;  %v6091_v63 = vld [vmem:[#allocation2 + $0x3f0] sm:$0xff] }
 0x16c   :  { %v2178_v24 = vmul.f32 %v4077_v32, %v5996_v33  ;;  %4092 = vrcp.f32 %v6053_v14  ;;  %v773_v10 = vmul.f32 1.442695, %v398_v60  ;;  %v775_v15 = vmul.f32 1.442695, %v399_v4 }
 0x16d   :  { %v4079_v40 = vpop.eup %4078  ;;  %4094 = vrcp.f32 %v6066_v25  ;;  %v400_v36 = vmin.f32 %v6059_v57, 20.0  ;;  %v401_v50 = vmin.f32 %v6061_v8, 20.0  ;;  %v402_v1 = vmin.f32 %v6063_v29, 20.0 }
 0x16e   :  { %v4081_v5 = vpop.eup %4080  ;;  %v2434_v49 = vsub.f32 2.0, %v2178_v24  ;;  %v2179_v44 = vmul.f32 %v4079_v40, %v6003_v6  ;;  %4096 = vpow2.f32 %v5991_v23  ;;  %v403_v33 = vmin.f32 %v6071_v48, 20.0 }
 0x16f   :  { %v2180_v17 = vmul.f32 %v4081_v5, %v6009_v19  ;;  %4098 = vpow2.f32 %v771_v47  ;;  %v777_v18 = vmul.f32 1.442695, %v400_v36  ;;  %v779_v31 = vmul.f32 1.442695, %v401_v50 }
 0x170   :  { %v4083_v37 = vpop.eup %4082  ;;  %v2690_v20 = vmul.f32 %v4077_v32, %v2434_v49  ;;  %v2435_v58 = vsub.f32 2.0, %v2179_v44  ;;  %4100 = vpow2.f32 %v773_v10  ;;  %v781_v59 = vmul.f32 1.442695, %v402_v1 }
 0x171   :  { %v4085_v13 = vpop.eup %4084  ;;  %v2436_v52 = vsub.f32 2.0, %v2180_v17  ;;  %v2181_v6 = vmul.f32 %v4083_v37, %v6016_v54  ;;  %4102 = vpow2.f32 %v775_v15  ;;  %v783_v23 = vmul.f32 1.442695, %v403_v33 }
 0x172   :  { %v3202_v39 = vmul.f32 %v5999_v43, %v2690_v20  ;;  %v2691_v53 = vmul.f32 %v4079_v40, %v2435_v58  ;;  %v2182_v19 = vmul.f32 %v4085_v13, %v6021_v26  ;;  %4104 = vpow2.f32 %v777_v18 }
 0x173   :  { %v4087_v16 = vpop.eup %4086  ;;  %v2692_v41 = vmul.f32 %v4081_v5, %v2436_v52  ;;  %v2437_v30 = vsub.f32 2.0, %v2181_v6  ;;  %4106 = vpow2.f32 %v779_v31  ;;  %v404_v2 = vmin.f32 %v6083_v7, 20.0 }
 0x174   :  { %v4089_v46 = vpop.eup %4088  ;;  %3458 = vst [vmem:[#allocation5 + $0x358] sm:$0xff] %v3202_v39  ;;  %v3203_v22 = vmul.f32 %v6006_v42, %v2691_v53  ;;  %v2438_v62 = vsub.f32 2.0, %v2182_v19  ;;  %v2183_v54 = vmul.f32 %v4087_v16, %v6032_v51  ;;  %4108 = vpow2.f32 %v781_v59 }
 0x175   :  { %v4091_v43 = vpop.eup %4090  ;;  %v3204_v26 = vmul.f32 %v6012_v28, %v2692_v41  ;;  %v2693_v45 = vmul.f32 %v4083_v37, %v2437_v30  ;;  %v2184_v60 = vmul.f32 %v4089_v46, %v6037_v3  ;;  %4110 = vpow2.f32 %v783_v23 }
 0x176   :  { %v4093_v4 = vpop.eup %4092  ;;  %3459 = vst [vmem:[#allocation5 + $0x360] sm:$0xff] %v3203_v22  ;;  %v2694_v32 = vmul.f32 %v4085_v13, %v2438_v62  ;;  %v2439_v47 = vsub.f32 2.0, %v2183_v54  ;;  %v2185_v24 = vmul.f32 %v4091_v43, %v6044_v55  ;;  %v785_v42 = vmul.f32 1.442695, %v404_v2  ;;  %v6122_v62 = vld [vmem:[#allocation2 + $0x3f8] sm:$0xff] }
 0x177   :  { %v4095_v10 = vpop.eup %4094  ;;  %3460 = vst [vmem:[#allocation5 + $0x368] sm:$0xff] %v3204_v26  ;;  %v3205_v51 = vmul.f32 %v6019_v34, %v2693_v45  ;;  %v2440_v15 = vsub.f32 2.0, %v2184_v60  ;;  %v2186_v40 = vmul.f32 %v4093_v4, %v6053_v14  ;;  %v405_v28 = vmin.f32 %v6091_v63, 20.0 }
 0x178   :  { %v4097_v36 = vpop.eup %4096  ;;  %v3206_v3 = vmul.f32 %v6024_v61, %v2694_v32  ;;  %v2695_v50 = vmul.f32 %v4087_v16, %v2439_v47  ;;  %v2441_v1 = vsub.f32 2.0, %v2185_v24  ;;  %v2187_v5 = vmul.f32 %v4095_v10, %v6066_v25 }
 0x179   :  { %v4099_v49 = vpop.eup %4098  ;;  %3461 = vst [vmem:[#allocation5 + $0x370] sm:$0xff] %v3205_v51  ;;  %v2696_v55 = vmul.f32 %v4089_v46, %v2440_v15  ;;  %v2442_v44 = vsub.f32 2.0, %v2186_v40  ;;  %v1164_v33 = vadd.f32 2.0, %v4097_v36  ;;  %4112 = vpow2.f32 %v785_v42  ;;  %v6143_v40 = vld [vmem:[#allocation2 + $0x400] sm:$0xff] }
 0x17a   :  { %v4101_v17 = vpop.eup %4100  ;;  %3462 = vst [vmem:[#allocation5 + $0x378] sm:$0xff] %v3206_v3  ;;  %v3207_v34 = vmul.f32 %v6035_v9, %v2695_v50  ;;  %v2697_v14 = vmul.f32 %v4091_v43, %v2441_v1  ;;  %v2443_v18 = vsub.f32 2.0, %v2187_v5  ;;  %v1165_v31 = vadd.f32 2.0, %v4099_v49  ;;  %v6157_v1 = vld [vmem:[#allocation2 + $0x418] sm:$0xff] }
 0x17b   :  { %v4103_v37 = vpop.eup %4102  ;;  %v3208_v61 = vmul.f32 %v6042_v11, %v2696_v55  ;;  %v2698_v20 = vmul.f32 %v4093_v4, %v2442_v44  ;;  %v1420_v58 = vmul.f32 %v4097_v36, %v1164_v33  ;;  %v1166_v59 = vadd.f32 2.0, %v4101_v17  ;;  %v6147_v36 = vld [vmem:[#allocation2 + $0x410] sm:$0xff]  ;;  %v6167_v33 = vld [vmem:[#allocation2 + $0x420] sm:$0xff] }
 0x17c   :  { %v4105_v25 = vpop.eup %4104  ;;  %3463 = vst [vmem:[#allocation5 + $0x380] sm:$0xff] %v3207_v34  ;;  %v3209_v13 = vmul.f32 %v6047_v35, %v2697_v14  ;;  %v2699_v52 = vmul.f32 %v4095_v10, %v2443_v18  ;;  %v1421_v6 = vmul.f32 %v4099_v49, %v1165_v31  ;;  %v1167_v23 = vadd.f32 2.0, %v4103_v37  ;;  %v6176_v14 = vld [vmem:[#allocation2 + $0x428] sm:$0xff]  ;;  %v6178_v18 = vld [vmem:[#allocation2 + $0x430] sm:$0xff] }
 0x17d   :  { %v4107_v39 = vpop.eup %4106  ;;  %3464 = vst [vmem:[#allocation5 + $0x388] sm:$0xff] %v3208_v61  ;;  %v3210_v9 = vmul.f32 %v6056_v27, %v2698_v20  ;;  %v6105_v53 = vadd.f32 2.0, %v1420_v58  ;;  %v6108_v19 = vmul.f32 %v1420_v58, %v5982_v21  ;;  %v1422_v11 = vmul.f32 %v4101_v17, %v1166_v59 }
 0x17e   :  { %v4109_v16 = vpop.eup %4108  ;;  %3465 = vst [vmem:[#allocation5 + $0x390] sm:$0xff] %v3209_v13  ;;  %v3211_v41 = vmul.f32 %v6069_v56, %v2699_v52  ;;  %v6111_v30 = vadd.f32 2.0, %v1421_v6  ;;  %v6114_v35 = vmul.f32 %v1421_v6, %v6027_v0  ;;  %v1423_v2 = vmul.f32 %v4103_v37, %v1167_v23 }
 0x17f   :  { %v4111_v46 = vpop.eup %4110  ;;  %3466 = vst [vmem:[#allocation5 + $0x398] sm:$0xff] %v3210_v9  ;;  %4114 = vrcp.f32 %v6105_v53  ;;  %v6117_v27 = vadd.f32 2.0, %v1422_v11  ;;  %v6120_v21 = vmul.f32 %v1422_v11, %v6029_v12  ;;  %v1168_v22 = vadd.f32 2.0, %v4105_v25 }
 0x180   :  { %3467 = vst [vmem:[#allocation5 + $0x3a0] sm:$0xff] %v3211_v41  ;;  %4116 = vrcp.f32 %v6111_v30  ;;  %v6125_v56 = vadd.f32 2.0, %v1423_v2  ;;  %v6128_v0 = vmul.f32 %v1423_v2, %v6039_v38  ;;  %v1169_v54 = vadd.f32 2.0, %v4107_v39 }
 0x181   :  { %4118 = vrcp.f32 %v6117_v27  ;;  %v1424_v43 = vmul.f32 %v4105_v25, %v1168_v22  ;;  %v1170_v26 = vadd.f32 2.0, %v4109_v16  ;;  %v1171_v45 = vadd.f32 2.0, %v4111_v46 }
 0x182   :  { %4120 = vrcp.f32 %v6125_v56  ;;  %v1425_v12 = vmul.f32 %v4107_v39, %v1169_v54  ;;  %v787_v60 = vmul.f32 1.442695, %v405_v28  ;;  %v406_v4 = vmin.f32 %v6122_v62, 20.0  ;;  %v6145_v28 = vld [vmem:[#allocation2 + $0x408] sm:$0xff] }
 0x183   :  { %v4113_v32 = vpop.eup %4112  ;;  %v6133_v47 = vadd.f32 2.0, %v1424_v43  ;;  %v6136_v24 = vmul.f32 %v1424_v43, %v6059_v57  ;;  %v1426_v38 = vmul.f32 %v4109_v16, %v1170_v26  ;;  %v1427_v42 = vmul.f32 %v4111_v46, %v1171_v45 }
 0x184   :  { %v6138_v10 = vadd.f32 2.0, %v1425_v12  ;;  %v6141_v51 = vmul.f32 %v1425_v12, %v6061_v8  ;;  %v1172_v15 = vadd.f32 2.0, %v4113_v32  ;;  %4122 = vpow2.f32 %v787_v60 }
 0x185   :  { %4124 = vrcp.f32 %v6133_v47  ;;  %v6150_v3 = vadd.f32 2.0, %v1426_v38  ;;  %v6153_v57 = vmul.f32 %v1426_v38, %v6063_v29  ;;  %v6155_v50 = vadd.f32 2.0, %v1427_v42 }
 0x186   :  { %4126 = vrcp.f32 %v6138_v10  ;;  %v6161_v8 = vmul.f32 %v1427_v42, %v6071_v48  ;;  %v1428_v5 = vmul.f32 %v4113_v32, %v1172_v15  ;;  %v789_v49 = vmul.f32 1.442695, %v406_v4 }
 0x187   :  { %4128 = vrcp.f32 %v6150_v3  ;;  %v407_v55 = vmin.f32 %v6143_v40, 20.0  ;;  %v408_v44 = vmin.f32 %v6145_v28, 20.0  ;;  %v409_v29 = vmin.f32 %v6147_v36, 20.0 }
 0x188   :  { %4130 = vrcp.f32 %v6155_v50  ;;  %v6170_v17 = vadd.f32 2.0, %v1428_v5  ;;  %v6173_v34 = vmul.f32 %v1428_v5, %v6083_v7  ;;  %v410_v48 = vmin.f32 %v6157_v1, 20.0 }
 0x189   :  { %v4115_v31 = vpop.eup %4114  ;;  %4132 = vpow2.f32 %v789_v49  ;;  %v791_v37 = vmul.f32 1.442695, %v407_v55  ;;  %v793_v61 = vmul.f32 1.442695, %v408_v44  ;;  %v795_v20 = vmul.f32 1.442695, %v409_v29 }
 0x18a   :  { %v4117_v58 = vpop.eup %4116  ;;  %v2188_v59 = vmul.f32 %v4115_v31, %v6105_v53  ;;  %4134 = vrcp.f32 %v6170_v17  ;;  %v797_v25 = vmul.f32 1.442695, %v410_v48  ;;  %v411_v7 = vmin.f32 %v6167_v33, 20.0 }
 0x18b   :  { %v4119_v13 = vpop.eup %4118  ;;  %v2189_v52 = vmul.f32 %v4117_v58, %v6111_v30  ;;  %4136 = vpow2.f32 %v791_v37  ;;  %v412_v6 = vmin.f32 %v6176_v14, 20.0  ;;  %v413_v23 = vmin.f32 %v6178_v18, 20.0 }
 0x18c   :  { %v4121_v39 = vpop.eup %4120  ;;  %v2444_v9 = vsub.f32 2.0, %v2188_v59  ;;  %v2190_v11 = vmul.f32 %v4119_v13, %v6117_v27  ;;  %4138 = vpow2.f32 %v793_v61  ;;  %v799_v16 = vmul.f32 1.442695, %v411_v7 }
 0x18d   :  { %v2445_v53 = vsub.f32 2.0, %v2189_v52  ;;  %v2191_v41 = vmul.f32 %v4121_v39, %v6125_v56  ;;  %4140 = vpow2.f32 %v795_v20  ;;  %v801_v2 = vmul.f32 1.442695, %v412_v6 }
 0x18e   :  { %v4123_v46 = vpop.eup %4122  ;;  %v2700_v22 = vmul.f32 %v4115_v31, %v2444_v9  ;;  %v2446_v54 = vsub.f32 2.0, %v2190_v11  ;;  %4142 = vpow2.f32 %v797_v25  ;;  %v803_v30 = vmul.f32 1.442695, %v413_v23 }
 0x18f   :  { %v4125_v43 = vpop.eup %4124  ;;  %v2701_v26 = vmul.f32 %v4117_v58, %v2445_v53  ;;  %v2447_v45 = vsub.f32 2.0, %v2191_v41  ;;  %v1173_v12 = vadd.f32 2.0, %v4123_v46  ;;  %4144 = vpow2.f32 %v799_v16 }
 0x190   :  { %v4127_v60 = vpop.eup %4126  ;;  %v3212_v27 = vmul.f32 %v6108_v19, %v2700_v22  ;;  %v2702_v4 = vmul.f32 %v4119_v13, %v2446_v54  ;;  %v2192_v32 = vmul.f32 %v4125_v43, %v6133_v47  ;;  %4146 = vpow2.f32 %v801_v2 }
 0x191   :  { %v4129_v56 = vpop.eup %4128  ;;  %v3213_v38 = vmul.f32 %v6114_v35, %v2701_v26  ;;  %v2703_v42 = vmul.f32 %v4121_v39, %v2447_v45  ;;  %v2193_v15 = vmul.f32 %v4127_v60, %v6138_v10  ;;  %v1429_v5 = vmul.f32 %v4123_v46, %v1173_v12 }
 0x192   :  { %v4131_v49 = vpop.eup %4130  ;;  %3468 = vst [vmem:[#allocation5 + $0x3a8] sm:$0xff] %v3212_v27  ;;  %v3214_v55 = vmul.f32 %v6120_v21, %v2702_v4  ;;  %v2448_v44 = vsub.f32 2.0, %v2192_v32  ;;  %v2194_v29 = vmul.f32 %v4129_v56, %v6150_v3  ;;  %4148 = vpow2.f32 %v803_v30  ;;  %v6225_v32 = vld [vmem:[#allocation2 + $0x438] sm:$0xff] }
 0x193   :  { %v4133_v19 = vpop.eup %4132  ;;  %3469 = vst [vmem:[#allocation5 + $0x3b0] sm:$0xff] %v3213_v38  ;;  %v3215_v47 = vmul.f32 %v6128_v0, %v2703_v42  ;;  %v2449_v48 = vsub.f32 2.0, %v2193_v15  ;;  %v2195_v31 = vmul.f32 %v4131_v49, %v6155_v50  ;;  %v6196_v35 = vadd.f32 2.0, %v1429_v5 }
 0x194   :  { %v4135_v37 = vpop.eup %4134  ;;  %3470 = vst [vmem:[#allocation5 + $0x3b8] sm:$0xff] %v3214_v55  ;;  %v2704_v10 = vmul.f32 %v4125_v43, %v2448_v44  ;;  %v2450_v61 = vsub.f32 2.0, %v2194_v29  ;;  %v6199_v20 = vmul.f32 %v1429_v5, %v6091_v63  ;;  %v1174_v21 = vadd.f32 2.0, %v4133_v19 }
 0x195   :  { %v4137_v58 = vpop.eup %4136  ;;  %3471 = vst [vmem:[#allocation5 + $0x3c0] sm:$0xff] %v3215_v47  ;;  %v2705_v3 = vmul.f32 %v4127_v60, %v2449_v48  ;;  %v2451_v59 = vsub.f32 2.0, %v2195_v31  ;;  %v2196_v25 = vmul.f32 %v4135_v37, %v6170_v17  ;;  %4150 = vrcp.f32 %v6196_v35  ;;  %v6252_v48 = vld [vmem:[#allocation2 + $0x450] sm:$0xff]  ;;  %v6254_v31 = vld [vmem:[#allocation2 + $0x458] sm:$0xff] }
 0x196   :  { %v4139_v0 = vpop.eup %4138  ;;  %v3216_v50 = vmul.f32 %v6136_v24, %v2704_v10  ;;  %v2706_v7 = vmul.f32 %v4129_v56, %v2450_v61  ;;  %v1430_v13 = vmul.f32 %v4133_v19, %v1174_v21  ;;  %v1175_v52 = vadd.f32 2.0, %v4137_v58  ;;  %v6266_v21 = vld [vmem:[#allocation2 + $0x460] sm:$0xff] }
 0x197   :  { %v4141_v6 = vpop.eup %4140  ;;  %v3217_v23 = vmul.f32 %v6141_v51, %v2705_v3  ;;  %v2707_v63 = vmul.f32 %v4131_v49, %v2451_v59  ;;  %v2452_v39 = vsub.f32 2.0, %v2196_v25  ;;  %v1176_v9 = vadd.f32 2.0, %v4139_v0 }
 0x198   :  { %v4143_v11 = vpop.eup %4142  ;;  %3472 = vst [vmem:[#allocation5 + $0x3c8] sm:$0xff] %v3216_v50  ;;  %v3218_v16 = vmul.f32 %v6153_v57, %v2706_v7  ;;  %v6206_v53 = vadd.f32 2.0, %v1430_v13  ;;  %v6209_v17 = vmul.f32 %v1430_v13, %v6122_v62  ;;  %v1431_v41 = vmul.f32 %v4137_v58, %v1175_v52 }
 0x199   :  { %v4145_v24 = vpop.eup %4144  ;;  %3473 = vst [vmem:[#allocation5 + $0x3d0] sm:$0xff] %v3217_v23  ;;  %v3219_v2 = vmul.f32 %v6161_v8, %v2707_v63  ;;  %v2708_v46 = vmul.f32 %v4135_v37, %v2452_v39  ;;  %v1432_v22 = vmul.f32 %v4139_v0, %v1176_v9  ;;  %v1177_v51 = vadd.f32 2.0, %v4141_v6  ;;  %v6279_v63 = vld [vmem:[#allocation2 + $0x470] sm:$0xff]  ;;  %v6281_v39 = vld [vmem:[#allocation2 + $0x478] sm:$0xff] }
 0x19a   :  { %v4147_v54 = vpop.eup %4146  ;;  %3474 = vst [vmem:[#allocation5 + $0x3d8] sm:$0xff] %v3218_v16  ;;  %4152 = vrcp.f32 %v6206_v53  ;;  %v6213_v30 = vadd.f32 2.0, %v1431_v41  ;;  %v6216_v57 = vmul.f32 %v1431_v41, %v6143_v40  ;;  %v1178_v43 = vadd.f32 2.0, %v4143_v11  ;;  %v6227_v40 = vld [vmem:[#allocation2 + $0x440] sm:$0xff] }
 0x19b   :  { %3475 = vst [vmem:[#allocation5 + $0x3e0] sm:$0xff] %v3219_v2  ;;  %v3220_v62 = vmul.f32 %v6173_v34, %v2708_v46  ;;  %v6219_v26 = vadd.f32 2.0, %v1432_v22  ;;  %v6222_v8 = vmul.f32 %v1432_v22, %v6145_v28  ;;  %v1433_v45 = vmul.f32 %v4141_v6, %v1177_v51 }
 0x19c   :  { %v4149_v12 = vpop.eup %4148  ;;  %4154 = vrcp.f32 %v6213_v30  ;;  %v1434_v60 = vmul.f32 %v4143_v11, %v1178_v43  ;;  %v1179_v27 = vadd.f32 2.0, %v4145_v24  ;;  %v1180_v4 = vadd.f32 2.0, %v4147_v54 }
 0x19d   :  { %3476 = vst [vmem:[#allocation5 + $0x3e8] sm:$0xff] %v3220_v62  ;;  %4156 = vrcp.f32 %v6219_v26  ;;  %v6230_v34 = vadd.f32 2.0, %v1433_v45  ;;  %v6233_v56 = vmul.f32 %v1433_v45, %v6147_v36  ;;  %v1181_v28 = vadd.f32 2.0, %v4149_v12 }
 0x19e   :  { %v6235_v38 = vadd.f32 2.0, %v1434_v60  ;;  %v6238_v42 = vmul.f32 %v1434_v60, %v6157_v1  ;;  %v1435_v15 = vmul.f32 %v4145_v24, %v1179_v27  ;;  %v1436_v5 = vmul.f32 %v4147_v54, %v1180_v4  ;;  %v6250_v1 = vld [vmem:[#allocation2 + $0x448] sm:$0xff]  ;;  %v6284_v24 = vld [vmem:[#allocation2 + $0x480] sm:$0xff] }
 0x19f   :  { %v4151_v49 = vpop.eup %4150  ;;  %4158 = vrcp.f32 %v6230_v34  ;;  %v1437_v55 = vmul.f32 %v4149_v12, %v1181_v28  ;;  %v414_v44 = vmin.f32 %v6225_v32, 20.0  ;;  %v415_v29 = vmin.f32 %v6227_v40, 20.0 }
 0x1a0   :  { %v2197_v19 = vmul.f32 %v4151_v49, %v6196_v35  ;;  %4160 = vrcp.f32 %v6235_v38  ;;  %v6245_v36 = vadd.f32 2.0, %v1435_v15  ;;  %v6248_v47 = vmul.f32 %v1435_v15, %v6167_v33  ;;  %v6268_v33 = vld [vmem:[#allocation2 + $0x468] sm:$0xff] }
 0x1a1   :  { %v6256_v37 = vadd.f32 2.0, %v1436_v5  ;;  %v6259_v10 = vmul.f32 %v1436_v5, %v6176_v14  ;;  %v6261_v61 = vadd.f32 2.0, %v1437_v55  ;;  %v6264_v35 = vmul.f32 %v1437_v55, %v6178_v18 }
 0x1a2   :  { %v2453_v58 = vsub.f32 2.0, %v2197_v19  ;;  %4162 = vrcp.f32 %v6245_v36  ;;  %v805_v3 = vmul.f32 1.442695, %v414_v44  ;;  %v807_v59 = vmul.f32 1.442695, %v415_v29 }
 0x1a3   :  { %4164 = vrcp.f32 %v6256_v37  ;;  %v416_v25 = vmin.f32 %v6250_v1, 20.0  ;;  %v417_v14 = vmin.f32 %v6252_v48, 20.0  ;;  %v418_v0 = vmin.f32 %v6254_v31, 20.0 }
 0x1a4   :  { %v4153_v50 = vpop.eup %4152  ;;  %v2709_v18 = vmul.f32 %v4151_v49, %v2453_v58  ;;  %4166 = vrcp.f32 %v6261_v61  ;;  %v419_v7 = vmin.f32 %v6266_v21, 20.0  ;;  %v420_v13 = vmin.f32 %v6268_v33, 20.0 }
 0x1a5   :  { %v2198_v52 = vmul.f32 %v4153_v50, %v6206_v53  ;;  %4168 = vpow2.f32 %v805_v3  ;;  %v809_v6 = vmul.f32 1.442695, %v416_v25  ;;  %v811_v23 = vmul.f32 1.442695, %v417_v14 }
 0x1a6   :  { %v4155_v9 = vpop.eup %4154  ;;  %v3221_v11 = vmul.f32 %v6199_v20, %v2709_v18  ;;  %4170 = vpow2.f32 %v807_v59  ;;  %v813_v16 = vmul.f32 1.442695, %v418_v0  ;;  %v815_v41 = vmul.f32 1.442695, %v419_v7  ;;  %v6296_v59 = vld [vmem:[#allocation2 + $0x488] sm:$0xff] }
 0x1a7   :  { %v4157_v2 = vpop.eup %4156  ;;  %v2454_v46 = vsub.f32 2.0, %v2198_v52  ;;  %v2199_v22 = vmul.f32 %v4155_v9, %v6213_v30  ;;  %4172 = vpow2.f32 %v809_v6  ;;  %v817_v53 = vmul.f32 1.442695, %v420_v13 }
 0x1a8   :  { %3477 = vst [vmem:[#allocation5 + $0x3f0] sm:$0xff] %v3221_v11  ;;  %v2200_v51 = vmul.f32 %v4157_v2, %v6219_v26  ;;  %4174 = vpow2.f32 %v811_v23  ;;  %v421_v54 = vmin.f32 %v6279_v63, 20.0  ;;  %v422_v43 = vmin.f32 %v6281_v39, 20.0 }
 0x1a9   :  { %v4159_v20 = vpop.eup %4158  ;;  %v2710_v62 = vmul.f32 %v4153_v50, %v2454_v46  ;;  %v2455_v45 = vsub.f32 2.0, %v2199_v22  ;;  %4176 = vpow2.f32 %v813_v16  ;;  %v423_v12 = vmin.f32 %v6284_v24, 20.0 }
 0x1aa   :  { %v4161_v60 = vpop.eup %4160  ;;  %v2456_v27 = vsub.f32 2.0, %v2200_v51  ;;  %v2201_v30 = vmul.f32 %v4159_v20, %v6230_v34  ;;  %4178 = vpow2.f32 %v815_v41  ;;  %v819_v4 = vmul.f32 1.442695, %v421_v54 }
 0x1ab   :  { %v3222_v28 = vmul.f32 %v6209_v17, %v2710_v62  ;;  %v2711_v26 = vmul.f32 %v4155_v9, %v2455_v45  ;;  %v2202_v15 = vmul.f32 %v4161_v60, %v6235_v38  ;;  %4180 = vpow2.f32 %v817_v53 }
 0x1ac   :  { %v4163_v5 = vpop.eup %4162  ;;  %v2712_v49 = vmul.f32 %v4157_v2, %v2456_v27  ;;  %v2457_v55 = vsub.f32 2.0, %v2201_v30  ;;  %4182 = vpow2.f32 %v819_v4  ;;  %v821_v44 = vmul.f32 1.442695, %v422_v43 }
 0x1ad   :  { %v4165_v29 = vpop.eup %4164  ;;  %3478 = vst [vmem:[#allocation5 + $0x3f8] sm:$0xff] %v3222_v28  ;;  %v3223_v19 = vmul.f32 %v6216_v57, %v2711_v26  ;;  %v2458_v58 = vsub.f32 2.0, %v2202_v15  ;;  %v2203_v34 = vmul.f32 %v4163_v5, %v6245_v36  ;;  %v823_v3 = vmul.f32 1.442695, %v423_v12  ;;  %v6325_v26 = vld [vmem:[#allocation2 + $0x490] sm:$0xff] }
 0x1ae   :  { %v4167_v17 = vpop.eup %4166  ;;  %v3224_v25 = vmul.f32 %v6222_v8, %v2712_v49  ;;  %v2713_v38 = vmul.f32 %v4159_v20, %v2457_v55  ;;  %v2204_v14 = vmul.f32 %v4165_v29, %v6256_v37  ;;  %4184 = vpow2.f32 %v821_v44 }
 0x1af   :  { %v4169_v0 = vpop.eup %4168  ;;  %3479 = vst [vmem:[#allocation5 + $0x400] sm:$0xff] %v3223_v19  ;;  %v2714_v50 = vmul.f32 %v4161_v60, %v2458_v58  ;;  %v2459_v18 = vsub.f32 2.0, %v2203_v34  ;;  %v2205_v7 = vmul.f32 %v4167_v17, %v6261_v61  ;;  %4186 = vpow2.f32 %v823_v3 }
 0x1b0   :  { %v4171_v57 = vpop.eup %4170  ;;  %3480 = vst [vmem:[#allocation5 + $0x408] sm:$0xff] %v3224_v25  ;;  %v3225_v36 = vmul.f32 %v6233_v56, %v2713_v38  ;;  %v2460_v13 = vsub.f32 2.0, %v2204_v14  ;;  %v1182_v52 = vadd.f32 2.0, %v4169_v0  ;;  %v424_v6 = vmin.f32 %v6296_v59, 20.0 }
 0x1b1   :  { %v4173_v8 = vpop.eup %4172  ;;  %v3226_v23 = vmul.f32 %v6238_v42, %v2714_v50  ;;  %v2715_v37 = vmul.f32 %v4163_v5, %v2459_v18  ;;  %v2461_v9 = vsub.f32 2.0, %v2205_v7  ;;  %v1183_v11 = vadd.f32 2.0, %v4171_v57  ;;  %v6346_v50 = vld [vmem:[#allocation2 + $0x498] sm:$0xff] }
 0x1b2   :  { %v4175_v16 = vpop.eup %4174  ;;  %3481 = vst [vmem:[#allocation5 + $0x410] sm:$0xff] %v3225_v36  ;;  %v2716_v41 = vmul.f32 %v4165_v29, %v2460_v13  ;;  %v1438_v2 = vmul.f32 %v4169_v0, %v1182_v52  ;;  %v1184_v61 = vadd.f32 2.0, %v4173_v8  ;;  %v6304_v46 = vmul.f32 1.442695, %v424_v6  ;;  %v6358_v36 = vld [vmem:[#allocation2 + $0x4a8] sm:$0xff]  ;;  %v6360_v13 = vld [vmem:[#allocation2 + $0x4b0] sm:$0xff] }
 0x1b3   :  { %v4177_v22 = vpop.eup %4176  ;;  %3482 = vst [vmem:[#allocation5 + $0x418] sm:$0xff] %v3226_v23  ;;  %v3227_v56 = vmul.f32 %v6248_v47, %v2715_v37  ;;  %v2717_v53 = vmul.f32 %v4167_v17, %v2461_v9  ;;  %v1439_v51 = vmul.f32 %v4171_v57, %v1183_v11  ;;  %v1185_v54 = vadd.f32 2.0, %v4175_v16  ;;  %v6356_v57 = vld [vmem:[#allocation2 + $0x4a0] sm:$0xff]  ;;  %v6377_v11 = vld [vmem:[#allocation2 + $0x4b8] sm:$0xff] }
 0x1b4   :  { %v4179_v43 = vpop.eup %4178  ;;  %v3228_v42 = vmul.f32 %v6259_v10, %v2716_v41  ;;  %v6308_v20 = vadd.f32 2.0, %v1438_v2  ;;  %v6311_v62 = vmul.f32 %v1438_v2, %v6225_v32  ;;  %v1440_v45 = vmul.f32 %v4173_v8, %v1184_v61  ;;  %v6385_v61 = vld [vmem:[#allocation2 + $0x4c0] sm:$0xff] }
 0x1b5   :  { %v4181_v12 = vpop.eup %4180  ;;  %3483 = vst [vmem:[#allocation5 + $0x420] sm:$0xff] %v3227_v56  ;;  %v3229_v60 = vmul.f32 %v6264_v35, %v2717_v53  ;;  %v6314_v27 = vadd.f32 2.0, %v1439_v51  ;;  %v6317_v47 = vmul.f32 %v1439_v51, %v6227_v40  ;;  %v1441_v30 = vmul.f32 %v4175_v16, %v1185_v54 }
 0x1b6   :  { %v4183_v4 = vpop.eup %4182  ;;  %3484 = vst [vmem:[#allocation5 + $0x428] sm:$0xff] %v3228_v42  ;;  %4188 = vrcp.f32 %v6308_v20  ;;  %v6320_v10 = vadd.f32 2.0, %v1440_v45  ;;  %v6323_v32 = vmul.f32 %v1440_v45, %v6250_v1  ;;  %v1186_v28 = vadd.f32 2.0, %v4177_v22 }
 0x1b7   :  { %3485 = vst [vmem:[#allocation5 + $0x430] sm:$0xff] %v3229_v60  ;;  %4190 = vrcp.f32 %v6314_v27  ;;  %v6328_v35 = vadd.f32 2.0, %v1441_v30  ;;  %v6331_v40 = vmul.f32 %v1441_v30, %v6252_v48  ;;  %v1187_v15 = vadd.f32 2.0, %v4179_v43 }
 0x1b8   :  { %v4185_v5 = vpop.eup %4184  ;;  %4192 = vrcp.f32 %v6320_v10  ;;  %v1442_v49 = vmul.f32 %v4177_v22, %v1186_v28  ;;  %v1188_v55 = vadd.f32 2.0, %v4181_v12  ;;  %v1189_v44 = vadd.f32 2.0, %v4183_v4 }
 0x1b9   :  { %v4187_v1 = vpop.eup %4186  ;;  %4194 = vrcp.f32 %v6328_v35  ;;  %v1443_v29 = vmul.f32 %v4179_v43, %v1187_v15  ;;  %v1190_v19 = vadd.f32 2.0, %v4185_v5  ;;  %v425_v58 = vmin.f32 %v6325_v26, 20.0 }
 0x1ba   :  { %v6336_v34 = vadd.f32 2.0, %v1442_v49  ;;  %v6339_v3 = vmul.f32 %v1442_v49, %v6254_v31  ;;  %v1444_v48 = vmul.f32 %v4181_v12, %v1188_v55  ;;  %v1445_v17 = vmul.f32 %v4183_v4, %v1189_v44 }
 0x1bb   :  { %v6341_v25 = vadd.f32 2.0, %v1443_v29  ;;  %v6344_v38 = vmul.f32 %v1443_v29, %v6266_v21  ;;  %v1446_v14 = vmul.f32 %v4185_v5, %v1190_v19  ;;  %v1191_v0 = vadd.f32 2.0, %v4187_v1 }
 0x1bc   :  { %4196 = vrcp.f32 %v6336_v34  ;;  %v6349_v18 = vadd.f32 2.0, %v1444_v48  ;;  %v6352_v7 = vmul.f32 %v1444_v48, %v6268_v33  ;;  %v6354_v31 = vadd.f32 2.0, %v1445_v17 }
 0x1bd   :  { %4198 = vrcp.f32 %v6341_v25  ;;  %v6364_v21 = vmul.f32 %v1445_v17, %v6279_v63  ;;  %v6366_v52 = vadd.f32 2.0, %v1446_v14  ;;  %v6369_v6 = vmul.f32 %v1446_v14, %v6281_v39 }
 0x1be   :  { %4200 = vrcp.f32 %v6349_v18  ;;  %v1447_v33 = vmul.f32 %v4187_v1, %v1191_v0  ;;  %v827_v8 = vmul.f32 1.442695, %v425_v58  ;;  %v426_v23 = vmin.f32 %v6346_v50, 20.0  ;;  %v6402_v0 = vld [vmem:[#allocation2 + $0x4d0] sm:$0xff] }
 0x1bf   :  { %4202 = vrcp.f32 %v6354_v31  ;;  %v427_v37 = vmin.f32 %v6356_v57, 20.0  ;;  %v428_v9 = vmin.f32 %v6358_v36, 20.0  ;;  %v429_v63 = vmin.f32 %v6360_v13, 20.0 }
 0x1c0   :  { %v4189_v16 = vpop.eup %4188  ;;  %4204 = vrcp.f32 %v6366_v52  ;;  %v6380_v39 = vadd.f32 2.0, %v1447_v33  ;;  %v6383_v41 = vmul.f32 %v1447_v33, %v6284_v24  ;;  %v829_v2 = vmul.f32 1.442695, %v426_v23 }
 0x1c1   :  { %v4191_v22 = vpop.eup %4190  ;;  %v2206_v56 = vmul.f32 %v4189_v16, %v6308_v20  ;;  %4206 = vpow2.f32 %v6304_v46  ;;  %v831_v53 = vmul.f32 1.442695, %v427_v37  ;;  %v833_v51 = vmul.f32 1.442695, %v428_v9  ;;  %v6394_v20 = vld [vmem:[#allocation2 + $0x4c8] sm:$0xff] }
 0x1c2   :  { %v4193_v54 = vpop.eup %4192  ;;  %v2207_v43 = vmul.f32 %v4191_v22, %v6314_v27  ;;  %4208 = vrcp.f32 %v6380_v39  ;;  %v835_v42 = vmul.f32 1.442695, %v429_v63  ;;  %v430_v45 = vmin.f32 %v6377_v11, 20.0 }
 0x1c3   :  { %v4195_v24 = vpop.eup %4194  ;;  %v2462_v12 = vsub.f32 2.0, %v2206_v56  ;;  %v2208_v60 = vmul.f32 %v4193_v54, %v6320_v10  ;;  %4210 = vpow2.f32 %v827_v8  ;;  %v431_v30 = vmin.f32 %v6385_v61, 20.0 }
 0x1c4   :  { %v2463_v46 = vsub.f32 2.0, %v2207_v43  ;;  %v2209_v4 = vmul.f32 %v4195_v24, %v6328_v35  ;;  %4212 = vpow2.f32 %v829_v2  ;;  %v837_v28 = vmul.f32 1.442695, %v430_v45 }
 0x1c5   :  { %v2718_v27 = vmul.f32 %v4189_v16, %v2462_v12  ;;  %v2464_v15 = vsub.f32 2.0, %v2208_v60  ;;  %4214 = vpow2.f32 %v831_v53  ;;  %v839_v5 = vmul.f32 1.442695, %v431_v30 }
 0x1c6   :  { %v4197_v49 = vpop.eup %4196  ;;  %v2719_v55 = vmul.f32 %v4191_v22, %v2463_v46  ;;  %v2465_v44 = vsub.f32 2.0, %v2209_v4  ;;  %4216 = vpow2.f32 %v833_v51  ;;  %v432_v10 = vmin.f32 %v6394_v20, 20.0 }
 0x1c7   :  { %v4199_v1 = vpop.eup %4198  ;;  %v3230_v29 = vmul.f32 %v6311_v62, %v2718_v27  ;;  %v2720_v19 = vmul.f32 %v4193_v54, %v2464_v15  ;;  %v2210_v58 = vmul.f32 %v4197_v49, %v6336_v34  ;;  %4218 = vpow2.f32 %v835_v42 }
 0x1c8   :  { %v4201_v35 = vpop.eup %4200  ;;  %v3231_v48 = vmul.f32 %v6317_v47, %v2719_v55  ;;  %v2721_v17 = vmul.f32 %v4195_v24, %v2465_v44  ;;  %v2211_v14 = vmul.f32 %v4199_v1, %v6341_v25  ;;  %4220 = vpow2.f32 %v837_v28 }
 0x1c9   :  { %v4203_v33 = vpop.eup %4202  ;;  %3486 = vst [vmem:[#allocation5 + $0x438] sm:$0xff] %v3230_v29  ;;  %v3232_v8 = vmul.f32 %v6323_v32, %v2720_v19  ;;  %v2466_v23 = vsub.f32 2.0, %v2210_v58  ;;  %v2212_v62 = vmul.f32 %v4201_v35, %v6349_v18  ;;  %4222 = vpow2.f32 %v839_v5 }
 0x1ca   :  { %v4205_v37 = vpop.eup %4204  ;;  %3487 = vst [vmem:[#allocation5 + $0x440] sm:$0xff] %v3231_v48  ;;  %v3233_v34 = vmul.f32 %v6331_v40, %v2721_v17  ;;  %v2467_v9 = vsub.f32 2.0, %v2211_v14  ;;  %v2213_v47 = vmul.f32 %v4203_v33, %v6354_v31  ;;  %v841_v63 = vmul.f32 1.442695, %v432_v10 }
 0x1cb   :  { %v4207_v25 = vpop.eup %4206  ;;  %3488 = vst [vmem:[#allocation5 + $0x448] sm:$0xff] %v3232_v8  ;;  %v2722_v16 = vmul.f32 %v4197_v49, %v2466_v23  ;;  %v2468_v2 = vsub.f32 2.0, %v2212_v62  ;;  %v2214_v22 = vmul.f32 %v4205_v37, %v6366_v52  ;;  %v433_v32 = vmin.f32 %v6402_v0, 20.0 }
 0x1cc   :  { %v4209_v56 = vpop.eup %4208  ;;  %3489 = vst [vmem:[#allocation5 + $0x450] sm:$0xff] %v3233_v34  ;;  %v2723_v18 = vmul.f32 %v4199_v1, %v2467_v9  ;;  %v2469_v53 = vsub.f32 2.0, %v2213_v47  ;;  %v1192_v51 = vadd.f32 2.0, %v4207_v25  ;;  %4224 = vpow2.f32 %v841_v63 }
 0x1cd   :  { %v4211_v54 = vpop.eup %4210  ;;  %v3234_v40 = vmul.f32 %v6339_v3, %v2722_v16  ;;  %v2724_v43 = vmul.f32 %v4201_v35, %v2468_v2  ;;  %v2470_v31 = vsub.f32 2.0, %v2214_v22  ;;  %v2215_v42 = vmul.f32 %v4209_v56, %v6380_v39  ;;  %v6452_v16 = vld [vmem:[#allocation2 + $0x4e8] sm:$0xff] }
 0x1ce   :  { %v4213_v45 = vpop.eup %4212  ;;  %v3235_v24 = vmul.f32 %v6344_v38, %v2723_v18  ;;  %v2725_v12 = vmul.f32 %v4203_v33, %v2469_v53  ;;  %v1448_v52 = vmul.f32 %v4207_v25, %v1192_v51  ;;  %v1193_v60 = vadd.f32 2.0, %v4211_v54  ;;  %v6448_v25 = vld [vmem:[#allocation2 + $0x4d8] sm:$0xff] }
 0x1cf   :  { %v4215_v30 = vpop.eup %4214  ;;  %3490 = vst [vmem:[#allocation5 + $0x458] sm:$0xff] %v3234_v40  ;;  %v3236_v46 = vmul.f32 %v6352_v7, %v2724_v43  ;;  %v2726_v4 = vmul.f32 %v4205_v37, %v2470_v31  ;;  %v2471_v28 = vsub.f32 2.0, %v2215_v42  ;;  %v1194_v27 = vadd.f32 2.0, %v4213_v45  ;;  %v6476_v43 = vld [vmem:[#allocation2 + $0x4f8] sm:$0xff]  ;;  %v6485_v42 = vld [vmem:[#allocation2 + $0x500] sm:$0xff] }
 0x1d0   :  { %v4217_v15 = vpop.eup %4216  ;;  %3491 = vst [vmem:[#allocation5 + $0x460] sm:$0xff] %v3235_v24  ;;  %v3237_v3 = vmul.f32 %v6364_v21, %v2725_v12  ;;  %v6415_v5 = vadd.f32 2.0, %v1448_v52  ;;  %v6418_v39 = vmul.f32 %v1448_v52, %v6296_v59  ;;  %v1449_v38 = vmul.f32 %v4211_v54, %v1193_v60  ;;  %v6489_v24 = vld [vmem:[#allocation2 + $0x510] sm:$0xff] }
 0x1d1   :  { %v4219_v49 = vpop.eup %4218  ;;  %3492 = vst [vmem:[#allocation5 + $0x468] sm:$0xff] %v3236_v46  ;;  %v3238_v55 = vmul.f32 %v6369_v6, %v2726_v4  ;;  %v2727_v44 = vmul.f32 %v4209_v56, %v2471_v28  ;;  %v1450_v10 = vmul.f32 %v4213_v45, %v1194_v27  ;;  %v1195_v7 = vadd.f32 2.0, %v4215_v30  ;;  %v6462_v56 = vld [vmem:[#allocation2 + $0x4f0] sm:$0xff]  ;;  %v6487_v45 = vld [vmem:[#allocation2 + $0x508] sm:$0xff] }
 0x1d2   :  { %v4221_v1 = vpop.eup %4220  ;;  %3493 = vst [vmem:[#allocation5 + $0x470] sm:$0xff] %v3237_v3  ;;  %4226 = vrcp.f32 %v6415_v5  ;;  %v6422_v29 = vadd.f32 2.0, %v1449_v38  ;;  %v6425_v21 = vmul.f32 %v1449_v38, %v6325_v26  ;;  %v1196_v19 = vadd.f32 2.0, %v4217_v15 }
 0x1d3   :  { %v4223_v59 = vpop.eup %4222  ;;  %3494 = vst [vmem:[#allocation5 + $0x478] sm:$0xff] %v3238_v55  ;;  %v3239_v58 = vmul.f32 %v6383_v41, %v2727_v44  ;;  %v6428_v35 = vadd.f32 2.0, %v1450_v10  ;;  %v6431_v6 = vmul.f32 %v1450_v10, %v6346_v50  ;;  %v1451_v48 = vmul.f32 %v4215_v30, %v1195_v7 }
 0x1d4   :  { %4228 = vrcp.f32 %v6422_v29  ;;  %v1452_v17 = vmul.f32 %v4217_v15, %v1196_v19  ;;  %v1197_v14 = vadd.f32 2.0, %v4219_v49  ;;  %v1198_v33 = vadd.f32 2.0, %v4221_v1 }
 0x1d5   :  { %3495 = vst [vmem:[#allocation5 + $0x480] sm:$0xff] %v3239_v58  ;;  %4230 = vrcp.f32 %v6428_v35  ;;  %v6435_v26 = vadd.f32 2.0, %v1451_v48  ;;  %v6438_v8 = vmul.f32 %v1451_v48, %v6356_v57  ;;  %v1199_v41 = vadd.f32 2.0, %v4223_v59  ;;  %v6450_v57 = vld [vmem:[#allocation2 + $0x4e0] sm:$0xff] }
 0x1d6   :  { %v4225_v23 = vpop.eup %4224  ;;  %v6440_v62 = vadd.f32 2.0, %v1452_v17  ;;  %v6443_v50 = vmul.f32 %v1452_v17, %v6358_v36  ;;  %v1453_v37 = vmul.f32 %v4219_v49, %v1197_v14  ;;  %v1454_v34 = vmul.f32 %v4221_v1, %v1198_v33 }
 0x1d7   :  { %4232 = vrcp.f32 %v6435_v26  ;;  %v1455_v9 = vmul.f32 %v4223_v59, %v1199_v41  ;;  %v1200_v47 = vadd.f32 2.0, %v4225_v23  ;;  %v843_v63 = vmul.f32 1.442695, %v433_v32 }
 0x1d8   :  { %4234 = vrcp.f32 %v6440_v62  ;;  %v6455_v2 = vadd.f32 2.0, %v1453_v37  ;;  %v6458_v36 = vmul.f32 %v1453_v37, %v6360_v13  ;;  %v6460_v22 = vadd.f32 2.0, %v1454_v34 }
 0x1d9   :  { %v6465_v18 = vmul.f32 %v1454_v34, %v6377_v11  ;;  %v6467_v32 = vadd.f32 2.0, %v1455_v9  ;;  %v6470_v53 = vmul.f32 %v1455_v9, %v6385_v61  ;;  %v1456_v51 = vmul.f32 %v4225_v23, %v1200_v47 }
 0x1da   :  { %4236 = vrcp.f32 %v6455_v2  ;;  %v434_v54 = vmin.f32 %v6448_v25, 20.0  ;;  %v435_v13 = vmin.f32 %v6450_v57, 20.0  ;;  %v436_v40 = vmin.f32 %v6452_v16, 20.0 }
 0x1db   :  { %4238 = vrcp.f32 %v6460_v22  ;;  %v6479_v11 = vadd.f32 2.0, %v1456_v51  ;;  %v6482_v31 = vmul.f32 %v1456_v51, %v6394_v20  ;;  %v437_v61 = vmin.f32 %v6462_v56, 20.0 }
 0x1dc   :  { %v4227_v12 = vpop.eup %4226  ;;  %4240 = vrcp.f32 %v6467_v32  ;;  %v845_v52 = vmul.f32 1.442695, %v434_v54  ;;  %v847_v60 = vmul.f32 1.442695, %v435_v13  ;;  %v849_v30 = vmul.f32 1.442695, %v436_v40 }
 0x1dd   :  { %v2216_v46 = vmul.f32 %v4227_v12, %v6415_v5  ;;  %4242 = vrcp.f32 %v6479_v11  ;;  %v851_v20 = vmul.f32 1.442695, %v437_v61  ;;  %v438_v4 = vmin.f32 %v6476_v43, 20.0  ;;  %v6499_v5 = vld [vmem:[#allocation2 + $0x518] sm:$0xff]  ;;  %v6508_v13 = vld [vmem:[#allocation2 + $0x520] sm:$0xff] }
 0x1de   :  { %v4229_v28 = vpop.eup %4228  ;;  %4244 = vpow2.f32 %v843_v63  ;;  %v439_v27 = vmin.f32 %v6485_v42, 20.0  ;;  %v440_v15 = vmin.f32 %v6487_v45, 20.0  ;;  %v441_v3 = vmin.f32 %v6489_v24, 20.0 }
 0x1df   :  { %v4231_v38 = vpop.eup %4230  ;;  %v2472_v49 = vsub.f32 2.0, %v2216_v46  ;;  %v2217_v55 = vmul.f32 %v4229_v28, %v6422_v29  ;;  %4246 = vpow2.f32 %v845_v52  ;;  %v853_v44 = vmul.f32 1.442695, %v438_v4 }
 0x1e0   :  { %v2218_v10 = vmul.f32 %v4231_v38, %v6428_v35  ;;  %4248 = vpow2.f32 %v847_v60  ;;  %v855_v7 = vmul.f32 1.442695, %v439_v27  ;;  %v857_v1 = vmul.f32 1.442695, %v440_v15 }
 0x1e1   :  { %v4233_v19 = vpop.eup %4232  ;;  %v2728_v59 = vmul.f32 %v4227_v12, %v2472_v49  ;;  %v2473_v58 = vsub.f32 2.0, %v2217_v55  ;;  %4250 = vpow2.f32 %v849_v30  ;;  %v859_v48 = vmul.f32 1.442695, %v441_v3 }
 0x1e2   :  { %v4235_v17 = vpop.eup %4234  ;;  %v2474_v14 = vsub.f32 2.0, %v2218_v10  ;;  %v2219_v33 = vmul.f32 %v4233_v19, %v6435_v26  ;;  %4252 = vpow2.f32 %v851_v20  ;;  %v442_v29 = vmin.f32 %v6499_v5, 20.0 }
 0x1e3   :  { %v3240_v41 = vmul.f32 %v6418_v39, %v2728_v59  ;;  %v2729_v23 = vmul.f32 %v4229_v28, %v2473_v58  ;;  %v2220_v35 = vmul.f32 %v4235_v17, %v6440_v62  ;;  %4254 = vpow2.f32 %v853_v44 }
 0x1e4   :  { %v4237_v37 = vpop.eup %4236  ;;  %v2730_v34 = vmul.f32 %v4231_v38, %v2474_v14  ;;  %v2475_v9 = vsub.f32 2.0, %v2219_v33  ;;  %4256 = vpow2.f32 %v855_v7  ;;  %v861_v47 = vmul.f32 1.442695, %v442_v29 }
 0x1e5   :  { %v4239_v63 = vpop.eup %4238  ;;  %3496 = vst [vmem:[#allocation5 + $0x488] sm:$0xff] %v3240_v41  ;;  %v3241_v51 = vmul.f32 %v6425_v21, %v2729_v23  ;;  %v2476_v54 = vsub.f32 2.0, %v2220_v35  ;;  %v2221_v26 = vmul.f32 %v4237_v37, %v6455_v2  ;;  %4258 = vpow2.f32 %v857_v1 }
 0x1e6   :  { %v4241_v39 = vpop.eup %4240  ;;  %v3242_v40 = vmul.f32 %v6431_v6, %v2730_v34  ;;  %v2731_v62 = vmul.f32 %v4233_v19, %v2475_v9  ;;  %v2222_v61 = vmul.f32 %v4239_v63, %v6460_v22  ;;  %4260 = vpow2.f32 %v859_v48 }
 0x1e7   :  { %v4243_v12 = vpop.eup %4242  ;;  %3497 = vst [vmem:[#allocation5 + $0x490] sm:$0xff] %v3241_v51  ;;  %v2732_v52 = vmul.f32 %v4235_v17, %v2476_v54  ;;  %v2477_v60 = vsub.f32 2.0, %v2221_v26  ;;  %v2223_v30 = vmul.f32 %v4241_v39, %v6467_v32  ;;  %4262 = vpow2.f32 %v861_v47 }
 0x1e8   :  { %v4245_v21 = vpop.eup %4244  ;;  %3498 = vst [vmem:[#allocation5 + $0x498] sm:$0xff] %v3242_v40  ;;  %v3243_v2 = vmul.f32 %v6438_v8, %v2731_v62  ;;  %v2478_v46 = vsub.f32 2.0, %v2222_v61  ;;  %v2224_v20 = vmul.f32 %v4243_v12, %v6479_v11  ;;  %v443_v6 = vmin.f32 %v6508_v13, 20.0 }
 0x1e9   :  { %v4247_v4 = vpop.eup %4246  ;;  %v3244_v22 = vmul.f32 %v6443_v50, %v2732_v52  ;;  %v2733_v28 = vmul.f32 %v4237_v37, %v2477_v60  ;;  %v2479_v27 = vsub.f32 2.0, %v2223_v30  ;;  %v1201_v15 = vadd.f32 2.0, %v4245_v21 }
 0x1ea   :  { %v4249_v3 = vpop.eup %4248  ;;  %3499 = vst [vmem:[#allocation5 + $0x4a0] sm:$0xff] %v3243_v2  ;;  %v2734_v38 = vmul.f32 %v4239_v63, %v2478_v46  ;;  %v2480_v32 = vsub.f32 2.0, %v2224_v20  ;;  %v1202_v49 = vadd.f32 2.0, %v4247_v4  ;;  %v6517_v55 = vmul.f32 1.442695, %v443_v6  ;;  %v6557_v2 = vld [vmem:[#allocation2 + $0x528] sm:$0xff] }
 0x1eb   :  { %v4251_v44 = vpop.eup %4250  ;;  %3500 = vst [vmem:[#allocation5 + $0x4a8] sm:$0xff] %v3244_v22  ;;  %v3245_v8 = vmul.f32 %v6458_v36, %v2733_v28  ;;  %v2735_v11 = vmul.f32 %v4241_v39, %v2479_v27  ;;  %v1457_v10 = vmul.f32 %v4245_v21, %v1201_v15  ;;  %v1203_v7 = vadd.f32 2.0, %v4249_v3  ;;  %v6567_v6 = vld [vmem:[#allocation2 + $0x530] sm:$0xff]  ;;  %v6571_v22 = vld [vmem:[#allocation2 + $0x540] sm:$0xff] }
 0x1ec   :  { %v4253_v1 = vpop.eup %4252  ;;  %v3246_v50 = vmul.f32 %v6465_v18, %v2734_v38  ;;  %v2736_v19 = vmul.f32 %v4243_v12, %v2480_v32  ;;  %v1458_v59 = vmul.f32 %v4247_v4, %v1202_v49  ;;  %v1204_v58 = vadd.f32 2.0, %v4251_v44  ;;  %v6569_v4 = vld [vmem:[#allocation2 + $0x538] sm:$0xff]  ;;  %v6584_v15 = vld [vmem:[#allocation2 + $0x550] sm:$0xff] }
 0x1ed   :  { %v4255_v48 = vpop.eup %4254  ;;  %3501 = vst [vmem:[#allocation5 + $0x4b0] sm:$0xff] %v3245_v8  ;;  %v3247_v17 = vmul.f32 %v6470_v53, %v2735_v11  ;;  %v6522_v14 = vadd.f32 2.0, %v1457_v10  ;;  %v6525_v33 = vmul.f32 %v1457_v10, %v6402_v0  ;;  %v1459_v29 = vmul.f32 %v4249_v3, %v1203_v7 }
 0x1ee   :  { %v4257_v36 = vpop.eup %4256  ;;  %3502 = vst [vmem:[#allocation5 + $0x4b8] sm:$0xff] %v3246_v50  ;;  %v3248_v41 = vmul.f32 %v6482_v31, %v2736_v19  ;;  %v6528_v23 = vadd.f32 2.0, %v1458_v59  ;;  %v6531_v18 = vmul.f32 %v1458_v59, %v6448_v25  ;;  %v1460_v35 = vmul.f32 %v4251_v44, %v1204_v58  ;;  %v6602_v19 = vld [vmem:[#allocation2 + $0x558] sm:$0xff] }
 0x1ef   :  { %v4259_v37 = vpop.eup %4258  ;;  %3503 = vst [vmem:[#allocation5 + $0x4c0] sm:$0xff] %v3247_v17  ;;  %4264 = vrcp.f32 %v6522_v14  ;;  %v6534_v53 = vadd.f32 2.0, %v1459_v29  ;;  %v6537_v0 = vmul.f32 %v1459_v29, %v6450_v57  ;;  %v1205_v34 = vadd.f32 2.0, %v4253_v1  ;;  %v6606_v29 = vld [vmem:[#allocation2 + $0x560] sm:$0xff] }
 0x1f0   :  { %v4261_v9 = vpop.eup %4260  ;;  %3504 = vst [vmem:[#allocation5 + $0x4c8] sm:$0xff] %v3248_v41  ;;  %4266 = vrcp.f32 %v6528_v23  ;;  %v6540_v31 = vadd.f32 2.0, %v1460_v35  ;;  %v6543_v25 = vmul.f32 %v1460_v35, %v6452_v16  ;;  %v1206_v47 = vadd.f32 2.0, %v4255_v48 }
 0x1f1   :  { %v4263_v63 = vpop.eup %4262  ;;  %4268 = vrcp.f32 %v6534_v53  ;;  %v1461_v51 = vmul.f32 %v4253_v1, %v1205_v34  ;;  %v1207_v54 = vadd.f32 2.0, %v4257_v36  ;;  %v1208_v26 = vadd.f32 2.0, %v4259_v37 }
 0x1f2   :  { %4270 = vrcp.f32 %v6540_v31  ;;  %v1462_v57 = vmul.f32 %v4255_v48, %v1206_v47  ;;  %v1209_v39 = vadd.f32 2.0, %v4261_v9  ;;  %v1210_v40 = vadd.f32 2.0, %v4263_v63 }
 0x1f3   :  { %v6547_v62 = vadd.f32 2.0, %v1461_v51  ;;  %v6550_v61 = vmul.f32 %v1461_v51, %v6462_v56  ;;  %v1463_v12 = vmul.f32 %v4257_v36, %v1207_v54  ;;  %v1464_v16 = vmul.f32 %v4259_v37, %v1208_v26 }
 0x1f4   :  { %v6552_v52 = vadd.f32 2.0, %v1462_v57  ;;  %v6555_v60 = vmul.f32 %v1462_v57, %v6476_v43  ;;  %v1465_v30 = vmul.f32 %v4261_v9, %v1209_v39  ;;  %v1466_v21 = vmul.f32 %v4263_v63, %v1210_v40 }
 0x1f5   :  { %4272 = vrcp.f32 %v6547_v62  ;;  %v6560_v46 = vadd.f32 2.0, %v1463_v12  ;;  %v6563_v20 = vmul.f32 %v1463_v12, %v6485_v42  ;;  %v6565_v56 = vadd.f32 2.0, %v1464_v16  ;;  %v6582_v42 = vld [vmem:[#allocation2 + $0x548] sm:$0xff] }
 0x1f6   :  { %4274 = vrcp.f32 %v6552_v52  ;;  %v6575_v43 = vmul.f32 %v1464_v16, %v6487_v45  ;;  %v6577_v28 = vadd.f32 2.0, %v1465_v30  ;;  %v6580_v27 = vmul.f32 %v1465_v30, %v6489_v24 }
 0x1f7   :  { %4276 = vrcp.f32 %v6560_v46  ;;  %v6587_v3 = vadd.f32 2.0, %v1466_v21  ;;  %v6590_v38 = vmul.f32 %v1466_v21, %v6499_v5  ;;  %v444_v32 = vmin.f32 %v6557_v2, 20.0  ;;  %v6616_v21 = vld [vmem:[#allocation2 + $0x568] sm:$0xff] }
 0x1f8   :  { %4278 = vrcp.f32 %v6565_v56  ;;  %v445_v45 = vmin.f32 %v6567_v6, 20.0  ;;  %v446_v24 = vmin.f32 %v6569_v4, 20.0  ;;  %v447_v49 = vmin.f32 %v6571_v22, 20.0 }
 0x1f9   :  { %v4265_v44 = vpop.eup %4264  ;;  %4280 = vrcp.f32 %v6577_v28  ;;  %v865_v8 = vmul.f32 1.442695, %v444_v32  ;;  %v448_v11 = vmin.f32 %v6582_v42, 20.0  ;;  %v449_v10 = vmin.f32 %v6584_v15, 20.0 }
 0x1fa   :  { %v4267_v5 = vpop.eup %4266  ;;  %v2225_v7 = vmul.f32 %v4265_v44, %v6522_v14  ;;  %4282 = vrcp.f32 %v6587_v3  ;;  %v867_v1 = vmul.f32 1.442695, %v445_v45  ;;  %v869_v50 = vmul.f32 1.442695, %v446_v24 }
 0x1fb   :  { %v4269_v59 = vpop.eup %4268  ;;  %v2226_v58 = vmul.f32 %v4267_v5, %v6528_v23  ;;  %4284 = vpow2.f32 %v6517_v55  ;;  %v871_v48 = vmul.f32 1.442695, %v447_v49  ;;  %v873_v17 = vmul.f32 1.442695, %v448_v11 }
 0x1fc   :  { %v4271_v36 = vpop.eup %4270  ;;  %v2481_v41 = vsub.f32 2.0, %v2225_v7  ;;  %v2227_v35 = vmul.f32 %v4269_v59, %v6534_v53  ;;  %4286 = vpow2.f32 %v865_v8  ;;  %v875_v14 = vmul.f32 1.442695, %v449_v10 }
 0x1fd   :  { %v2482_v37 = vsub.f32 2.0, %v2226_v58  ;;  %v2228_v34 = vmul.f32 %v4271_v36, %v6540_v31  ;;  %4288 = vpow2.f32 %v867_v1  ;;  %v450_v9 = vmin.f32 %v6602_v19, 20.0 }
 0x1fe   :  { %v2737_v47 = vmul.f32 %v4265_v44, %v2481_v41  ;;  %v2483_v23 = vsub.f32 2.0, %v2227_v35  ;;  %4290 = vpow2.f32 %v869_v50  ;;  %v451_v55 = vmin.f32 %v6606_v29, 20.0 }
 0x1ff   :  { %v4273_v63 = vpop.eup %4272  ;;  %v2738_v51 = vmul.f32 %v4267_v5, %v2482_v37  ;;  %v2484_v54 = vsub.f32 2.0, %v2228_v34  ;;  %4292 = vpow2.f32 %v871_v48  ;;  %v877_v26 = vmul.f32 1.442695, %v450_v9 }
 0x200   :  { %v4275_v57 = vpop.eup %4274  ;;  %v3249_v53 = vmul.f32 %v6525_v33, %v2737_v47  ;;  %v2739_v39 = vmul.f32 %v4269_v59, %v2483_v23  ;;  %v2229_v40 = vmul.f32 %v4273_v63, %v6547_v62  ;;  %4294 = vpow2.f32 %v873_v17 }
 0x201   :  { %v4277_v31 = vpop.eup %4276  ;;  %v3250_v12 = vmul.f32 %v6531_v18, %v2738_v51  ;;  %v2740_v16 = vmul.f32 %v4271_v36, %v2484_v54  ;;  %v2230_v30 = vmul.f32 %v4275_v57, %v6552_v52  ;;  %4296 = vpow2.f32 %v875_v14 }
 0x202   :  { %v4279_v32 = vpop.eup %4278  ;;  %3505 = vst [vmem:[#allocation5 + $0x4d0] sm:$0xff] %v3249_v53  ;;  %v3251_v45 = vmul.f32 %v6537_v0, %v2739_v39  ;;  %v2485_v24 = vsub.f32 2.0, %v2229_v40  ;;  %v2231_v33 = vmul.f32 %v4277_v31, %v6560_v46  ;;  %4298 = vpow2.f32 %v877_v26 }
 0x203   :  { %v4281_v49 = vpop.eup %4280  ;;  %3506 = vst [vmem:[#allocation5 + $0x4d8] sm:$0xff] %v3250_v12  ;;  %v3252_v62 = vmul.f32 %v6543_v25, %v2740_v16  ;;  %v2486_v44 = vsub.f32 2.0, %v2230_v30  ;;  %v2232_v18 = vmul.f32 %v4279_v32, %v6565_v56  ;;  %v879_v8 = vmul.f32 1.442695, %v451_v55  ;;  %v6647_v16 = vld [vmem:[#allocation2 + $0x570] sm:$0xff] }
 0x204   :  { %v4283_v52 = vpop.eup %4282  ;;  %3507 = vst [vmem:[#allocation5 + $0x4e0] sm:$0xff] %v3251_v45  ;;  %v2741_v11 = vmul.f32 %v4273_v63, %v2485_v24  ;;  %v2487_v10 = vsub.f32 2.0, %v2231_v33  ;;  %v2233_v5 = vmul.f32 %v4281_v49, %v6577_v28  ;;  %v452_v0 = vmin.f32 %v6616_v21, 20.0 }
 0x205   :  { %v4285_v7 = vpop.eup %4284  ;;  %3508 = vst [vmem:[#allocation5 + $0x4e8] sm:$0xff] %v3252_v62  ;;  %v2742_v46 = vmul.f32 %v4275_v57, %v2486_v44  ;;  %v2488_v1 = vsub.f32 2.0, %v2232_v18  ;;  %v2234_v50 = vmul.f32 %v4283_v52, %v6587_v3  ;;  %4300 = vpow2.f32 %v879_v8 }
 0x206   :  { %v4287_v25 = vpop.eup %4286  ;;  %v3253_v59 = vmul.f32 %v6550_v61, %v2741_v11  ;;  %v2743_v56 = vmul.f32 %v4277_v31, %v2487_v10  ;;  %v2489_v58 = vsub.f32 2.0, %v2233_v5  ;;  %v1211_v48 = vadd.f32 2.0, %v4285_v7  ;;  %v6668_v5 = vld [vmem:[#allocation2 + $0x578] sm:$0xff] }
 0x207   :  { %v4289_v17 = vpop.eup %4288  ;;  %v3254_v36 = vmul.f32 %v6555_v60, %v2742_v46  ;;  %v2744_v41 = vmul.f32 %v4279_v32, %v2488_v1  ;;  %v2490_v28 = vsub.f32 2.0, %v2234_v50  ;;  %v1212_v35 = vadd.f32 2.0, %v4287_v25  ;;  %v6682_v50 = vld [vmem:[#allocation2 + $0x590] sm:$0xff] }
 0x208   :  { %v4291_v14 = vpop.eup %4290  ;;  %3509 = vst [vmem:[#allocation5 + $0x4f0] sm:$0xff] %v3253_v59  ;;  %v3255_v37 = vmul.f32 %v6563_v20, %v2743_v56  ;;  %v2745_v34 = vmul.f32 %v4281_v49, %v2489_v58  ;;  %v1467_v9 = vmul.f32 %v4285_v7, %v1211_v48  ;;  %v1213_v3 = vadd.f32 2.0, %v4289_v17  ;;  %v6670_v7 = vld [vmem:[#allocation2 + $0x580] sm:$0xff]  ;;  %v6692_v48 = vld [vmem:[#allocation2 + $0x598] sm:$0xff] }
 0x209   :  { %v4293_v47 = vpop.eup %4292  ;;  %3510 = vst [vmem:[#allocation5 + $0x4f8] sm:$0xff] %v3254_v36  ;;  %v3256_v61 = vmul.f32 %v6575_v43, %v2744_v41  ;;  %v2746_v23 = vmul.f32 %v4283_v52, %v2490_v28  ;;  %v1468_v55 = vmul.f32 %v4287_v25, %v1212_v35  ;;  %v1214_v63 = vadd.f32 2.0, %v4291_v14  ;;  %v6701_v41 = vld [vmem:[#allocation2 + $0x5a0] sm:$0xff]  ;;  %v6703_v28 = vld [vmem:[#allocation2 + $0x5a8] sm:$0xff] }
 0x20a   :  { %v4295_v51 = vpop.eup %4294  ;;  %3511 = vst [vmem:[#allocation5 + $0x500] sm:$0xff] %v3255_v37  ;;  %v3257_v60 = vmul.f32 %v6580_v27, %v2745_v34  ;;  %v6630_v54 = vadd.f32 2.0, %v1467_v9  ;;  %v6633_v26 = vmul.f32 %v1467_v9, %v6508_v13  ;;  %v1469_v20 = vmul.f32 %v4289_v17, %v1213_v3 }
 0x20b   :  { %v4297_v57 = vpop.eup %4296  ;;  %3512 = vst [vmem:[#allocation5 + $0x508] sm:$0xff] %v3256_v61  ;;  %v3258_v53 = vmul.f32 %v6590_v38, %v2746_v23  ;;  %v6636_v39 = vadd.f32 2.0, %v1468_v55  ;;  %v6639_v43 = vmul.f32 %v1468_v55, %v6557_v2  ;;  %v1470_v40 = vmul.f32 %v4291_v14, %v1214_v63 }
 0x20c   :  { %v4299_v31 = vpop.eup %4298  ;;  %3513 = vst [vmem:[#allocation5 + $0x510] sm:$0xff] %v3257_v60  ;;  %4302 = vrcp.f32 %v6630_v54  ;;  %v6642_v27 = vadd.f32 2.0, %v1469_v20  ;;  %v6645_v13 = vmul.f32 %v1469_v20, %v6567_v6  ;;  %v1215_v12 = vadd.f32 2.0, %v4293_v47 }
 0x20d   :  { %3514 = vst [vmem:[#allocation5 + $0x518] sm:$0xff] %v3258_v53  ;;  %4304 = vrcp.f32 %v6636_v39  ;;  %v6650_v38 = vadd.f32 2.0, %v1470_v40  ;;  %v6653_v2 = vmul.f32 %v1470_v40, %v6569_v4  ;;  %v1216_v30 = vadd.f32 2.0, %v4295_v51 }
 0x20e   :  { %4306 = vrcp.f32 %v6642_v27  ;;  %v1471_v32 = vmul.f32 %v4293_v47, %v1215_v12  ;;  %v1217_v45 = vadd.f32 2.0, %v4297_v57  ;;  %v1218_v24 = vadd.f32 2.0, %v4299_v31 }
 0x20f   :  { %v4301_v33 = vpop.eup %4300  ;;  %4308 = vrcp.f32 %v6650_v38  ;;  %v1472_v6 = vmul.f32 %v4295_v51, %v1216_v30  ;;  %v881_v49 = vmul.f32 1.442695, %v452_v0  ;;  %v453_v62 = vmin.f32 %v6647_v16, 20.0  ;;  %v6672_v0 = vld [vmem:[#allocation2 + $0x588] sm:$0xff] }
 0x210   :  { %v6658_v44 = vadd.f32 2.0, %v1471_v32  ;;  %v6661_v18 = vmul.f32 %v1471_v32, %v6571_v22  ;;  %v1473_v4 = vmul.f32 %v4297_v57, %v1217_v45  ;;  %v1474_v8 = vmul.f32 %v4299_v31, %v1218_v24 }
 0x211   :  { %v6663_v52 = vadd.f32 2.0, %v1472_v6  ;;  %v6666_v11 = vmul.f32 %v1472_v6, %v6582_v42  ;;  %v1219_v10 = vadd.f32 2.0, %v4301_v33  ;;  %4310 = vpow2.f32 %v881_v49 }
 0x212   :  { %4312 = vrcp.f32 %v6658_v44  ;;  %v6675_v46 = vadd.f32 2.0, %v1473_v4  ;;  %v6678_v22 = vmul.f32 %v1473_v4, %v6584_v15  ;;  %v6680_v1 = vadd.f32 2.0, %v1474_v8 }
 0x213   :  { %4314 = vrcp.f32 %v6663_v52  ;;  %v6686_v42 = vmul.f32 %v1474_v8, %v6602_v19  ;;  %v1475_v25 = vmul.f32 %v4301_v33, %v1219_v10  ;;  %v883_v59 = vmul.f32 1.442695, %v453_v62 }
 0x214   :  { %4316 = vrcp.f32 %v6675_v46  ;;  %v454_v56 = vmin.f32 %v6668_v5, 20.0  ;;  %v455_v58 = vmin.f32 %v6670_v7, 20.0  ;;  %v456_v15 = vmin.f32 %v6672_v0, 20.0 }
 0x215   :  { %4318 = vrcp.f32 %v6680_v1  ;;  %v6695_v17 = vadd.f32 2.0, %v1475_v25  ;;  %v6698_v36 = vmul.f32 %v1475_v25, %v6606_v29  ;;  %v457_v19 = vmin.f32 %v6682_v50, 20.0 }
 0x216   :  { %v4303_v35 = vpop.eup %4302  ;;  %4320 = vpow2.f32 %v883_v59  ;;  %v885_v14 = vmul.f32 1.442695, %v454_v56  ;;  %v887_v37 = vmul.f32 1.442695, %v455_v58  ;;  %v889_v34 = vmul.f32 1.442695, %v456_v15 }
 0x217   :  { %v4305_v9 = vpop.eup %4304  ;;  %v2235_v3 = vmul.f32 %v4303_v35, %v6630_v54  ;;  %4322 = vrcp.f32 %v6695_v17  ;;  %v891_v47 = vmul.f32 1.442695, %v457_v19  ;;  %v458_v29 = vmin.f32 %v6692_v48, 20.0 }
 0x218   :  { %v4307_v61 = vpop.eup %4306  ;;  %v2236_v23 = vmul.f32 %v4305_v9, %v6636_v39  ;;  %4324 = vpow2.f32 %v885_v14  ;;  %v459_v55 = vmin.f32 %v6701_v41, 20.0  ;;  %v460_v63 = vmin.f32 %v6703_v28, 20.0 }
 0x219   :  { %v4309_v51 = vpop.eup %4308  ;;  %v2491_v60 = vsub.f32 2.0, %v2235_v3  ;;  %v2237_v20 = vmul.f32 %v4307_v61, %v6642_v27  ;;  %4326 = vpow2.f32 %v887_v37  ;;  %v893_v57 = vmul.f32 1.442695, %v458_v29 }
 0x21a   :  { %v2492_v54 = vsub.f32 2.0, %v2236_v23  ;;  %v2238_v53 = vmul.f32 %v4309_v51, %v6650_v38  ;;  %4328 = vpow2.f32 %v889_v34  ;;  %v895_v40 = vmul.f32 1.442695, %v459_v55 }
 0x21b   :  { %v4311_v31 = vpop.eup %4310  ;;  %v2747_v12 = vmul.f32 %v4303_v35, %v2491_v60  ;;  %v2493_v30 = vsub.f32 2.0, %v2237_v20  ;;  %4330 = vpow2.f32 %v891_v47  ;;  %v897_v39 = vmul.f32 1.442695, %v460_v63 }
 0x21c   :  { %v4313_v32 = vpop.eup %4312  ;;  %v2748_v45 = vmul.f32 %v4305_v9, %v2492_v54  ;;  %v2494_v24 = vsub.f32 2.0, %v2238_v53  ;;  %v1220_v33 = vadd.f32 2.0, %v4311_v31  ;;  %4332 = vpow2.f32 %v893_v57 }
 0x21d   :  { %v4315_v6 = vpop.eup %4314  ;;  %v3259_v27 = vmul.f32 %v6633_v26, %v2747_v12  ;;  %v2749_v49 = vmul.f32 %v4307_v61, %v2493_v30  ;;  %v2239_v62 = vmul.f32 %v4313_v32, %v6658_v44  ;;  %4334 = vpow2.f32 %v895_v40 }
 0x21e   :  { %v4317_v38 = vpop.eup %4316  ;;  %v3260_v4 = vmul.f32 %v6639_v43, %v2748_v45  ;;  %v2750_v8 = vmul.f32 %v4309_v51, %v2494_v24  ;;  %v2240_v10 = vmul.f32 %v4315_v6, %v6663_v52  ;;  %v1476_v25 = vmul.f32 %v4311_v31, %v1220_v33 }
 0x21f   :  { %v4319_v59 = vpop.eup %4318  ;;  %3515 = vst [vmem:[#allocation5 + $0x520] sm:$0xff] %v3259_v27  ;;  %v3261_v56 = vmul.f32 %v6645_v13, %v2749_v49  ;;  %v2495_v58 = vsub.f32 2.0, %v2239_v62  ;;  %v2241_v15 = vmul.f32 %v4317_v38, %v6675_v46  ;;  %4336 = vpow2.f32 %v897_v39  ;;  %v6750_v62 = vld [vmem:[#allocation2 + $0x5b0] sm:$0xff] }
 0x220   :  { %v4321_v26 = vpop.eup %4320  ;;  %3516 = vst [vmem:[#allocation5 + $0x528] sm:$0xff] %v3260_v4  ;;  %v3262_v44 = vmul.f32 %v6653_v2, %v2750_v8  ;;  %v2496_v19 = vsub.f32 2.0, %v2240_v10  ;;  %v2242_v35 = vmul.f32 %v4319_v59, %v6680_v1  ;;  %v6721_v43 = vadd.f32 2.0, %v1476_v25 }
 0x221   :  { %v4323_v14 = vpop.eup %4322  ;;  %3517 = vst [vmem:[#allocation5 + $0x530] sm:$0xff] %v3261_v56  ;;  %v2751_v52 = vmul.f32 %v4313_v32, %v2495_v58  ;;  %v2497_v37 = vsub.f32 2.0, %v2241_v15  ;;  %v6724_v34 = vmul.f32 %v1476_v25, %v6616_v21  ;;  %v1221_v13 = vadd.f32 2.0, %v4321_v26 }
 0x222   :  { %v4325_v9 = vpop.eup %4324  ;;  %3518 = vst [vmem:[#allocation5 + $0x538] sm:$0xff] %v3262_v44  ;;  %v2752_v46 = vmul.f32 %v4315_v6, %v2496_v19  ;;  %v2498_v3 = vsub.f32 2.0, %v2242_v35  ;;  %v2243_v47 = vmul.f32 %v4323_v14, %v6695_v17  ;;  %4338 = vrcp.f32 %v6721_v43  ;;  %v6777_v19 = vld [vmem:[#allocation2 + $0x5c8] sm:$0xff]  ;;  %v6779_v35 = vld [vmem:[#allocation2 + $0x5d0] sm:$0xff] }
 0x223   :  { %v4327_v2 = vpop.eup %4326  ;;  %v3263_v1 = vmul.f32 %v6661_v18, %v2751_v52  ;;  %v2753_v29 = vmul.f32 %v4317_v38, %v2497_v37  ;;  %v1477_v61 = vmul.f32 %v4321_v26, %v1221_v13  ;;  %v1222_v23 = vadd.f32 2.0, %v4325_v9  ;;  %v6791_v13 = vld [vmem:[#allocation2 + $0x5d8] sm:$0xff] }
 0x224   :  { %v4329_v55 = vpop.eup %4328  ;;  %v3264_v63 = vmul.f32 %v6666_v11, %v2752_v46  ;;  %v2754_v21 = vmul.f32 %v4319_v59, %v2498_v3  ;;  %v2499_v51 = vsub.f32 2.0, %v2243_v47  ;;  %v1223_v60 = vadd.f32 2.0, %v4327_v2 }
 0x225   :  { %v4331_v20 = vpop.eup %4330  ;;  %3519 = vst [vmem:[#allocation5 + $0x540] sm:$0xff] %v3263_v1  ;;  %v3265_v57 = vmul.f32 %v6678_v22, %v2753_v29  ;;  %v6731_v54 = vadd.f32 2.0, %v1477_v61  ;;  %v6734_v17 = vmul.f32 %v1477_v61, %v6647_v16  ;;  %v1478_v53 = vmul.f32 %v4325_v9, %v1222_v23 }
 0x226   :  { %v4333_v18 = vpop.eup %4332  ;;  %3520 = vst [vmem:[#allocation5 + $0x548] sm:$0xff] %v3264_v63  ;;  %v3266_v40 = vmul.f32 %v6686_v42, %v2754_v21  ;;  %v2755_v31 = vmul.f32 %v4323_v14, %v2499_v51  ;;  %v1479_v12 = vmul.f32 %v4327_v2, %v1223_v60  ;;  %v1224_v11 = vadd.f32 2.0, %v4329_v55  ;;  %v6804_v21 = vld [vmem:[#allocation2 + $0x5e8] sm:$0xff]  ;;  %v6806_v51 = vld [vmem:[#allocation2 + $0x5f0] sm:$0xff] }
 0x227   :  { %v4335_v30 = vpop.eup %4334  ;;  %3521 = vst [vmem:[#allocation5 + $0x550] sm:$0xff] %v3265_v57  ;;  %4340 = vrcp.f32 %v6731_v54  ;;  %v6738_v39 = vadd.f32 2.0, %v1478_v53  ;;  %v6741_v22 = vmul.f32 %v1478_v53, %v6668_v5  ;;  %v1225_v32 = vadd.f32 2.0, %v4331_v20  ;;  %v6752_v5 = vld [vmem:[#allocation2 + $0x5b8] sm:$0xff] }
 0x228   :  { %3522 = vst [vmem:[#allocation5 + $0x558] sm:$0xff] %v3266_v40  ;;  %v3267_v16 = vmul.f32 %v6698_v36, %v2755_v31  ;;  %v6744_v45 = vadd.f32 2.0, %v1479_v12  ;;  %v6747_v42 = vmul.f32 %v1479_v12, %v6670_v7  ;;  %v1480_v24 = vmul.f32 %v4329_v55, %v1224_v11 }
 0x229   :  { %v4337_v33 = vpop.eup %4336  ;;  %4342 = vrcp.f32 %v6738_v39  ;;  %v1481_v6 = vmul.f32 %v4331_v20, %v1225_v32  ;;  %v1226_v27 = vadd.f32 2.0, %v4333_v18  ;;  %v1227_v49 = vadd.f32 2.0, %v4335_v30 }
 0x22a   :  { %3523 = vst [vmem:[#allocation5 + $0x560] sm:$0xff] %v3267_v16  ;;  %4344 = vrcp.f32 %v6744_v45  ;;  %v6755_v36 = vadd.f32 2.0, %v1480_v24  ;;  %v6758_v38 = vmul.f32 %v1480_v24, %v6672_v0  ;;  %v1228_v7 = vadd.f32 2.0, %v4337_v33 }
 0x22b   :  { %v6760_v4 = vadd.f32 2.0, %v1481_v6  ;;  %v6763_v8 = vmul.f32 %v1481_v6, %v6682_v50  ;;  %v1482_v10 = vmul.f32 %v4333_v18, %v1226_v27  ;;  %v1483_v25 = vmul.f32 %v4335_v30, %v1227_v49  ;;  %v6775_v50 = vld [vmem:[#allocation2 + $0x5c0] sm:$0xff]  ;;  %v6809_v18 = vld [vmem:[#allocation2 + $0x5f8] sm:$0xff] }
 0x22c   :  { %v4339_v59 = vpop.eup %4338  ;;  %4346 = vrcp.f32 %v6755_v36  ;;  %v1484_v56 = vmul.f32 %v4337_v33, %v1228_v7  ;;  %v461_v58 = vmin.f32 %v6750_v62, 20.0  ;;  %v462_v15 = vmin.f32 %v6752_v5, 20.0 }
 0x22d   :  { %v2244_v26 = vmul.f32 %v4339_v59, %v6721_v43  ;;  %4348 = vrcp.f32 %v6760_v4  ;;  %v6770_v0 = vadd.f32 2.0, %v1482_v10  ;;  %v6773_v44 = vmul.f32 %v1482_v10, %v6692_v48  ;;  %v6793_v48 = vld [vmem:[#allocation2 + $0x5e0] sm:$0xff] }
 0x22e   :  { %v6781_v14 = vadd.f32 2.0, %v1483_v25  ;;  %v6784_v52 = vmul.f32 %v1483_v25, %v6701_v41  ;;  %v6786_v37 = vadd.f32 2.0, %v1484_v56  ;;  %v6789_v43 = vmul.f32 %v1484_v56, %v6703_v28 }
 0x22f   :  { %v2500_v9 = vsub.f32 2.0, %v2244_v26  ;;  %4350 = vrcp.f32 %v6770_v0  ;;  %v899_v46 = vmul.f32 1.442695, %v461_v58  ;;  %v901_v3 = vmul.f32 1.442695, %v462_v15 }
 0x230   :  { %4352 = vrcp.f32 %v6781_v14  ;;  %v463_v47 = vmin.f32 %v6775_v50, 20.0  ;;  %v464_v41 = vmin.f32 %v6777_v19, 20.0  ;;  %v465_v2 = vmin.f32 %v6779_v35, 20.0 }
 0x231   :  { %v4341_v1 = vpop.eup %4340  ;;  %v2756_v28 = vmul.f32 %v4339_v59, %v2500_v9  ;;  %4354 = vrcp.f32 %v6786_v37  ;;  %v466_v29 = vmin.f32 %v6791_v13, 20.0  ;;  %v467_v61 = vmin.f32 %v6793_v48, 20.0 }
 0x232   :  { %v2245_v23 = vmul.f32 %v4341_v1, %v6731_v54  ;;  %4356 = vpow2.f32 %v899_v46  ;;  %v903_v55 = vmul.f32 1.442695, %v463_v47  ;;  %v905_v63 = vmul.f32 1.442695, %v464_v41 }
 0x233   :  { %v4343_v60 = vpop.eup %4342  ;;  %v3268_v20 = vmul.f32 %v6724_v34, %v2756_v28  ;;  %4358 = vpow2.f32 %v901_v3  ;;  %v907_v57 = vmul.f32 1.442695, %v465_v2  ;;  %v909_v53 = vmul.f32 1.442695, %v466_v29  ;;  %v6821_v3 = vld [vmem:[#allocation2 + $0x600] sm:$0xff] }
 0x234   :  { %v4345_v40 = vpop.eup %4344  ;;  %v2501_v31 = vsub.f32 2.0, %v2245_v23  ;;  %v2246_v12 = vmul.f32 %v4343_v60, %v6738_v39  ;;  %4360 = vpow2.f32 %v903_v55  ;;  %v911_v54 = vmul.f32 1.442695, %v467_v61 }
 0x235   :  { %3524 = vst [vmem:[#allocation5 + $0x568] sm:$0xff] %v3268_v20  ;;  %v2247_v11 = vmul.f32 %v4345_v40, %v6744_v45  ;;  %4362 = vpow2.f32 %v905_v63  ;;  %v468_v30 = vmin.f32 %v6804_v21, 20.0  ;;  %v469_v32 = vmin.f32 %v6806_v51, 20.0 }
 0x236   :  { %v4347_v34 = vpop.eup %4346  ;;  %v2757_v16 = vmul.f32 %v4341_v1, %v2501_v31  ;;  %v2502_v24 = vsub.f32 2.0, %v2246_v12  ;;  %4364 = vpow2.f32 %v907_v57  ;;  %v470_v33 = vmin.f32 %v6809_v18, 20.0 }
 0x237   :  { %v4349_v6 = vpop.eup %4348  ;;  %v2503_v27 = vsub.f32 2.0, %v2247_v11  ;;  %v2248_v39 = vmul.f32 %v4347_v34, %v6755_v36  ;;  %4366 = vpow2.f32 %v909_v53  ;;  %v913_v49 = vmul.f32 1.442695, %v468_v30 }
 0x238   :  { %v3269_v7 = vmul.f32 %v6734_v17, %v2757_v16  ;;  %v2758_v45 = vmul.f32 %v4343_v60, %v2502_v24  ;;  %v2249_v10 = vmul.f32 %v4349_v6, %v6760_v4  ;;  %4368 = vpow2.f32 %v911_v54 }
 0x239   :  { %v4351_v25 = vpop.eup %4350  ;;  %v2759_v59 = vmul.f32 %v4345_v40, %v2503_v27  ;;  %v2504_v56 = vsub.f32 2.0, %v2248_v39  ;;  %4370 = vpow2.f32 %v913_v49  ;;  %v915_v58 = vmul.f32 1.442695, %v469_v32 }
 0x23a   :  { %v4353_v15 = vpop.eup %4352  ;;  %3525 = vst [vmem:[#allocation5 + $0x570] sm:$0xff] %v3269_v7  ;;  %v3270_v26 = vmul.f32 %v6741_v22, %v2758_v45  ;;  %v2505_v9 = vsub.f32 2.0, %v2249_v10  ;;  %v2250_v36 = vmul.f32 %v4351_v25, %v6770_v0  ;;  %v917_v46 = vmul.f32 1.442695, %v470_v33  ;;  %v6850_v45 = vld [vmem:[#allocation2 + $0x608] sm:$0xff] }
 0x23b   :  { %v4355_v17 = vpop.eup %4354  ;;  %v3271_v47 = vmul.f32 %v6747_v42, %v2759_v59  ;;  %v2760_v4 = vmul.f32 %v4347_v34, %v2504_v56  ;;  %v2251_v41 = vmul.f32 %v4353_v15, %v6781_v14  ;;  %4372 = vpow2.f32 %v915_v58 }
 0x23c   :  { %v4357_v2 = vpop.eup %4356  ;;  %3526 = vst [vmem:[#allocation5 + $0x578] sm:$0xff] %v3270_v26  ;;  %v2761_v1 = vmul.f32 %v4349_v6, %v2505_v9  ;;  %v2506_v28 = vsub.f32 2.0, %v2250_v36  ;;  %v2252_v29 = vmul.f32 %v4355_v17, %v6786_v37  ;;  %4374 = vpow2.f32 %v917_v46 }
 0x23d   :  { %v4359_v22 = vpop.eup %4358  ;;  %3527 = vst [vmem:[#allocation5 + $0x580] sm:$0xff] %v3271_v47  ;;  %v3272_v0 = vmul.f32 %v6758_v38, %v2760_v4  ;;  %v2507_v61 = vsub.f32 2.0, %v2251_v41  ;;  %v1229_v23 = vadd.f32 2.0, %v4357_v2  ;;  %v471_v55 = vmin.f32 %v6821_v3, 20.0 }
 0x23e   :  { %v4361_v42 = vpop.eup %4360  ;;  %v3273_v63 = vmul.f32 %v6763_v8, %v2761_v1  ;;  %v2762_v14 = vmul.f32 %v4351_v25, %v2506_v28  ;;  %v2508_v60 = vsub.f32 2.0, %v2252_v29  ;;  %v1230_v20 = vadd.f32 2.0, %v4359_v22  ;;  %v6871_v1 = vld [vmem:[#allocation2 + $0x610] sm:$0xff] }
 0x23f   :  { %v4363_v57 = vpop.eup %4362  ;;  %3528 = vst [vmem:[#allocation5 + $0x588] sm:$0xff] %v3272_v0  ;;  %v2763_v53 = vmul.f32 %v4353_v15, %v2507_v61  ;;  %v1485_v40 = vmul.f32 %v4357_v2, %v1229_v23  ;;  %v1231_v37 = vadd.f32 2.0, %v4361_v42  ;;  %v6829_v31 = vmul.f32 1.442695, %v471_v55  ;;  %v6883_v0 = vld [vmem:[#allocation2 + $0x620] sm:$0xff]  ;;  %v6885_v61 = vld [vmem:[#allocation2 + $0x628] sm:$0xff] }
 0x240   :  { %v4365_v12 = vpop.eup %4364  ;;  %3529 = vst [vmem:[#allocation5 + $0x590] sm:$0xff] %v3273_v63  ;;  %v3274_v38 = vmul.f32 %v6773_v44, %v2762_v14  ;;  %v2764_v54 = vmul.f32 %v4355_v17, %v2508_v60  ;;  %v1486_v11 = vmul.f32 %v4359_v22, %v1230_v20  ;;  %v1232_v30 = vadd.f32 2.0, %v4363_v57  ;;  %v6881_v22 = vld [vmem:[#allocation2 + $0x618] sm:$0xff]  ;;  %v6902_v20 = vld [vmem:[#allocation2 + $0x630] sm:$0xff] }
 0x241   :  { %v4367_v32 = vpop.eup %4366  ;;  %v3275_v8 = vmul.f32 %v6784_v52, %v2763_v53  ;;  %v6833_v34 = vadd.f32 2.0, %v1485_v40  ;;  %v6836_v16 = vmul.f32 %v1485_v40, %v6750_v62  ;;  %v1487_v24 = vmul.f32 %v4361_v42, %v1231_v37  ;;  %v6910_v37 = vld [vmem:[#allocation2 + $0x638] sm:$0xff] }
 0x242   :  { %v4369_v33 = vpop.eup %4368  ;;  %3530 = vst [vmem:[#allocation5 + $0x598] sm:$0xff] %v3274_v38  ;;  %v3276_v6 = vmul.f32 %v6789_v43, %v2764_v54  ;;  %v6839_v27 = vadd.f32 2.0, %v1486_v11  ;;  %v6842_v44 = vmul.f32 %v1486_v11, %v6752_v5  ;;  %v1488_v39 = vmul.f32 %v4363_v57, %v1232_v30 }
 0x243   :  { %v4371_v49 = vpop.eup %4370  ;;  %3531 = vst [vmem:[#allocation5 + $0x5a0] sm:$0xff] %v3275_v8  ;;  %4376 = vrcp.f32 %v6833_v34  ;;  %v6845_v52 = vadd.f32 2.0, %v1487_v24  ;;  %v6848_v62 = vmul.f32 %v1487_v24, %v6775_v50  ;;  %v1233_v7 = vadd.f32 2.0, %v4365_v12 }
 0x244   :  { %3532 = vst [vmem:[#allocation5 + $0x5a8] sm:$0xff] %v3276_v6  ;;  %4378 = vrcp.f32 %v6839_v27  ;;  %v6853_v43 = vadd.f32 2.0, %v1488_v39  ;;  %v6856_v5 = vmul.f32 %v1488_v39, %v6777_v19  ;;  %v1234_v10 = vadd.f32 2.0, %v4367_v32 }
 0x245   :  { %v4373_v25 = vpop.eup %4372  ;;  %4380 = vrcp.f32 %v6845_v52  ;;  %v1489_v59 = vmul.f32 %v4365_v12, %v1233_v7  ;;  %v1235_v56 = vadd.f32 2.0, %v4369_v33  ;;  %v1236_v58 = vadd.f32 2.0, %v4371_v49 }
 0x246   :  { %v4375_v50 = vpop.eup %4374  ;;  %4382 = vrcp.f32 %v6853_v43  ;;  %v1490_v15 = vmul.f32 %v4367_v32, %v1234_v10  ;;  %v1237_v26 = vadd.f32 2.0, %v4373_v25  ;;  %v472_v9 = vmin.f32 %v6850_v45, 20.0 }
 0x247   :  { %v6861_v36 = vadd.f32 2.0, %v1489_v59  ;;  %v6864_v46 = vmul.f32 %v1489_v59, %v6779_v35  ;;  %v1491_v19 = vmul.f32 %v4369_v33, %v1235_v56  ;;  %v1492_v17 = vmul.f32 %v4371_v49, %v1236_v58 }
 0x248   :  { %v6866_v47 = vadd.f32 2.0, %v1490_v15  ;;  %v6869_v4 = vmul.f32 %v1490_v15, %v6791_v13  ;;  %v1493_v41 = vmul.f32 %v4373_v25, %v1237_v26  ;;  %v1238_v2 = vadd.f32 2.0, %v4375_v50 }
 0x249   :  { %4384 = vrcp.f32 %v6861_v36  ;;  %v6874_v28 = vadd.f32 2.0, %v1491_v19  ;;  %v6877_v29 = vmul.f32 %v1491_v19, %v6793_v48  ;;  %v6879_v35 = vadd.f32 2.0, %v1492_v17 }
 0x24a   :  { %4386 = vrcp.f32 %v6866_v47  ;;  %v6889_v13 = vmul.f32 %v1492_v17, %v6804_v21  ;;  %v6891_v23 = vadd.f32 2.0, %v1493_v41  ;;  %v6894_v55 = vmul.f32 %v1493_v41, %v6806_v51 }
 0x24b   :  { %4388 = vrcp.f32 %v6874_v28  ;;  %v1494_v48 = vmul.f32 %v4375_v50, %v1238_v2  ;;  %v921_v42 = vmul.f32 1.442695, %v472_v9  ;;  %v473_v63 = vmin.f32 %v6871_v1, 20.0  ;;  %v6927_v2 = vld [vmem:[#allocation2 + $0x648] sm:$0xff] }
 0x24c   :  { %4390 = vrcp.f32 %v6879_v35  ;;  %v474_v14 = vmin.f32 %v6881_v22, 20.0  ;;  %v475_v60 = vmin.f32 %v6883_v0, 20.0  ;;  %v476_v21 = vmin.f32 %v6885_v61, 20.0 }
 0x24d   :  { %v4377_v57 = vpop.eup %4376  ;;  %4392 = vrcp.f32 %v6891_v23  ;;  %v6905_v51 = vadd.f32 2.0, %v1494_v48  ;;  %v6908_v53 = vmul.f32 %v1494_v48, %v6809_v18  ;;  %v923_v40 = vmul.f32 1.442695, %v473_v63 }
 0x24e   :  { %v4379_v12 = vpop.eup %4378  ;;  %v2253_v38 = vmul.f32 %v4377_v57, %v6833_v34  ;;  %4394 = vpow2.f32 %v6829_v31  ;;  %v925_v54 = vmul.f32 1.442695, %v474_v14  ;;  %v927_v11 = vmul.f32 1.442695, %v475_v60  ;;  %v6919_v34 = vld [vmem:[#allocation2 + $0x640] sm:$0xff] }
 0x24f   :  { %v4381_v30 = vpop.eup %4380  ;;  %v2254_v32 = vmul.f32 %v4379_v12, %v6839_v27  ;;  %4396 = vrcp.f32 %v6905_v51  ;;  %v929_v8 = vmul.f32 1.442695, %v476_v21  ;;  %v477_v24 = vmin.f32 %v6902_v20, 20.0 }
 0x250   :  { %v4383_v18 = vpop.eup %4382  ;;  %v2509_v33 = vsub.f32 2.0, %v2253_v38  ;;  %v2255_v6 = vmul.f32 %v4381_v30, %v6845_v52  ;;  %4398 = vpow2.f32 %v921_v42  ;;  %v478_v39 = vmin.f32 %v6910_v37, 20.0 }
 0x251   :  { %v2510_v31 = vsub.f32 2.0, %v2254_v32  ;;  %v2256_v49 = vmul.f32 %v4383_v18, %v6853_v43  ;;  %4400 = vpow2.f32 %v923_v40  ;;  %v931_v7 = vmul.f32 1.442695, %v477_v24 }
 0x252   :  { %v2765_v27 = vmul.f32 %v4377_v57, %v2509_v33  ;;  %v2511_v10 = vsub.f32 2.0, %v2255_v6  ;;  %4402 = vpow2.f32 %v925_v54  ;;  %v933_v25 = vmul.f32 1.442695, %v478_v39 }
 0x253   :  { %v4385_v59 = vpop.eup %4384  ;;  %v2766_v56 = vmul.f32 %v4379_v12, %v2510_v31  ;;  %v2512_v58 = vsub.f32 2.0, %v2256_v49  ;;  %4404 = vpow2.f32 %v927_v11  ;;  %v479_v52 = vmin.f32 %v6919_v34, 20.0 }
 0x254   :  { %v4387_v50 = vpop.eup %4386  ;;  %v3277_v15 = vmul.f32 %v6836_v16, %v2765_v27  ;;  %v2767_v26 = vmul.f32 %v4381_v30, %v2511_v10  ;;  %v2257_v9 = vmul.f32 %v4385_v59, %v6861_v36  ;;  %4406 = vpow2.f32 %v929_v8 }
 0x255   :  { %v4389_v43 = vpop.eup %4388  ;;  %v3278_v19 = vmul.f32 %v6842_v44, %v2766_v56  ;;  %v2768_v17 = vmul.f32 %v4383_v18, %v2512_v58  ;;  %v2258_v41 = vmul.f32 %v4387_v50, %v6866_v47  ;;  %4408 = vpow2.f32 %v931_v7 }
 0x256   :  { %v4391_v48 = vpop.eup %4390  ;;  %3533 = vst [vmem:[#allocation5 + $0x5b0] sm:$0xff] %v3277_v15  ;;  %v3279_v42 = vmul.f32 %v6848_v62, %v2767_v26  ;;  %v2513_v63 = vsub.f32 2.0, %v2257_v9  ;;  %v2259_v16 = vmul.f32 %v4389_v43, %v6874_v28  ;;  %4410 = vpow2.f32 %v933_v25 }
 0x257   :  { %v4393_v14 = vpop.eup %4392  ;;  %3534 = vst [vmem:[#allocation5 + $0x5b8] sm:$0xff] %v3278_v19  ;;  %v3280_v36 = vmul.f32 %v6856_v5, %v2768_v17  ;;  %v2514_v60 = vsub.f32 2.0, %v2258_v41  ;;  %v2260_v44 = vmul.f32 %v4391_v48, %v6879_v35  ;;  %v935_v21 = vmul.f32 1.442695, %v479_v52 }
 0x258   :  { %v4395_v47 = vpop.eup %4394  ;;  %3535 = vst [vmem:[#allocation5 + $0x5c0] sm:$0xff] %v3279_v42  ;;  %v2769_v57 = vmul.f32 %v4385_v59, %v2513_v63  ;;  %v2515_v40 = vsub.f32 2.0, %v2259_v16  ;;  %v2261_v12 = vmul.f32 %v4393_v14, %v6891_v23  ;;  %v480_v62 = vmin.f32 %v6927_v2, 20.0 }
 0x259   :  { %v4397_v38 = vpop.eup %4396  ;;  %3536 = vst [vmem:[#allocation5 + $0x5c8] sm:$0xff] %v3280_v36  ;;  %v2770_v28 = vmul.f32 %v4387_v50, %v2514_v60  ;;  %v2516_v54 = vsub.f32 2.0, %v2260_v44  ;;  %v1239_v11 = vadd.f32 2.0, %v4395_v47  ;;  %4412 = vpow2.f32 %v935_v21 }
 0x25a   :  { %v4399_v30 = vpop.eup %4398  ;;  %v3281_v5 = vmul.f32 %v6864_v46, %v2769_v57  ;;  %v2771_v32 = vmul.f32 %v4389_v43, %v2515_v40  ;;  %v2517_v35 = vsub.f32 2.0, %v2261_v12  ;;  %v2262_v8 = vmul.f32 %v4397_v38, %v6905_v51  ;;  %v6977_v57 = vld [vmem:[#allocation2 + $0x660] sm:$0xff] }
 0x25b   :  { %v4401_v24 = vpop.eup %4400  ;;  %v3282_v18 = vmul.f32 %v6869_v4, %v2770_v28  ;;  %v2772_v33 = vmul.f32 %v4391_v48, %v2516_v54  ;;  %v1495_v23 = vmul.f32 %v4395_v47, %v1239_v11  ;;  %v1240_v6 = vadd.f32 2.0, %v4399_v30  ;;  %v6973_v47 = vld [vmem:[#allocation2 + $0x650] sm:$0xff] }
 0x25c   :  { %v4403_v39 = vpop.eup %4402  ;;  %3537 = vst [vmem:[#allocation5 + $0x5d0] sm:$0xff] %v3281_v5  ;;  %v3283_v31 = vmul.f32 %v6877_v29, %v2771_v32  ;;  %v2773_v49 = vmul.f32 %v4393_v14, %v2517_v35  ;;  %v2518_v7 = vsub.f32 2.0, %v2262_v8  ;;  %v1241_v27 = vadd.f32 2.0, %v4401_v24  ;;  %v7001_v32 = vld [vmem:[#allocation2 + $0x670] sm:$0xff]  ;;  %v7010_v8 = vld [vmem:[#allocation2 + $0x678] sm:$0xff] }
 0x25d   :  { %v4405_v10 = vpop.eup %4404  ;;  %3538 = vst [vmem:[#allocation5 + $0x5d8] sm:$0xff] %v3282_v18  ;;  %v3284_v46 = vmul.f32 %v6889_v13, %v2772_v33  ;;  %v6940_v25 = vadd.f32 2.0, %v1495_v23  ;;  %v6943_v51 = vmul.f32 %v1495_v23, %v6821_v3  ;;  %v1496_v4 = vmul.f32 %v4399_v30, %v1240_v6  ;;  %v7014_v18 = vld [vmem:[#allocation2 + $0x688] sm:$0xff] }
 0x25e   :  { %v4407_v59 = vpop.eup %4406  ;;  %3539 = vst [vmem:[#allocation5 + $0x5e0] sm:$0xff] %v3283_v31  ;;  %v3285_v56 = vmul.f32 %v6894_v55, %v2773_v49  ;;  %v2774_v58 = vmul.f32 %v4397_v38, %v2518_v7  ;;  %v1497_v52 = vmul.f32 %v4401_v24, %v1241_v27  ;;  %v1242_v29 = vadd.f32 2.0, %v4403_v39  ;;  %v6987_v38 = vld [vmem:[#allocation2 + $0x668] sm:$0xff]  ;;  %v7012_v24 = vld [vmem:[#allocation2 + $0x680] sm:$0xff] }
 0x25f   :  { %v4409_v50 = vpop.eup %4408  ;;  %3540 = vst [vmem:[#allocation5 + $0x5e8] sm:$0xff] %v3284_v46  ;;  %4414 = vrcp.f32 %v6940_v25  ;;  %v6947_v15 = vadd.f32 2.0, %v1496_v4  ;;  %v6950_v13 = vmul.f32 %v1496_v4, %v6850_v45  ;;  %v1243_v26 = vadd.f32 2.0, %v4405_v10 }
 0x260   :  { %v4411_v3 = vpop.eup %4410  ;;  %3541 = vst [vmem:[#allocation5 + $0x5f0] sm:$0xff] %v3285_v56  ;;  %v3286_v9 = vmul.f32 %v6908_v53, %v2774_v58  ;;  %v6953_v43 = vadd.f32 2.0, %v1497_v52  ;;  %v6956_v55 = vmul.f32 %v1497_v52, %v6871_v1  ;;  %v1498_v19 = vmul.f32 %v4403_v39, %v1242_v29 }
 0x261   :  { %4416 = vrcp.f32 %v6947_v15  ;;  %v1499_v17 = vmul.f32 %v4405_v10, %v1243_v26  ;;  %v1244_v41 = vadd.f32 2.0, %v4407_v59  ;;  %v1245_v48 = vadd.f32 2.0, %v4409_v50 }
 0x262   :  { %3542 = vst [vmem:[#allocation5 + $0x5f8] sm:$0xff] %v3286_v9  ;;  %4418 = vrcp.f32 %v6953_v43  ;;  %v6960_v45 = vadd.f32 2.0, %v1498_v19  ;;  %v6963_v42 = vmul.f32 %v1498_v19, %v6881_v22  ;;  %v1246_v53 = vadd.f32 2.0, %v4411_v3  ;;  %v6975_v22 = vld [vmem:[#allocation2 + $0x658] sm:$0xff] }
 0x263   :  { %v4413_v63 = vpop.eup %4412  ;;  %v6965_v16 = vadd.f32 2.0, %v1499_v17  ;;  %v6968_v1 = vmul.f32 %v1499_v17, %v6883_v0  ;;  %v1500_v14 = vmul.f32 %v4407_v59, %v1244_v41  ;;  %v1501_v36 = vmul.f32 %v4409_v50, %v1245_v48 }
 0x264   :  { %4420 = vrcp.f32 %v6960_v45  ;;  %v1502_v60 = vmul.f32 %v4411_v3, %v1246_v53  ;;  %v1247_v44 = vadd.f32 2.0, %v4413_v63  ;;  %v937_v21 = vmul.f32 1.442695, %v480_v62 }
 0x265   :  { %4422 = vrcp.f32 %v6965_v16  ;;  %v6980_v40 = vadd.f32 2.0, %v1500_v14  ;;  %v6983_v0 = vmul.f32 %v1500_v14, %v6885_v61  ;;  %v6985_v12 = vadd.f32 2.0, %v1501_v36 }
 0x266   :  { %v6990_v28 = vmul.f32 %v1501_v36, %v6902_v20  ;;  %v6992_v62 = vadd.f32 2.0, %v1502_v60  ;;  %v6995_v54 = vmul.f32 %v1502_v60, %v6910_v37  ;;  %v1503_v11 = vmul.f32 %v4413_v63, %v1247_v44 }
 0x267   :  { %4424 = vrcp.f32 %v6980_v40  ;;  %v481_v30 = vmin.f32 %v6973_v47, 20.0  ;;  %v482_v61 = vmin.f32 %v6975_v22, 20.0  ;;  %v483_v5 = vmin.f32 %v6977_v57, 20.0 }
 0x268   :  { %4426 = vrcp.f32 %v6985_v12  ;;  %v7004_v20 = vadd.f32 2.0, %v1503_v11  ;;  %v7007_v35 = vmul.f32 %v1503_v11, %v6919_v34  ;;  %v484_v37 = vmin.f32 %v6987_v38, 20.0 }
 0x269   :  { %v4415_v33 = vpop.eup %4414  ;;  %4428 = vrcp.f32 %v6992_v62  ;;  %v939_v23 = vmul.f32 1.442695, %v481_v30  ;;  %v941_v6 = vmul.f32 1.442695, %v482_v61  ;;  %v943_v39 = vmul.f32 1.442695, %v483_v5 }
 0x26a   :  { %v2263_v31 = vmul.f32 %v4415_v33, %v6940_v25  ;;  %4430 = vrcp.f32 %v7004_v20  ;;  %v945_v34 = vmul.f32 1.442695, %v484_v37  ;;  %v485_v49 = vmin.f32 %v7001_v32, 20.0  ;;  %v7024_v25 = vld [vmem:[#allocation2 + $0x690] sm:$0xff]  ;;  %v7033_v61 = vld [vmem:[#allocation2 + $0x698] sm:$0xff] }
 0x26b   :  { %v4417_v7 = vpop.eup %4416  ;;  %4432 = vpow2.f32 %v937_v21  ;;  %v486_v27 = vmin.f32 %v7010_v8, 20.0  ;;  %v487_v10 = vmin.f32 %v7012_v24, 20.0  ;;  %v488_v46 = vmin.f32 %v7014_v18, 20.0 }
 0x26c   :  { %v4419_v4 = vpop.eup %4418  ;;  %v2519_v59 = vsub.f32 2.0, %v2263_v31  ;;  %v2264_v56 = vmul.f32 %v4417_v7, %v6947_v15  ;;  %4434 = vpow2.f32 %v939_v23  ;;  %v947_v58 = vmul.f32 1.442695, %v485_v49 }
 0x26d   :  { %v2265_v52 = vmul.f32 %v4419_v4, %v6953_v43  ;;  %4436 = vpow2.f32 %v941_v6  ;;  %v949_v29 = vmul.f32 1.442695, %v486_v27  ;;  %v951_v50 = vmul.f32 1.442695, %v487_v10 }
 0x26e   :  { %v4421_v26 = vpop.eup %4420  ;;  %v2775_v3 = vmul.f32 %v4415_v33, %v2519_v59  ;;  %v2520_v9 = vsub.f32 2.0, %v2264_v56  ;;  %4438 = vpow2.f32 %v943_v39  ;;  %v953_v19 = vmul.f32 1.442695, %v488_v46 }
 0x26f   :  { %v4423_v17 = vpop.eup %4422  ;;  %v2521_v41 = vsub.f32 2.0, %v2265_v52  ;;  %v2266_v48 = vmul.f32 %v4421_v26, %v6960_v45  ;;  %4440 = vpow2.f32 %v945_v34  ;;  %v489_v15 = vmin.f32 %v7024_v25, 20.0 }
 0x270   :  { %v3287_v53 = vmul.f32 %v6943_v51, %v2775_v3  ;;  %v2776_v63 = vmul.f32 %v4417_v7, %v2520_v9  ;;  %v2267_v43 = vmul.f32 %v4423_v17, %v6965_v16  ;;  %4442 = vpow2.f32 %v947_v58 }
 0x271   :  { %v4425_v14 = vpop.eup %4424  ;;  %v2777_v36 = vmul.f32 %v4419_v4, %v2521_v41  ;;  %v2522_v60 = vsub.f32 2.0, %v2266_v48  ;;  %4444 = vpow2.f32 %v949_v29  ;;  %v955_v44 = vmul.f32 1.442695, %v489_v15 }
 0x272   :  { %v4427_v21 = vpop.eup %4426  ;;  %3543 = vst [vmem:[#allocation5 + $0x600] sm:$0xff] %v3287_v53  ;;  %v3288_v11 = vmul.f32 %v6950_v13, %v2776_v63  ;;  %v2523_v30 = vsub.f32 2.0, %v2267_v43  ;;  %v2268_v45 = vmul.f32 %v4425_v14, %v6980_v40  ;;  %4446 = vpow2.f32 %v951_v50 }
 0x273   :  { %v4429_v51 = vpop.eup %4428  ;;  %v3289_v5 = vmul.f32 %v6956_v55, %v2777_v36  ;;  %v2778_v16 = vmul.f32 %v4421_v26, %v2522_v60  ;;  %v2269_v37 = vmul.f32 %v4427_v21, %v6985_v12  ;;  %4448 = vpow2.f32 %v953_v19 }
 0x274   :  { %v4431_v33 = vpop.eup %4430  ;;  %3544 = vst [vmem:[#allocation5 + $0x608] sm:$0xff] %v3288_v11  ;;  %v2779_v23 = vmul.f32 %v4423_v17, %v2523_v30  ;;  %v2524_v6 = vsub.f32 2.0, %v2268_v45  ;;  %v2270_v39 = vmul.f32 %v4429_v51, %v6992_v62  ;;  %4450 = vpow2.f32 %v955_v44 }
 0x275   :  { %v4433_v13 = vpop.eup %4432  ;;  %3545 = vst [vmem:[#allocation5 + $0x610] sm:$0xff] %v3289_v5  ;;  %v3290_v40 = vmul.f32 %v6963_v42, %v2778_v16  ;;  %v2525_v31 = vsub.f32 2.0, %v2269_v37  ;;  %v2271_v34 = vmul.f32 %v4431_v33, %v7004_v20  ;;  %v490_v55 = vmin.f32 %v7033_v61, 20.0 }
 0x276   :  { %v4435_v49 = vpop.eup %4434  ;;  %v3291_v12 = vmul.f32 %v6968_v1, %v2779_v23  ;;  %v2780_v7 = vmul.f32 %v4425_v14, %v2524_v6  ;;  %v2526_v27 = vsub.f32 2.0, %v2270_v39  ;;  %v1248_v10 = vadd.f32 2.0, %v4433_v13 }
 0x277   :  { %v4437_v46 = vpop.eup %4436  ;;  %3546 = vst [vmem:[#allocation5 + $0x618] sm:$0xff] %v3290_v40  ;;  %v2781_v4 = vmul.f32 %v4427_v21, %v2525_v31  ;;  %v2527_v62 = vsub.f32 2.0, %v2271_v34  ;;  %v1249_v59 = vadd.f32 2.0, %v4435_v49  ;;  %v7042_v56 = vmul.f32 1.442695, %v490_v55  ;;  %v7082_v40 = vld [vmem:[#allocation2 + $0x6a0] sm:$0xff] }
 0x278   :  { %v4439_v58 = vpop.eup %4438  ;;  %3547 = vst [vmem:[#allocation5 + $0x620] sm:$0xff] %v3291_v12  ;;  %v3292_v42 = vmul.f32 %v6983_v0, %v2780_v7  ;;  %v2782_v20 = vmul.f32 %v4429_v51, %v2526_v27  ;;  %v1504_v52 = vmul.f32 %v4433_v13, %v1248_v10  ;;  %v1250_v29 = vadd.f32 2.0, %v4437_v46  ;;  %v7092_v55 = vld [vmem:[#allocation2 + $0x6a8] sm:$0xff]  ;;  %v7096_v12 = vld [vmem:[#allocation2 + $0x6b8] sm:$0xff] }
 0x279   :  { %v4441_v50 = vpop.eup %4440  ;;  %v3293_v1 = vmul.f32 %v6990_v28, %v2781_v4  ;;  %v2783_v26 = vmul.f32 %v4431_v33, %v2527_v62  ;;  %v1505_v3 = vmul.f32 %v4435_v49, %v1249_v59  ;;  %v1251_v9 = vadd.f32 2.0, %v4439_v58  ;;  %v7094_v49 = vld [vmem:[#allocation2 + $0x6b0] sm:$0xff]  ;;  %v7109_v10 = vld [vmem:[#allocation2 + $0x6c8] sm:$0xff] }
 0x27a   :  { %v4443_v19 = vpop.eup %4442  ;;  %3548 = vst [vmem:[#allocation5 + $0x628] sm:$0xff] %v3292_v42  ;;  %v3294_v17 = vmul.f32 %v6995_v54, %v2782_v20  ;;  %v7047_v41 = vadd.f32 2.0, %v1504_v52  ;;  %v7050_v48 = vmul.f32 %v1504_v52, %v6927_v2  ;;  %v1506_v15 = vmul.f32 %v4437_v46, %v1250_v29 }
 0x27b   :  { %v4445_v0 = vpop.eup %4444  ;;  %3549 = vst [vmem:[#allocation5 + $0x630] sm:$0xff] %v3293_v1  ;;  %v3295_v53 = vmul.f32 %v7007_v35, %v2783_v26  ;;  %v7053_v63 = vadd.f32 2.0, %v1505_v3  ;;  %v7056_v28 = vmul.f32 %v1505_v3, %v6973_v47  ;;  %v1507_v43 = vmul.f32 %v4439_v58, %v1251_v9  ;;  %v7127_v26 = vld [vmem:[#allocation2 + $0x6d0] sm:$0xff] }
 0x27c   :  { %v4447_v14 = vpop.eup %4446  ;;  %3550 = vst [vmem:[#allocation5 + $0x638] sm:$0xff] %v3294_v17  ;;  %4452 = vrcp.f32 %v7047_v41  ;;  %v7059_v54 = vadd.f32 2.0, %v1506_v15  ;;  %v7062_v2 = vmul.f32 %v1506_v15, %v6975_v22  ;;  %v1252_v36 = vadd.f32 2.0, %v4441_v50  ;;  %v7131_v15 = vld [vmem:[#allocation2 + $0x6d8] sm:$0xff] }
 0x27d   :  { %v4449_v60 = vpop.eup %4448  ;;  %3551 = vst [vmem:[#allocation5 + $0x640] sm:$0xff] %v3295_v53  ;;  %4454 = vrcp.f32 %v7053_v63  ;;  %v7065_v35 = vadd.f32 2.0, %v1507_v43  ;;  %v7068_v47 = vmul.f32 %v1507_v43, %v6977_v57  ;;  %v1253_v44 = vadd.f32 2.0, %v4443_v19 }
 0x27e   :  { %v4451_v21 = vpop.eup %4450  ;;  %4456 = vrcp.f32 %v7059_v54  ;;  %v1508_v11 = vmul.f32 %v4441_v50, %v1252_v36  ;;  %v1254_v30 = vadd.f32 2.0, %v4445_v0  ;;  %v1255_v45 = vadd.f32 2.0, %v4447_v14 }
 0x27f   :  { %4458 = vrcp.f32 %v7065_v35  ;;  %v1509_v22 = vmul.f32 %v4443_v19, %v1253_v44  ;;  %v1256_v51 = vadd.f32 2.0, %v4449_v60  ;;  %v1257_v5 = vadd.f32 2.0, %v4451_v21 }
 0x280   :  { %v7072_v16 = vadd.f32 2.0, %v1508_v11  ;;  %v7075_v37 = vmul.f32 %v1508_v11, %v6987_v38  ;;  %v1510_v33 = vmul.f32 %v4445_v0, %v1254_v30  ;;  %v1511_v57 = vmul.f32 %v4447_v14, %v1255_v45 }
 0x281   :  { %v7077_v23 = vadd.f32 2.0, %v1509_v22  ;;  %v7080_v6 = vmul.f32 %v1509_v22, %v7001_v32  ;;  %v1512_v39 = vmul.f32 %v4449_v60, %v1256_v51  ;;  %v1513_v13 = vmul.f32 %v4451_v21, %v1257_v5 }
 0x282   :  { %4460 = vrcp.f32 %v7072_v16  ;;  %v7085_v31 = vadd.f32 2.0, %v1510_v33  ;;  %v7088_v34 = vmul.f32 %v1510_v33, %v7010_v8  ;;  %v7090_v38 = vadd.f32 2.0, %v1511_v57  ;;  %v7107_v8 = vld [vmem:[#allocation2 + $0x6c0] sm:$0xff] }
 0x283   :  { %4462 = vrcp.f32 %v7077_v23  ;;  %v7100_v32 = vmul.f32 %v1511_v57, %v7012_v24  ;;  %v7102_v7 = vadd.f32 2.0, %v1512_v39  ;;  %v7105_v27 = vmul.f32 %v1512_v39, %v7014_v18 }
 0x284   :  { %4464 = vrcp.f32 %v7085_v31  ;;  %v7112_v46 = vadd.f32 2.0, %v1513_v13  ;;  %v7115_v4 = vmul.f32 %v1513_v13, %v7024_v25  ;;  %v491_v62 = vmin.f32 %v7082_v40, 20.0  ;;  %v7141_v13 = vld [vmem:[#allocation2 + $0x6e0] sm:$0xff] }
 0x285   :  { %4466 = vrcp.f32 %v7090_v38  ;;  %v492_v24 = vmin.f32 %v7092_v55, 20.0  ;;  %v493_v18 = vmin.f32 %v7094_v49, 20.0  ;;  %v494_v59 = vmin.f32 %v7096_v12, 20.0 }
 0x286   :  { %v4453_v58 = vpop.eup %4452  ;;  %4468 = vrcp.f32 %v7102_v7  ;;  %v959_v42 = vmul.f32 1.442695, %v491_v62  ;;  %v495_v20 = vmin.f32 %v7107_v8, 20.0  ;;  %v496_v52 = vmin.f32 %v7109_v10, 20.0 }
 0x287   :  { %v4455_v25 = vpop.eup %4454  ;;  %v2272_v29 = vmul.f32 %v4453_v58, %v7047_v41  ;;  %4470 = vrcp.f32 %v7112_v46  ;;  %v961_v50 = vmul.f32 1.442695, %v492_v24  ;;  %v963_v1 = vmul.f32 1.442695, %v493_v18 }
 0x288   :  { %v4457_v3 = vpop.eup %4456  ;;  %v2273_v9 = vmul.f32 %v4455_v25, %v7053_v63  ;;  %4472 = vpow2.f32 %v7042_v56  ;;  %v965_v19 = vmul.f32 1.442695, %v494_v59  ;;  %v967_v17 = vmul.f32 1.442695, %v495_v20 }
 0x289   :  { %v4459_v0 = vpop.eup %4458  ;;  %v2528_v53 = vsub.f32 2.0, %v2272_v29  ;;  %v2274_v43 = vmul.f32 %v4457_v3, %v7059_v54  ;;  %4474 = vpow2.f32 %v959_v42  ;;  %v969_v41 = vmul.f32 1.442695, %v496_v52 }
 0x28a   :  { %v2529_v14 = vsub.f32 2.0, %v2273_v9  ;;  %v2275_v36 = vmul.f32 %v4459_v0, %v7065_v35  ;;  %4476 = vpow2.f32 %v961_v50  ;;  %v497_v60 = vmin.f32 %v7127_v26, 20.0 }
 0x28b   :  { %v2784_v44 = vmul.f32 %v4453_v58, %v2528_v53  ;;  %v2530_v63 = vsub.f32 2.0, %v2274_v43  ;;  %4478 = vpow2.f32 %v963_v1  ;;  %v498_v56 = vmin.f32 %v7131_v15, 20.0 }
 0x28c   :  { %v4461_v21 = vpop.eup %4460  ;;  %v2785_v11 = vmul.f32 %v4455_v25, %v2529_v14  ;;  %v2531_v30 = vsub.f32 2.0, %v2275_v36  ;;  %4480 = vpow2.f32 %v965_v19  ;;  %v971_v45 = vmul.f32 1.442695, %v497_v60 }
 0x28d   :  { %v4463_v22 = vpop.eup %4462  ;;  %v3296_v54 = vmul.f32 %v7050_v48, %v2784_v44  ;;  %v2786_v51 = vmul.f32 %v4457_v3, %v2530_v63  ;;  %v2276_v5 = vmul.f32 %v4461_v21, %v7072_v16  ;;  %4482 = vpow2.f32 %v967_v17 }
 0x28e   :  { %v4465_v35 = vpop.eup %4464  ;;  %v3297_v33 = vmul.f32 %v7056_v28, %v2785_v11  ;;  %v2787_v57 = vmul.f32 %v4459_v0, %v2531_v30  ;;  %v2277_v39 = vmul.f32 %v4463_v22, %v7077_v23  ;;  %4484 = vpow2.f32 %v969_v41 }
 0x28f   :  { %v4467_v62 = vpop.eup %4466  ;;  %3552 = vst [vmem:[#allocation5 + $0x648] sm:$0xff] %v3296_v54  ;;  %v3298_v24 = vmul.f32 %v7062_v2, %v2786_v51  ;;  %v2532_v18 = vsub.f32 2.0, %v2276_v5  ;;  %v2278_v48 = vmul.f32 %v4465_v35, %v7085_v31  ;;  %4486 = vpow2.f32 %v971_v45 }
 0x290   :  { %v4469_v59 = vpop.eup %4468  ;;  %3553 = vst [vmem:[#allocation5 + $0x650] sm:$0xff] %v3297_v33  ;;  %v3299_v16 = vmul.f32 %v7068_v47, %v2787_v57  ;;  %v2533_v58 = vsub.f32 2.0, %v2277_v39  ;;  %v2279_v28 = vmul.f32 %v4467_v62, %v7090_v38  ;;  %v973_v42 = vmul.f32 1.442695, %v498_v56  ;;  %v7172_v57 = vld [vmem:[#allocation2 + $0x6e8] sm:$0xff] }
 0x291   :  { %v4471_v23 = vpop.eup %4470  ;;  %3554 = vst [vmem:[#allocation5 + $0x658] sm:$0xff] %v3298_v24  ;;  %v2788_v20 = vmul.f32 %v4461_v21, %v2532_v18  ;;  %v2534_v52 = vsub.f32 2.0, %v2278_v48  ;;  %v2280_v25 = vmul.f32 %v4469_v59, %v7102_v7  ;;  %v499_v2 = vmin.f32 %v7141_v13, 20.0 }
 0x292   :  { %v4473_v29 = vpop.eup %4472  ;;  %3555 = vst [vmem:[#allocation5 + $0x660] sm:$0xff] %v3299_v16  ;;  %v2789_v31 = vmul.f32 %v4463_v22, %v2533_v58  ;;  %v2535_v50 = vsub.f32 2.0, %v2279_v28  ;;  %v2281_v1 = vmul.f32 %v4471_v23, %v7112_v46  ;;  %4488 = vpow2.f32 %v973_v42 }
 0x293   :  { %v4475_v47 = vpop.eup %4474  ;;  %v3300_v3 = vmul.f32 %v7075_v37, %v2788_v20  ;;  %v2790_v38 = vmul.f32 %v4465_v35, %v2534_v52  ;;  %v2536_v9 = vsub.f32 2.0, %v2280_v25  ;;  %v1258_v19 = vadd.f32 2.0, %v4473_v29  ;;  %v7193_v25 = vld [vmem:[#allocation2 + $0x6f0] sm:$0xff] }
 0x294   :  { %v4477_v17 = vpop.eup %4476  ;;  %v3301_v0 = vmul.f32 %v7080_v6, %v2789_v31  ;;  %v2791_v53 = vmul.f32 %v4467_v62, %v2535_v50  ;;  %v2537_v7 = vsub.f32 2.0, %v2281_v1  ;;  %v1259_v43 = vadd.f32 2.0, %v4475_v47  ;;  %v7207_v1 = vld [vmem:[#allocation2 + $0x708] sm:$0xff] }
 0x295   :  { %v4479_v41 = vpop.eup %4478  ;;  %3556 = vst [vmem:[#allocation5 + $0x668] sm:$0xff] %v3300_v3  ;;  %v3302_v14 = vmul.f32 %v7088_v34, %v2790_v38  ;;  %v2792_v36 = vmul.f32 %v4469_v59, %v2536_v9  ;;  %v1514_v60 = vmul.f32 %v4473_v29, %v1258_v19  ;;  %v1260_v46 = vadd.f32 2.0, %v4477_v17  ;;  %v7195_v29 = vld [vmem:[#allocation2 + $0x6f8] sm:$0xff]  ;;  %v7217_v19 = vld [vmem:[#allocation2 + $0x710] sm:$0xff] }
 0x296   :  { %v4481_v44 = vpop.eup %4480  ;;  %3557 = vst [vmem:[#allocation5 + $0x670] sm:$0xff] %v3301_v0  ;;  %v3303_v37 = vmul.f32 %v7100_v32, %v2791_v53  ;;  %v2793_v63 = vmul.f32 %v4471_v23, %v2537_v7  ;;  %v1515_v56 = vmul.f32 %v4475_v47, %v1259_v43  ;;  %v1261_v21 = vadd.f32 2.0, %v4479_v41  ;;  %v7226_v53 = vld [vmem:[#allocation2 + $0x718] sm:$0xff]  ;;  %v7228_v7 = vld [vmem:[#allocation2 + $0x720] sm:$0xff] }
 0x297   :  { %v4483_v11 = vpop.eup %4482  ;;  %3558 = vst [vmem:[#allocation5 + $0x678] sm:$0xff] %v3302_v14  ;;  %v3304_v6 = vmul.f32 %v7105_v27, %v2792_v36  ;;  %v7155_v30 = vadd.f32 2.0, %v1514_v60  ;;  %v7158_v45 = vmul.f32 %v1514_v60, %v7033_v61  ;;  %v1516_v34 = vmul.f32 %v4477_v17, %v1260_v46 }
 0x298   :  { %v4485_v22 = vpop.eup %4484  ;;  %3559 = vst [vmem:[#allocation5 + $0x680] sm:$0xff] %v3303_v37  ;;  %v3305_v54 = vmul.f32 %v7115_v4, %v2793_v63  ;;  %v7161_v51 = vadd.f32 2.0, %v1515_v56  ;;  %v7164_v32 = vmul.f32 %v1515_v56, %v7082_v40  ;;  %v1517_v5 = vmul.f32 %v4479_v41, %v1261_v21 }
 0x299   :  { %v4487_v35 = vpop.eup %4486  ;;  %3560 = vst [vmem:[#allocation5 + $0x688] sm:$0xff] %v3304_v6  ;;  %4490 = vrcp.f32 %v7155_v30  ;;  %v7167_v27 = vadd.f32 2.0, %v1516_v34  ;;  %v7170_v61 = vmul.f32 %v1516_v34, %v7092_v55  ;;  %v1262_v33 = vadd.f32 2.0, %v4481_v44 }
 0x29a   :  { %3561 = vst [vmem:[#allocation5 + $0x690] sm:$0xff] %v3305_v54  ;;  %4492 = vrcp.f32 %v7161_v51  ;;  %v7175_v4 = vadd.f32 2.0, %v1517_v5  ;;  %v7178_v40 = vmul.f32 %v1517_v5, %v7094_v49  ;;  %v1263_v39 = vadd.f32 2.0, %v4483_v11 }
 0x29b   :  { %4494 = vrcp.f32 %v7167_v27  ;;  %v1518_v62 = vmul.f32 %v4481_v44, %v1262_v33  ;;  %v1264_v24 = vadd.f32 2.0, %v4485_v22  ;;  %v1265_v18 = vadd.f32 2.0, %v4487_v35 }
 0x29c   :  { %v4489_v48 = vpop.eup %4488  ;;  %4496 = vrcp.f32 %v7175_v4  ;;  %v1519_v55 = vmul.f32 %v4483_v11, %v1263_v39  ;;  %v975_v59 = vmul.f32 1.442695, %v499_v2  ;;  %v500_v16 = vmin.f32 %v7172_v57, 20.0  ;;  %v7197_v2 = vld [vmem:[#allocation2 + $0x700] sm:$0xff] }
 0x29d   :  { %v7183_v58 = vadd.f32 2.0, %v1518_v62  ;;  %v7186_v28 = vmul.f32 %v1518_v62, %v7096_v12  ;;  %v1520_v49 = vmul.f32 %v4485_v22, %v1264_v24  ;;  %v1521_v42 = vmul.f32 %v4487_v35, %v1265_v18 }
 0x29e   :  { %v7188_v23 = vadd.f32 2.0, %v1519_v55  ;;  %v7191_v20 = vmul.f32 %v1519_v55, %v7107_v8  ;;  %v1266_v52 = vadd.f32 2.0, %v4489_v48  ;;  %4498 = vpow2.f32 %v975_v59 }
 0x29f   :  { %4500 = vrcp.f32 %v7183_v58  ;;  %v7200_v31 = vadd.f32 2.0, %v1520_v49  ;;  %v7203_v12 = vmul.f32 %v1520_v49, %v7109_v10  ;;  %v7205_v50 = vadd.f32 2.0, %v1521_v42 }
 0x2a0   :  { %4502 = vrcp.f32 %v7188_v23  ;;  %v7211_v8 = vmul.f32 %v1521_v42, %v7127_v26  ;;  %v1522_v47 = vmul.f32 %v4489_v48, %v1266_v52  ;;  %v977_v3 = vmul.f32 1.442695, %v500_v16 }
 0x2a1   :  { %4504 = vrcp.f32 %v7200_v31  ;;  %v501_v38 = vmin.f32 %v7193_v25, 20.0  ;;  %v502_v9 = vmin.f32 %v7195_v29, 20.0  ;;  %v503_v10 = vmin.f32 %v7197_v2, 20.0 }
 0x2a2   :  { %4506 = vrcp.f32 %v7205_v50  ;;  %v7220_v17 = vadd.f32 2.0, %v1522_v47  ;;  %v7223_v0 = vmul.f32 %v1522_v47, %v7131_v15  ;;  %v504_v26 = vmin.f32 %v7207_v1, 20.0 }
 0x2a3   :  { %v4491_v43 = vpop.eup %4490  ;;  %4508 = vpow2.f32 %v977_v3  ;;  %v979_v41 = vmul.f32 1.442695, %v501_v38  ;;  %v981_v14 = vmul.f32 1.442695, %v502_v9  ;;  %v983_v36 = vmul.f32 1.442695, %v503_v10 }
 0x2a4   :  { %v4493_v60 = vpop.eup %4492  ;;  %v2282_v46 = vmul.f32 %v4491_v43, %v7155_v30  ;;  %4510 = vrcp.f32 %v7220_v17  ;;  %v985_v44 = vmul.f32 1.442695, %v504_v26  ;;  %v505_v15 = vmin.f32 %v7217_v19, 20.0 }
 0x2a5   :  { %v4495_v37 = vpop.eup %4494  ;;  %v2283_v63 = vmul.f32 %v4493_v60, %v7161_v51  ;;  %4512 = vpow2.f32 %v979_v41  ;;  %v506_v56 = vmin.f32 %v7226_v53, 20.0  ;;  %v507_v21 = vmin.f32 %v7228_v7, 20.0 }
 0x2a6   :  { %v4497_v11 = vpop.eup %4496  ;;  %v2538_v6 = vsub.f32 2.0, %v2282_v46  ;;  %v2284_v34 = vmul.f32 %v4495_v37, %v7167_v27  ;;  %4514 = vpow2.f32 %v981_v14  ;;  %v987_v22 = vmul.f32 1.442695, %v505_v15 }
 0x2a7   :  { %v2539_v30 = vsub.f32 2.0, %v2283_v63  ;;  %v2285_v54 = vmul.f32 %v4497_v11, %v7175_v4  ;;  %4516 = vpow2.f32 %v983_v36  ;;  %v989_v5 = vmul.f32 1.442695, %v506_v56 }
 0x2a8   :  { %v4499_v35 = vpop.eup %4498  ;;  %v2794_v33 = vmul.f32 %v4491_v43, %v2538_v6  ;;  %v2540_v39 = vsub.f32 2.0, %v2284_v34  ;;  %4518 = vpow2.f32 %v985_v44  ;;  %v991_v51 = vmul.f32 1.442695, %v507_v21 }
 0x2a9   :  { %v4501_v62 = vpop.eup %4500  ;;  %v2795_v24 = vmul.f32 %v4493_v60, %v2539_v30  ;;  %v2541_v18 = vsub.f32 2.0, %v2285_v54  ;;  %v1267_v48 = vadd.f32 2.0, %v4499_v35  ;;  %4520 = vpow2.f32 %v987_v22 }
 0x2aa   :  { %v4503_v55 = vpop.eup %4502  ;;  %v3306_v27 = vmul.f32 %v7158_v45, %v2794_v33  ;;  %v2796_v59 = vmul.f32 %v4495_v37, %v2540_v39  ;;  %v2286_v16 = vmul.f32 %v4501_v62, %v7183_v58  ;;  %4522 = vpow2.f32 %v989_v5 }
 0x2ab   :  { %v4505_v4 = vpop.eup %4504  ;;  %v3307_v49 = vmul.f32 %v7164_v32, %v2795_v24  ;;  %v2797_v42 = vmul.f32 %v4497_v11, %v2541_v18  ;;  %v2287_v52 = vmul.f32 %v4503_v55, %v7188_v23  ;;  %v1523_v47 = vmul.f32 %v4499_v35, %v1267_v48 }
 0x2ac   :  { %v4507_v3 = vpop.eup %4506  ;;  %3562 = vst [vmem:[#allocation5 + $0x698] sm:$0xff] %v3306_v27  ;;  %v3308_v38 = vmul.f32 %v7170_v61, %v2796_v59  ;;  %v2542_v9 = vsub.f32 2.0, %v2286_v16  ;;  %v2288_v10 = vmul.f32 %v4505_v4, %v7200_v31  ;;  %4524 = vpow2.f32 %v991_v51  ;;  %v7275_v16 = vld [vmem:[#allocation2 + $0x728] sm:$0xff] }
 0x2ad   :  { %v4509_v45 = vpop.eup %4508  ;;  %3563 = vst [vmem:[#allocation5 + $0x6a0] sm:$0xff] %v3307_v49  ;;  %v3309_v58 = vmul.f32 %v7178_v40, %v2797_v42  ;;  %v2543_v26 = vsub.f32 2.0, %v2287_v52  ;;  %v2289_v43 = vmul.f32 %v4507_v3, %v7205_v50  ;;  %v7246_v32 = vadd.f32 2.0, %v1523_v47 }
 0x2ae   :  { %v4511_v41 = vpop.eup %4510  ;;  %3564 = vst [vmem:[#allocation5 + $0x6a8] sm:$0xff] %v3308_v38  ;;  %v2798_v23 = vmul.f32 %v4501_v62, %v2542_v9  ;;  %v2544_v14 = vsub.f32 2.0, %v2288_v10  ;;  %v7249_v36 = vmul.f32 %v1523_v47, %v7141_v13  ;;  %v1268_v61 = vadd.f32 2.0, %v4509_v45 }
 0x2af   :  { %v4513_v60 = vpop.eup %4512  ;;  %3565 = vst [vmem:[#allocation5 + $0x6b0] sm:$0xff] %v3309_v58  ;;  %v2799_v31 = vmul.f32 %v4503_v55, %v2543_v26  ;;  %v2545_v46 = vsub.f32 2.0, %v2289_v43  ;;  %v2290_v44 = vmul.f32 %v4511_v41, %v7220_v17  ;;  %4526 = vrcp.f32 %v7246_v32  ;;  %v7302_v26 = vld [vmem:[#allocation2 + $0x740] sm:$0xff]  ;;  %v7304_v43 = vld [vmem:[#allocation2 + $0x748] sm:$0xff] }
 0x2b0   :  { %v4515_v40 = vpop.eup %4514  ;;  %v3310_v50 = vmul.f32 %v7186_v28, %v2798_v23  ;;  %v2800_v15 = vmul.f32 %v4505_v4, %v2544_v14  ;;  %v1524_v37 = vmul.f32 %v4509_v45, %v1268_v61  ;;  %v1269_v63 = vadd.f32 2.0, %v4513_v60  ;;  %v7316_v61 = vld [vmem:[#allocation2 + $0x750] sm:$0xff] }
 0x2b1   :  { %v4517_v56 = vpop.eup %4516  ;;  %v3311_v21 = vmul.f32 %v7191_v20, %v2799_v31  ;;  %v2801_v13 = vmul.f32 %v4507_v3, %v2545_v46  ;;  %v2546_v11 = vsub.f32 2.0, %v2290_v44  ;;  %v1270_v6 = vadd.f32 2.0, %v4515_v40 }
 0x2b2   :  { %v4519_v34 = vpop.eup %4518  ;;  %3566 = vst [vmem:[#allocation5 + $0x6b8] sm:$0xff] %v3310_v50  ;;  %v3312_v22 = vmul.f32 %v7203_v12, %v2800_v15  ;;  %v7256_v30 = vadd.f32 2.0, %v1524_v37  ;;  %v7259_v17 = vmul.f32 %v1524_v37, %v7172_v57  ;;  %v1525_v54 = vmul.f32 %v4513_v60, %v1269_v63 }
 0x2b3   :  { %v4521_v28 = vpop.eup %4520  ;;  %3567 = vst [vmem:[#allocation5 + $0x6c0] sm:$0xff] %v3311_v21  ;;  %v3313_v5 = vmul.f32 %v7211_v8, %v2801_v13  ;;  %v2802_v35 = vmul.f32 %v4511_v41, %v2546_v11  ;;  %v1526_v33 = vmul.f32 %v4515_v40, %v1270_v6  ;;  %v1271_v20 = vadd.f32 2.0, %v4517_v56  ;;  %v7329_v13 = vld [vmem:[#allocation2 + $0x760] sm:$0xff]  ;;  %v7331_v11 = vld [vmem:[#allocation2 + $0x768] sm:$0xff] }
 0x2b4   :  { %v4523_v39 = vpop.eup %4522  ;;  %3568 = vst [vmem:[#allocation5 + $0x6c8] sm:$0xff] %v3312_v22  ;;  %4528 = vrcp.f32 %v7256_v30  ;;  %v7263_v51 = vadd.f32 2.0, %v1525_v54  ;;  %v7266_v12 = vmul.f32 %v1525_v54, %v7193_v25  ;;  %v1272_v62 = vadd.f32 2.0, %v4519_v34  ;;  %v7277_v25 = vld [vmem:[#allocation2 + $0x730] sm:$0xff] }
 0x2b5   :  { %3569 = vst [vmem:[#allocation5 + $0x6d0] sm:$0xff] %v3313_v5  ;;  %v3314_v57 = vmul.f32 %v7223_v0, %v2802_v35  ;;  %v7269_v24 = vadd.f32 2.0, %v1526_v33  ;;  %v7272_v8 = vmul.f32 %v1526_v33, %v7195_v29  ;;  %v1527_v18 = vmul.f32 %v4517_v56, %v1271_v20 }
 0x2b6   :  { %v4525_v48 = vpop.eup %4524  ;;  %4530 = vrcp.f32 %v7263_v51  ;;  %v1528_v55 = vmul.f32 %v4519_v34, %v1272_v62  ;;  %v1273_v27 = vadd.f32 2.0, %v4521_v28  ;;  %v1274_v59 = vadd.f32 2.0, %v4523_v39 }
 0x2b7   :  { %3570 = vst [vmem:[#allocation5 + $0x6d8] sm:$0xff] %v3314_v57  ;;  %4532 = vrcp.f32 %v7269_v24  ;;  %v7280_v0 = vadd.f32 2.0, %v1527_v18  ;;  %v7283_v4 = vmul.f32 %v1527_v18, %v7197_v2  ;;  %v1275_v29 = vadd.f32 2.0, %v4525_v48 }
 0x2b8   :  { %v7285_v49 = vadd.f32 2.0, %v1528_v55  ;;  %v7288_v42 = vmul.f32 %v1528_v55, %v7207_v1  ;;  %v1529_v52 = vmul.f32 %v4521_v28, %v1273_v27  ;;  %v1530_v47 = vmul.f32 %v4523_v39, %v1274_v59  ;;  %v7300_v1 = vld [vmem:[#allocation2 + $0x738] sm:$0xff]  ;;  %v7334_v28 = vld [vmem:[#allocation2 + $0x770] sm:$0xff] }
 0x2b9   :  { %v4527_v3 = vpop.eup %4526  ;;  %4534 = vrcp.f32 %v7280_v0  ;;  %v1531_v38 = vmul.f32 %v4525_v48, %v1275_v29  ;;  %v508_v9 = vmin.f32 %v7275_v16, 20.0  ;;  %v509_v10 = vmin.f32 %v7277_v25, 20.0 }
 0x2ba   :  { %v2291_v45 = vmul.f32 %v4527_v3, %v7246_v32  ;;  %4536 = vrcp.f32 %v7285_v49  ;;  %v7295_v2 = vadd.f32 2.0, %v1529_v52  ;;  %v7298_v58 = vmul.f32 %v1529_v52, %v7217_v19  ;;  %v7318_v19 = vld [vmem:[#allocation2 + $0x758] sm:$0xff] }
 0x2bb   :  { %v7306_v41 = vadd.f32 2.0, %v1530_v47  ;;  %v7309_v23 = vmul.f32 %v1530_v47, %v7226_v53  ;;  %v7311_v14 = vadd.f32 2.0, %v1531_v38  ;;  %v7314_v32 = vmul.f32 %v1531_v38, %v7228_v7 }
 0x2bc   :  { %v2547_v60 = vsub.f32 2.0, %v2291_v45  ;;  %4538 = vrcp.f32 %v7295_v2  ;;  %v993_v31 = vmul.f32 1.442695, %v508_v9  ;;  %v995_v46 = vmul.f32 1.442695, %v509_v10 }
 0x2bd   :  { %4540 = vrcp.f32 %v7306_v41  ;;  %v510_v44 = vmin.f32 %v7300_v1, 20.0  ;;  %v511_v53 = vmin.f32 %v7302_v26, 20.0  ;;  %v512_v40 = vmin.f32 %v7304_v43, 20.0 }
 0x2be   :  { %v4529_v50 = vpop.eup %4528  ;;  %v2803_v7 = vmul.f32 %v4527_v3, %v2547_v60  ;;  %4542 = vrcp.f32 %v7311_v14  ;;  %v513_v15 = vmin.f32 %v7316_v61, 20.0  ;;  %v514_v37 = vmin.f32 %v7318_v19, 20.0 }
 0x2bf   :  { %v2292_v63 = vmul.f32 %v4529_v50, %v7256_v30  ;;  %4544 = vpow2.f32 %v993_v31  ;;  %v997_v56 = vmul.f32 1.442695, %v510_v44  ;;  %v999_v21 = vmul.f32 1.442695, %v511_v53 }
 0x2c0   :  { %v4531_v6 = vpop.eup %4530  ;;  %v3315_v34 = vmul.f32 %v7249_v36, %v2803_v7  ;;  %4546 = vpow2.f32 %v995_v46  ;;  %v1001_v22 = vmul.f32 1.442695, %v512_v40  ;;  %v1003_v54 = vmul.f32 1.442695, %v513_v15  ;;  %v7346_v46 = vld [vmem:[#allocation2 + $0x778] sm:$0xff] }
 0x2c1   :  { %v4533_v5 = vpop.eup %4532  ;;  %v2548_v35 = vsub.f32 2.0, %v2292_v63  ;;  %v2293_v33 = vmul.f32 %v4531_v6, %v7263_v51  ;;  %4548 = vpow2.f32 %v997_v56  ;;  %v1005_v30 = vmul.f32 1.442695, %v514_v37 }
 0x2c2   :  { %3571 = vst [vmem:[#allocation5 + $0x6e0] sm:$0xff] %v3315_v34  ;;  %v2294_v20 = vmul.f32 %v4533_v5, %v7269_v24  ;;  %4550 = vpow2.f32 %v999_v21  ;;  %v515_v39 = vmin.f32 %v7329_v13, 20.0  ;;  %v516_v62 = vmin.f32 %v7331_v11, 20.0 }
 0x2c3   :  { %v4535_v36 = vpop.eup %4534  ;;  %v2804_v57 = vmul.f32 %v4529_v50, %v2548_v35  ;;  %v2549_v18 = vsub.f32 2.0, %v2293_v33  ;;  %4552 = vpow2.f32 %v1001_v22  ;;  %v517_v48 = vmin.f32 %v7334_v28, 20.0 }
 0x2c4   :  { %v4537_v55 = vpop.eup %4536  ;;  %v2550_v27 = vsub.f32 2.0, %v2294_v20  ;;  %v2295_v51 = vmul.f32 %v4535_v36, %v7280_v0  ;;  %4554 = vpow2.f32 %v1003_v54  ;;  %v1007_v59 = vmul.f32 1.442695, %v515_v39 }
 0x2c5   :  { %v3316_v29 = vmul.f32 %v7259_v17, %v2804_v57  ;;  %v2805_v24 = vmul.f32 %v4531_v6, %v2549_v18  ;;  %v2296_v52 = vmul.f32 %v4537_v55, %v7285_v49  ;;  %4556 = vpow2.f32 %v1005_v30 }
 0x2c6   :  { %v4539_v47 = vpop.eup %4538  ;;  %v2806_v3 = vmul.f32 %v4533_v5, %v2550_v27  ;;  %v2551_v38 = vsub.f32 2.0, %v2295_v51  ;;  %4558 = vpow2.f32 %v1007_v59  ;;  %v1009_v9 = vmul.f32 1.442695, %v516_v62 }
 0x2c7   :  { %v4541_v10 = vpop.eup %4540  ;;  %3572 = vst [vmem:[#allocation5 + $0x6e8] sm:$0xff] %v3316_v29  ;;  %v3317_v45 = vmul.f32 %v7266_v12, %v2805_v24  ;;  %v2552_v60 = vsub.f32 2.0, %v2296_v52  ;;  %v2297_v0 = vmul.f32 %v4539_v47, %v7295_v2  ;;  %v1011_v31 = vmul.f32 1.442695, %v517_v48  ;;  %v7378_v52 = vld [vmem:[#allocation2 + $0x780] sm:$0xff] }
 0x2c8   :  { %v4543_v17 = vpop.eup %4542  ;;  %v3318_v44 = vmul.f32 %v7272_v8, %v2806_v3  ;;  %v2807_v49 = vmul.f32 %v4535_v36, %v2551_v38  ;;  %v2298_v53 = vmul.f32 %v4541_v10, %v7306_v41  ;;  %4560 = vpow2.f32 %v1009_v9 }
 0x2c9   :  { %v4545_v40 = vpop.eup %4544  ;;  %3573 = vst [vmem:[#allocation5 + $0x6f0] sm:$0xff] %v3317_v45  ;;  %v2808_v50 = vmul.f32 %v4537_v55, %v2552_v60  ;;  %v2553_v7 = vsub.f32 2.0, %v2297_v0  ;;  %v2299_v15 = vmul.f32 %v4543_v17, %v7311_v14  ;;  %4562 = vpow2.f32 %v1011_v31 }
 0x2ca   :  { %v4547_v12 = vpop.eup %4546  ;;  %3574 = vst [vmem:[#allocation5 + $0x6f8] sm:$0xff] %v3318_v44  ;;  %v3319_v2 = vmul.f32 %v7283_v4, %v2807_v49  ;;  %v2554_v37 = vsub.f32 2.0, %v2298_v53  ;;  %v1276_v63 = vadd.f32 2.0, %v4545_v40  ;;  %v518_v56 = vmin.f32 %v7346_v46, 20.0 }
 0x2cb   :  { %v4549_v8 = vpop.eup %4548  ;;  %v3320_v21 = vmul.f32 %v7288_v42, %v2808_v50  ;;  %v2809_v41 = vmul.f32 %v4539_v47, %v2553_v7  ;;  %v2555_v6 = vsub.f32 2.0, %v2299_v15  ;;  %v1277_v34 = vadd.f32 2.0, %v4547_v12  ;;  %v7393_v50 = vld [vmem:[#allocation2 + $0x788] sm:$0xff] }
 0x2cc   :  { %v4551_v22 = vpop.eup %4550  ;;  %3575 = vst [vmem:[#allocation5 + $0x700] sm:$0xff] %v3319_v2  ;;  %v2810_v54 = vmul.f32 %v4541_v10, %v2554_v37  ;;  %v1532_v5 = vmul.f32 %v4545_v40, %v1276_v63  ;;  %v1278_v14 = vadd.f32 2.0, %v4549_v8  ;;  %v7358_v57 = vmul.f32 1.442695, %v518_v56  ;;  %v7405_v2 = vld [vmem:[#allocation2 + $0x798] sm:$0xff] }
 0x2cd   :  { %v4553_v35 = vpop.eup %4552  ;;  %3576 = vst [vmem:[#allocation5 + $0x708] sm:$0xff] %v3320_v21  ;;  %v3321_v33 = vmul.f32 %v7298_v58, %v2809_v41  ;;  %v2811_v4 = vmul.f32 %v4543_v17, %v2555_v6  ;;  %v1533_v30 = vmul.f32 %v4547_v12, %v1277_v34  ;;  %v1279_v20 = vadd.f32 2.0, %v4551_v22  ;;  %v7403_v12 = vld [vmem:[#allocation2 + $0x790] sm:$0xff]  ;;  %v7426_v34 = vld [vmem:[#allocation2 + $0x7a8] sm:$0xff] }
 0x2ce   :  { %v4555_v39 = vpop.eup %4554  ;;  %v3322_v62 = vmul.f32 %v7309_v23, %v2810_v54  ;;  %v7356_v36 = vadd.f32 2.0, %v1532_v5  ;;  %v1534_v42 = vmul.f32 %v4549_v8, %v1278_v14  ;;  %v7362_v55 = vmul.f32 %v1532_v5, %v7275_v16  ;;  %v7435_v14 = vld [vmem:[#allocation2 + $0x7b0] sm:$0xff] }
 0x2cf   :  { %v4557_v18 = vpop.eup %4556  ;;  %3577 = vst [vmem:[#allocation5 + $0x710] sm:$0xff] %v3321_v33  ;;  %v3323_v48 = vmul.f32 %v7314_v32, %v2811_v4  ;;  %v7364_v27 = vadd.f32 2.0, %v1533_v30  ;;  %v1535_v58 = vmul.f32 %v4551_v22, %v1279_v20  ;;  %v7368_v23 = vmul.f32 %v1533_v30, %v7277_v25 }
 0x2d0   :  { %v4559_v51 = vpop.eup %4558  ;;  %3578 = vst [vmem:[#allocation5 + $0x718] sm:$0xff] %v3322_v62  ;;  %4564 = vrcp.f32 %v7356_v36  ;;  %v7370_v59 = vadd.f32 2.0, %v1534_v42  ;;  %v1280_v29 = vadd.f32 2.0, %v4553_v35  ;;  %v7374_v32 = vmul.f32 %v1534_v42, %v7300_v1 }
 0x2d1   :  { %3579 = vst [vmem:[#allocation5 + $0x720] sm:$0xff] %v3323_v48  ;;  %4566 = vrcp.f32 %v7364_v27  ;;  %v7376_v16 = vadd.f32 2.0, %v1535_v58  ;;  %v1281_v24 = vadd.f32 2.0, %v4555_v39  ;;  %v1282_v25 = vadd.f32 2.0, %v4557_v18 }
 0x2d2   :  { %v4561_v47 = vpop.eup %4560  ;;  %4568 = vrcp.f32 %v7370_v59  ;;  %v1536_v3 = vmul.f32 %v4553_v35, %v1280_v29  ;;  %v1283_v38 = vadd.f32 2.0, %v4559_v51  ;;  %v7383_v10 = vmul.f32 %v1535_v58, %v7302_v26 }
 0x2d3   :  { %v4563_v9 = vpop.eup %4562  ;;  %4570 = vrcp.f32 %v7376_v16  ;;  %v1537_v45 = vmul.f32 %v4555_v39, %v1281_v24  ;;  %v1284_v1 = vadd.f32 2.0, %v4561_v47  ;;  %v1538_v0 = vmul.f32 %v4557_v18, %v1282_v25 }
 0x2d4   :  { %v7385_v60 = vadd.f32 2.0, %v1536_v3  ;;  %v1539_v31 = vmul.f32 %v4559_v51, %v1283_v38  ;;  %v519_v17 = vmin.f32 %v7378_v52, 20.0  ;;  %v7389_v44 = vmul.f32 %v1536_v3, %v7304_v43  ;;  %v7407_v43 = vld [vmem:[#allocation2 + $0x7a0] sm:$0xff] }
 0x2d5   :  { %v7391_v49 = vadd.f32 2.0, %v1537_v45  ;;  %v1540_v53 = vmul.f32 %v4561_v47, %v1284_v1  ;;  %v1285_v40 = vadd.f32 2.0, %v4563_v9  ;;  %v7397_v26 = vmul.f32 %v1537_v45, %v7316_v61 }
 0x2d6   :  { %4572 = vrcp.f32 %v7385_v60  ;;  %v7399_v7 = vadd.f32 2.0, %v1538_v0  ;;  %v7401_v15 = vadd.f32 2.0, %v1539_v31  ;;  %v7411_v37 = vmul.f32 %v1538_v0, %v7318_v19 }
 0x2d7   :  { %4574 = vrcp.f32 %v7391_v49  ;;  %v7414_v63 = vmul.f32 %v1539_v31, %v7329_v13  ;;  %v7416_v61 = vadd.f32 2.0, %v1540_v53  ;;  %v7419_v56 = vmul.f32 %v4563_v9, %v1285_v40 }
 0x2d8   :  { %4576 = vrcp.f32 %v7399_v7  ;;  %v1015_v8 = vmul.f32 1.442695, %v519_v17  ;;  %v520_v21 = vmin.f32 %v7393_v50, 20.0  ;;  %v521_v41 = vmin.f32 %v7403_v12, 20.0 }
 0x2d9   :  { %4578 = vrcp.f32 %v7401_v15  ;;  %v522_v6 = vmin.f32 %v7405_v2, 20.0  ;;  %v523_v19 = vmin.f32 %v7407_v43, 20.0  ;;  %v7430_v22 = vmul.f32 %v1540_v53, %v7331_v11 }
 0x2da   :  { %v4565_v13 = vpop.eup %4564  ;;  %4580 = vrcp.f32 %v7416_v61  ;;  %v7433_v54 = vadd.f32 2.0, %v7419_v56  ;;  %v1017_v5 = vmul.f32 1.442695, %v520_v21  ;;  %v1019_v4 = vmul.f32 1.442695, %v521_v41 }
 0x2db   :  { %v4567_v35 = vpop.eup %4566  ;;  %v2300_v33 = vmul.f32 %v4565_v13, %v7356_v36  ;;  %4582 = vpow2.f32 %v7358_v57  ;;  %v1021_v30 = vmul.f32 1.442695, %v522_v6  ;;  %v1023_v11 = vmul.f32 1.442695, %v523_v19  ;;  %v7444_v36 = vld [vmem:[#allocation2 + $0x7b8] sm:$0xff] }
 0x2dc   :  { %v4569_v20 = vpop.eup %4568  ;;  %v2301_v39 = vmul.f32 %v4567_v35, %v7364_v27  ;;  %4584 = vrcp.f32 %v7433_v54  ;;  %v524_v62 = vmin.f32 %v7426_v34, 20.0  ;;  %v525_v58 = vmin.f32 %v7435_v14, 20.0 }
 0x2dd   :  { %v4571_v42 = vpop.eup %4570  ;;  %v2556_v18 = vsub.f32 2.0, %v2300_v33  ;;  %v2302_v48 = vmul.f32 %v4569_v20, %v7370_v59  ;;  %4586 = vpow2.f32 %v1015_v8  ;;  %v526_v59 = vmin.f32 %v7444_v36, 20.0 }
 0x2de   :  { %v2557_v57 = vsub.f32 2.0, %v2301_v39  ;;  %v2303_v51 = vmul.f32 %v4571_v42, %v7376_v16  ;;  %4588 = vpow2.f32 %v1017_v5  ;;  %v1025_v29 = vmul.f32 1.442695, %v524_v62 }
 0x2df   :  { %v2812_v27 = vmul.f32 %v4565_v13, %v2556_v18  ;;  %v2558_v24 = vsub.f32 2.0, %v2302_v48  ;;  %4590 = vpow2.f32 %v1019_v4  ;;  %v1027_v47 = vmul.f32 1.442695, %v525_v58 }
 0x2e0   :  { %v4573_v3 = vpop.eup %4572  ;;  %v2813_v25 = vmul.f32 %v4567_v35, %v2557_v57  ;;  %v2559_v38 = vsub.f32 2.0, %v2303_v51  ;;  %4592 = vpow2.f32 %v1021_v30 }
 0x2e1   :  { %v4575_v9 = vpop.eup %4574  ;;  %v3324_v45 = vmul.f32 %v7362_v55, %v2812_v27  ;;  %v2814_v1 = vmul.f32 %v4569_v20, %v2558_v24  ;;  %v2304_v0 = vmul.f32 %v4573_v3, %v7385_v60  ;;  %4594 = vpow2.f32 %v1023_v11 }
 0x2e2   :  { %v4577_v16 = vpop.eup %4576  ;;  %v3325_v31 = vmul.f32 %v7368_v23, %v2813_v25  ;;  %v2815_v17 = vmul.f32 %v4571_v42, %v2559_v38  ;;  %v2305_v53 = vmul.f32 %v4575_v9, %v7391_v49  ;;  %4596 = vpow2.f32 %v1025_v29 }
 0x2e3   :  { %v4579_v40 = vpop.eup %4578  ;;  %3580 = vst [vmem:[#allocation5 + $0x728] sm:$0xff] %v3324_v45  ;;  %v3326_v8 = vmul.f32 %v7374_v32, %v2814_v1  ;;  %v2560_v21 = vsub.f32 2.0, %v2304_v0  ;;  %v2306_v41 = vmul.f32 %v4577_v16, %v7399_v7  ;;  %4598 = vpow2.f32 %v1027_v47 }
 0x2e4   :  { %v4581_v55 = vpop.eup %4580  ;;  %3581 = vst [vmem:[#allocation5 + $0x730] sm:$0xff] %v3325_v31  ;;  %v3327_v60 = vmul.f32 %v7383_v10, %v2815_v17  ;;  %v2561_v6 = vsub.f32 2.0, %v2305_v53  ;;  %v2307_v19 = vmul.f32 %v4579_v40, %v7401_v15  ;;  %v1029_v23 = vmul.f32 1.442695, %v526_v59 }
 0x2e5   :  { %v4583_v13 = vpop.eup %4582  ;;  %3582 = vst [vmem:[#allocation5 + $0x738] sm:$0xff] %v3326_v8  ;;  %v2816_v49 = vmul.f32 %v4573_v3, %v2560_v21  ;;  %v2562_v5 = vsub.f32 2.0, %v2306_v41  ;;  %v2308_v35 = vmul.f32 %v4581_v55, %v7416_v61  ;;  %v3077_v32 = vmul.f32 %v7419_v56, %v7334_v28 }
 0x2e6   :  { %v4585_v33 = vpop.eup %4584  ;;  %3583 = vst [vmem:[#allocation5 + $0x740] sm:$0xff] %v3327_v60  ;;  %v2817_v7 = vmul.f32 %v4575_v9, %v2561_v6  ;;  %v2563_v4 = vsub.f32 2.0, %v2307_v19  ;;  %v1286_v30 = vadd.f32 2.0, %v4583_v13  ;;  %4600 = vpow2.f32 %v1029_v23  ;;  %v7467_v9 = vld [vmem:[#allocation2 + $0x7c0] sm:$0xff]  ;;  %v7483_v19 = vld [vmem:[#allocation2 + $0x7c8] sm:$0xff]  ;;  %v7485_v23 = vld [vmem:[#allocation2 + $0x7d0] sm:$0xff] }
 0x2e7   :  { %v4587_v10 = vpop.eup %4586  ;;  %v3328_v20 = vmul.f32 %v7389_v44, %v2816_v49  ;;  %v2818_v15 = vmul.f32 %v4577_v16, %v2562_v5  ;;  %v2564_v39 = vsub.f32 2.0, %v2308_v35  ;;  %v2309_v11 = vmul.f32 %v4585_v33, %v7433_v54  ;;  %v7495_v35 = vld [vmem:[#allocation2 + $0x7e0] sm:$0xff] }
 0x2e8   :  { %v4589_v62 = vpop.eup %4588  ;;  %v3329_v42 = vmul.f32 %v7397_v26, %v2817_v7  ;;  %v2819_v61 = vmul.f32 %v4579_v40, %v2563_v4  ;;  %v1542_v18 = vmul.f32 %v4583_v13, %v1286_v30  ;;  %v1287_v48 = vadd.f32 2.0, %v4587_v10  ;;  %v7487_v13 = vld [vmem:[#allocation2 + $0x7d8] sm:$0xff] }
 0x2e9   :  { %v4591_v28 = vpop.eup %4590  ;;  %3584 = vst [vmem:[#allocation5 + $0x748] sm:$0xff] %v3328_v20  ;;  %v3330_v56 = vmul.f32 %v7411_v37, %v2818_v15  ;;  %v2820_v58 = vmul.f32 %v4581_v55, %v2564_v39  ;;  %v2565_v57 = vsub.f32 2.0, %v2309_v11  ;;  %v1288_v51 = vadd.f32 2.0, %v4589_v62  ;;  %v7506_v20 = vld [vmem:[#allocation2 + $0x7e8] sm:$0xff] }
 0x2ea   :  { %v4593_v29 = vpop.eup %4592  ;;  %3585 = vst [vmem:[#allocation5 + $0x750] sm:$0xff] %v3329_v42  ;;  %v3331_v44 = vmul.f32 %v7414_v63, %v2819_v61  ;;  %v1798_v27 = vadd.f32 2.0, %v1542_v18  ;;  %v1543_v24 = vmul.f32 %v4587_v10, %v1287_v48  ;;  %v1289_v25 = vadd.f32 2.0, %v4591_v28  ;;  %v7516_v42 = vld [vmem:[#allocation2 + $0x7f8] sm:$0xff] }
 0x2eb   :  { %v4595_v54 = vpop.eup %4594  ;;  %3586 = vst [vmem:[#allocation5 + $0x758] sm:$0xff] %v3330_v56  ;;  %v3332_v26 = vmul.f32 %v7430_v22, %v2820_v58  ;;  %v2821_v47 = vmul.f32 %v4585_v33, %v2565_v57  ;;  %v7465_v3 = vmul.f32 %v4589_v62, %v1288_v51  ;;  %v1290_v59 = vadd.f32 2.0, %v4593_v29  ;;  %v7514_v62 = vld [vmem:[#allocation2 + $0x7f0] sm:$0xff] }
 0x2ec   :  { %v4597_v38 = vpop.eup %4596  ;;  %3587 = vst [vmem:[#allocation5 + $0x760] sm:$0xff] %v3331_v44  ;;  %4602 = vrcp.f32 %v1798_v27  ;;  %v1799_v37 = vadd.f32 2.0, %v1543_v24  ;;  %v7470_v0 = vmul.f32 %v4591_v28, %v1289_v25  ;;  %v1291_v16 = vadd.f32 2.0, %v4595_v54 }
 0x2ed   :  { %v4599_v45 = vpop.eup %4598  ;;  %3588 = vst [vmem:[#allocation5 + $0x768] sm:$0xff] %v3332_v26  ;;  %v3333_v63 = vmul.f32 %v3077_v32, %v2821_v47  ;;  %v1800_v1 = vadd.f32 2.0, %v7465_v3  ;;  %v7472_v22 = vmul.f32 %v4593_v29, %v1290_v59  ;;  %v1292_v31 = vadd.f32 2.0, %v4597_v38 }
 0x2ee   :  { %4604 = vrcp.f32 %v1799_v37  ;;  %v1801_v17 = vadd.f32 2.0, %v7470_v0  ;;  %v1293_v53 = vadd.f32 2.0, %v4599_v45  ;;  %v527_v40 = vmin.f32 %v7467_v9, 20.0 }
 0x2ef   :  { %3589 = vst [vmem:[#allocation5 + $0x770] sm:$0xff] %v3333_v63  ;;  %4606 = vrcp.f32 %v1800_v1  ;;  %v1802_v21 = vadd.f32 2.0, %v7472_v22  ;;  %v7477_v41 = vmul.f32 %v4595_v54, %v1291_v16  ;;  %v7479_v55 = vmul.f32 %v4597_v38, %v1292_v31 }
 0x2f0   :  { %v4601_v8 = vpop.eup %4600  ;;  %4608 = vrcp.f32 %v1801_v17  ;;  %v7481_v60 = vmul.f32 %v4599_v45, %v1293_v53  ;;  %v1031_v7 = vmul.f32 1.442695, %v527_v40  ;;  %v528_v4 = vmin.f32 %v7483_v19, 20.0 }
 0x2f1   :  { %v1294_v6 = vadd.f32 2.0, %v4601_v8  ;;  %4610 = vrcp.f32 %v1802_v21  ;;  %v7490_v49 = vadd.f32 2.0, %v7477_v41  ;;  %v7493_v5 = vadd.f32 2.0, %v7479_v55 }
 0x2f2   :  { %v7498_v32 = vadd.f32 2.0, %v7481_v60  ;;  %v529_v30 = vmin.f32 %v7485_v23, 20.0  ;;  %v530_v10 = vmin.f32 %v7487_v13, 20.0  ;;  %v3078_v15 = vmul.f32 %v1542_v18, %v7346_v46 }
 0x2f3   :  { %v7500_v33 = vmul.f32 %v4601_v8, %v1294_v6  ;;  %4612 = vrcp.f32 %v7490_v49  ;;  %v531_v11 = vmin.f32 %v7495_v35, 20.0  ;;  %v3079_v48 = vmul.f32 %v1543_v24, %v7378_v52 }
 0x2f4   :  { %4614 = vrcp.f32 %v7493_v5  ;;  %v1033_v28 = vmul.f32 1.442695, %v528_v4  ;;  %v1035_v56 = vmul.f32 1.442695, %v529_v30  ;;  %v1037_v46 = vmul.f32 1.442695, %v530_v10 }
 0x2f5   :  { %v7511_v39 = vadd.f32 2.0, %v7500_v33  ;;  %4616 = vrcp.f32 %v7498_v32  ;;  %v532_v18 = vmin.f32 %v7506_v20, 20.0  ;;  %v1039_v51 = vmul.f32 1.442695, %v531_v11 }
 0x2f6   :  { %v4603_v61 = vpop.eup %4602  ;;  %v533_v29 = vmin.f32 %v7514_v62, 20.0  ;;  %v534_v44 = vmin.f32 %v7516_v42, 20.0  ;;  %v3081_v40 = vmul.f32 %v7470_v0, %v7403_v12 }
 0x2f7   :  { %v2310_v58 = vmul.f32 %v4603_v61, %v1798_v27  ;;  %4618 = vrcp.f32 %v7511_v39  ;;  %v1041_v24 = vmul.f32 1.442695, %v532_v18  ;;  %v3080_v27 = vmul.f32 %v7465_v3, %v7393_v50 }
 0x2f8   :  { %v4605_v57 = vpop.eup %4604  ;;  %4620 = vpow2.f32 %v1031_v7  ;;  %v1043_v25 = vmul.f32 1.442695, %v533_v29  ;;  %v1045_v63 = vmul.f32 1.442695, %v534_v44  ;;  %v3082_v7 = vmul.f32 %v7472_v22, %v7405_v2 }
 0x2f9   :  { %v4607_v54 = vpop.eup %4606  ;;  %v2566_v26 = vsub.f32 2.0, %v2310_v58  ;;  %v2311_v52 = vmul.f32 %v4605_v57, %v1799_v37  ;;  %4622 = vpow2.f32 %v1033_v28  ;;  %v3084_v22 = vmul.f32 %v7479_v55, %v7426_v34 }
 0x2fa   :  { %v2312_v47 = vmul.f32 %v4607_v54, %v1800_v1  ;;  %4624 = vpow2.f32 %v1035_v56  ;;  %v4609_v38 = vpop.eup %4608  ;;  %v3086_v55 = vmul.f32 %v7500_v33, %v7444_v36 }
 0x2fb   :  { %v2822_v59 = vmul.f32 %v4603_v61, %v2566_v26  ;;  %v2567_v45 = vsub.f32 2.0, %v2311_v52  ;;  %4626 = vpow2.f32 %v1037_v46  ;;  %v4611_v16 = vpop.eup %4610  ;;  %v2313_v53 = vmul.f32 %v4609_v38, %v1801_v17 }
 0x2fc   :  { %v2568_v31 = vsub.f32 2.0, %v2312_v47  ;;  %4628 = vpow2.f32 %v1039_v51  ;;  %v2314_v1 = vmul.f32 %v4611_v16, %v1802_v21  ;;  %v3083_v21 = vmul.f32 %v7477_v41, %v7407_v43 }
 0x2fd   :  { %v3334_v37 = vmul.f32 %v3078_v15, %v2822_v59  ;;  %v2823_v8 = vmul.f32 %v4605_v57, %v2567_v45  ;;  %4630 = vpow2.f32 %v1041_v24  ;;  %v4613_v6 = vpop.eup %4612  ;;  %v2569_v3 = vsub.f32 2.0, %v2313_v53 }
 0x2fe   :  { %v2824_v50 = vmul.f32 %v4607_v54, %v2568_v31  ;;  %4632 = vpow2.f32 %v1043_v25  ;;  %v4615_v4 = vpop.eup %4614  ;;  %v2570_v10 = vsub.f32 2.0, %v2314_v1  ;;  %v2315_v17 = vmul.f32 %v4613_v6, %v7490_v49 }
 0x2ff   :  { %3590 = vst [vmem:[#allocation5 + $0x778] sm:$0xff] %v3334_v37  ;;  %v3335_v30 = vmul.f32 %v3079_v48, %v2823_v8  ;;  %4634 = vpow2.f32 %v1045_v63  ;;  %v4617_v12 = vpop.eup %4616  ;;  %v2825_v15 = vmul.f32 %v4609_v38, %v2569_v3  ;;  %v2316_v11 = vmul.f32 %v4615_v4, %v7493_v5 }
 0x300   :  { %v3336_v0 = vmul.f32 %v3080_v27, %v2824_v50  ;;  %v2826_v28 = vmul.f32 %v4611_v16, %v2570_v10  ;;  %v2571_v2 = vsub.f32 2.0, %v2315_v17  ;;  %v2317_v48 = vmul.f32 %v4617_v12, %v7498_v32 }
 0x301   :  { %v4619_v61 = vpop.eup %4618  ;;  %3591 = vst [vmem:[#allocation5 + $0x780] sm:$0xff] %v3335_v30  ;;  %v3337_v49 = vmul.f32 %v3081_v40, %v2825_v15  ;;  %v2572_v58 = vsub.f32 2.0, %v2316_v11  ;;  %v3085_v46 = vmul.f32 %v7481_v60, %v7435_v14 }
 0x302   :  { %v4621_v56 = vpop.eup %4620  ;;  %3592 = vst [vmem:[#allocation5 + $0x788] sm:$0xff] %v3336_v0  ;;  %v2318_v43 = vmul.f32 %v4619_v61, %v7511_v39  ;;  %v3338_v5 = vmul.f32 %v3082_v7, %v2826_v28  ;;  %v2827_v18 = vmul.f32 %v4613_v6, %v2571_v2  ;;  %v2573_v57 = vsub.f32 2.0, %v2317_v48 }
 0x303   :  { %v4623_v41 = vpop.eup %4622  ;;  %v1295_v51 = vadd.f32 2.0, %v4621_v56  ;;  %3593 = vst [vmem:[#allocation5 + $0x790] sm:$0xff] %v3337_v49  ;;  %v2828_v44 = vmul.f32 %v4615_v4, %v2572_v58 }
 0x304   :  { %v4625_v29 = vpop.eup %4624  ;;  %v2574_v34 = vsub.f32 2.0, %v2318_v43  ;;  %v1296_v32 = vadd.f32 2.0, %v4623_v41  ;;  %3594 = vst [vmem:[#allocation5 + $0x798] sm:$0xff] %v3338_v5  ;;  %v3339_v26 = vmul.f32 %v3083_v21, %v2827_v18  ;;  %v2829_v52 = vmul.f32 %v4617_v12, %v2573_v57 }
 0x305   :  { %v4627_v54 = vpop.eup %4626  ;;  %v1551_v14 = vmul.f32 %v4621_v56, %v1295_v51  ;;  %v1297_v60 = vadd.f32 2.0, %v4625_v29  ;;  %v3340_v24 = vmul.f32 %v3084_v22, %v2828_v44 }
 0x306   :  { %v4629_v39 = vpop.eup %4628  ;;  %v2830_v47 = vmul.f32 %v4619_v61, %v2574_v34  ;;  %v1552_v27 = vmul.f32 %v4623_v41, %v1296_v32  ;;  %v1298_v25 = vadd.f32 2.0, %v4627_v54  ;;  %3595 = vst [vmem:[#allocation5 + $0x7a0] sm:$0xff] %v3339_v26  ;;  %v3341_v59 = vmul.f32 %v3085_v46, %v2829_v52 }
 0x307   :  { %v4631_v38 = vpop.eup %4630  ;;  %v1807_v45 = vadd.f32 2.0, %v1551_v14  ;;  %v1553_v63 = vmul.f32 %v4625_v29, %v1297_v60  ;;  %3596 = vst [vmem:[#allocation5 + $0x7a8] sm:$0xff] %v3340_v24  ;;  %v1299_v37 = vadd.f32 2.0, %v4629_v39  ;;  %v3087_v48 = vmul.f32 %v1551_v14, %v7467_v9 }
 0x308   :  { %v4633_v16 = vpop.eup %4632  ;;  %v3342_v36 = vmul.f32 %v3086_v55, %v2830_v47  ;;  %v1808_v33 = vadd.f32 2.0, %v1552_v27  ;;  %v1554_v31 = vmul.f32 %v4627_v54, %v1298_v25  ;;  %3597 = vst [vmem:[#allocation5 + $0x7b0] sm:$0xff] %v3341_v59  ;;  %v1300_v1 = vadd.f32 2.0, %v4631_v38 }
 0x309   :  { %v4635_v53 = vpop.eup %4634  ;;  %4636 = vrcp.f32 %v1807_v45  ;;  %v1809_v40 = vadd.f32 2.0, %v1553_v63  ;;  %v1555_v6 = vmul.f32 %v4629_v39, %v1299_v37  ;;  %v1301_v50 = vadd.f32 2.0, %v4633_v16 }
 0x30a   :  { %3598 = vst [vmem:[#allocation5 + $0x7b8] sm:$0xff] %v3342_v36  ;;  %4638 = vrcp.f32 %v1808_v33  ;;  %v1810_v8 = vadd.f32 2.0, %v1554_v31  ;;  %v1302_v3 = vadd.f32 2.0, %v4635_v53  ;;  %v1556_v7 = vmul.f32 %v4631_v38, %v1300_v1 }
 0x30b   :  { %4640 = vrcp.f32 %v1809_v40  ;;  %v1811_v4 = vadd.f32 2.0, %v1555_v6  ;;  %v1557_v30 = vmul.f32 %v4633_v16, %v1301_v50  ;;  %v3088_v58 = vmul.f32 %v1552_v27, %v7483_v19 }
 0x30c   :  { %4642 = vrcp.f32 %v1810_v8  ;;  %v1558_v10 = vmul.f32 %v4635_v53, %v1302_v3  ;;  %v1812_v17 = vadd.f32 2.0, %v1556_v7  ;;  %v3089_v5 = vmul.f32 %v1553_v63, %v7485_v23 }
 0x30d   :  { %4644 = vrcp.f32 %v1811_v4  ;;  %v1813_v12 = vadd.f32 2.0, %v1557_v30  ;;  %v3090_v29 = vmul.f32 %v1554_v31, %v7487_v13  ;;  %v3091_v39 = vmul.f32 %v1555_v6, %v7495_v35 }
 0x30e   :  { %v1814_v0 = vadd.f32 2.0, %v1558_v10  ;;  %4646 = vrcp.f32 %v1812_v17  ;;  %v3092_v13 = vmul.f32 %v1556_v7, %v7506_v20  ;;  %v3093_v59 = vmul.f32 %v1557_v30, %v7514_v62 }
 0x30f   :  { %4648 = vrcp.f32 %v1813_v12  ;;  %v3094_v16 = vmul.f32 %v1558_v10, %v7516_v42 }
 0x310   :  { %4650 = vrcp.f32 %v1814_v0 }
 0x313   :  { %v4637_v15 = vpop.eup %4636 }
 0x314   :  { %v4639_v21 = vpop.eup %4638  ;;  %v2319_v11 = vmul.f32 %v4637_v15, %v1807_v45 }
 0x315   :  { %v4641_v61 = vpop.eup %4640  ;;  %v2320_v28 = vmul.f32 %v4639_v21, %v1808_v33 }
 0x316   :  { %v4643_v2 = vpop.eup %4642  ;;  %v2575_v22 = vsub.f32 2.0, %v2319_v11  ;;  %v2321_v56 = vmul.f32 %v4641_v61, %v1809_v40 }
 0x317   :  { %v2576_v49 = vsub.f32 2.0, %v2320_v28  ;;  %v2322_v46 = vmul.f32 %v4643_v2, %v1810_v8  ;;  %v4645_v18 = vpop.eup %4644 }
 0x318   :  { %v2831_v43 = vmul.f32 %v4637_v15, %v2575_v22  ;;  %v2577_v41 = vsub.f32 2.0, %v2321_v56  ;;  %v4647_v44 = vpop.eup %4646  ;;  %v2323_v32 = vmul.f32 %v4645_v18, %v1811_v4 }
 0x319   :  { %v2832_v57 = vmul.f32 %v4639_v21, %v2576_v49  ;;  %v2578_v51 = vsub.f32 2.0, %v2322_v46  ;;  %v4649_v54 = vpop.eup %4648  ;;  %v2324_v52 = vmul.f32 %v4647_v44, %v1812_v17 }
 0x31a   :  { %v3343_v34 = vmul.f32 %v3087_v48, %v2831_v43  ;;  %v2833_v55 = vmul.f32 %v4641_v61, %v2577_v41  ;;  %v4651_v14 = vpop.eup %4650  ;;  %v2579_v60 = vsub.f32 2.0, %v2323_v32  ;;  %v2325_v23 = vmul.f32 %v4649_v54, %v1813_v12 }
 0x31b   :  { %v3344_v9 = vmul.f32 %v3088_v58, %v2832_v57  ;;  %v2834_v26 = vmul.f32 %v4643_v2, %v2578_v51  ;;  %v2580_v47 = vsub.f32 2.0, %v2324_v52  ;;  %v2326_v27 = vmul.f32 %v4651_v14, %v1814_v0 }
 0x31c   :  { %3599 = vst [vmem:[#allocation5 + $0x7c0] sm:$0xff] %v3343_v34  ;;  %v3345_v19 = vmul.f32 %v3089_v5, %v2833_v55  ;;  %v2835_v25 = vmul.f32 %v4645_v18, %v2579_v60  ;;  %v2581_v38 = vsub.f32 2.0, %v2325_v23 }
 0x31d   :  { %3600 = vst [vmem:[#allocation5 + $0x7c8] sm:$0xff] %v3344_v9  ;;  %v3346_v24 = vmul.f32 %v3090_v29, %v2834_v26  ;;  %v2836_v45 = vmul.f32 %v4647_v44, %v2580_v47  ;;  %v2582_v63 = vsub.f32 2.0, %v2326_v27 }
 0x31e   :  { %3601 = vst [vmem:[#allocation5 + $0x7d0] sm:$0xff] %v3345_v19  ;;  %v3347_v36 = vmul.f32 %v3091_v39, %v2835_v25  ;;  %v2837_v33 = vmul.f32 %v4649_v54, %v2581_v38 }
 0x31f   :  { %3602 = vst [vmem:[#allocation5 + $0x7d8] sm:$0xff] %v3346_v24  ;;  %v3348_v35 = vmul.f32 %v3092_v13, %v2836_v45  ;;  %v2838_v31 = vmul.f32 %v4651_v14, %v2582_v63 }
 0x320   :  { %3603 = vst [vmem:[#allocation5 + $0x7e0] sm:$0xff] %v3347_v36  ;;  %v3349_v53 = vmul.f32 %v3093_v59, %v2837_v33 }
 0x321   :  { %3604 = vst [vmem:[#allocation5 + $0x7e8] sm:$0xff] %v3348_v35  ;;  %v3350_v20 = vmul.f32 %v3094_v16, %v2838_v31 }
 0x322   :  { %3605 = vst [vmem:[#allocation5 + $0x7f0] sm:$0xff] %v3349_v53 }
 0x323   :  { %3606 = vst [vmem:[#allocation5 + $0x7f8] sm:$0xff] %v3350_v20 }
 0x324   :  { %4685 = shalt.err (!%p4682_p12)
}
 0x325   :  { %s4686_s24 = scalar_lea.hbm %s7566_s1, 32768 }
 0x326   :  { %p4687_p13 = scmp.ne.s32.totalorder %s7566_s1, %s4686_s24  ;;  %p4690_p0 = scmp.lt.u32.totalorder %s4686_s24, %s7566_s1 }
 0x328   :  { %p4692_p1 = pnand %p4690_p0, %p4687_p13 }
 0x32a   :  { %4695 = shalt.err (!%p4692_p1)
}
 0x32b   :  { %3618 = dma.vmem_to_hbm [thread:$0]  %s3613_s20, 32768, %s7566_s1, [#allocation4], %s4701_s16, %s4701_s16, %s4702_s17  }
 0x32c   :  { %4698 = dma.done.wait [#allocation4], 32768  }
 0x32d   :  { %4699 = vsyncadd [#allocation4], 4294934528 }
 0x32e   :  { %3622 = vsyncpa [#allocation3], 1 }
 0x32f   :  { %3623 = vsyncpa [#allocation4], 1 }

</bundles_post_ra>
